<compile_context>
chip_gen: v7x
topology: tpu7x:2x2x1
jax: 0.10.0
libtpu: 0.0.40
codegen_flags: <defaults>
</compile_context>

<pallas_src>
import jax
import jax.numpy as jnp
import numpy as np
from jax import lax
from jax.experimental import pallas as pl
from jax.experimental.pallas import tpu as pltpu

BBLK = 8  # batch rows per grid block (one f32 vreg row-block)


# ----------------------------------------------------------------------------
# Fused Pallas kernel: wavefront 2-layer LSTM recurrence + FC, per batch block.
# ----------------------------------------------------------------------------
def lstm_lm_fused_kernel(x_ref,            # (T*Bb, E)   bf16  time-major embeds
                         wih1_ref,         # (E, 4H)     bf16
                         whh1_ref,         # (H, 4H)     bf16
                         b1_ref,           # (1, 4H)     f32   (b_ih + b_hh)
                         wih2_ref,         # (H, 4H)     bf16
                         whh2_ref,         # (H, 4H)     bf16
                         b2_ref,           # (1, 4H)     f32
                         fcw_ref,          # (H, V)      bf16
                         fcb_ref,          # (1, V)      f32
                         h0_ref,           # (2, Bb, H)  f32
                         c0_ref,           # (2, Bb, H)  f32
                         logits_ref,       # out (T*Bb, V)  f32
                         hn_ref,           # out (2, Bb, H) f32
                         cn_ref,           # out (2, Bb, H) f32
                         gx_sc,            # scratch (T*Bb, 4H) f32
                         h2seq_sc):        # scratch (T*Bb, H)  f32
    TB, H4 = gx_sc.shape
    H = h2seq_sc.shape[1]
    Bb = h0_ref.shape[1]
    T = TB // Bb

    # ---- Layer-1 non-recurrent input projection: ONE big MXU matmul, bias
    #      folded in once (never re-broadcast per step).
    gx_sc[...] = (jnp.dot(x_ref[...], wih1_ref[...],
                          preferred_element_type=jnp.float32)
                  + b1_ref[...])

    # Hoist the layer-2 bias broadcast out of the recurrence.
    b2b = jnp.broadcast_to(b2_ref[...], (Bb, H4))

    def gate_split(gates):
        i_g = jax.nn.sigmoid(gates[:, 0 * H:1 * H])
        f_g = jax.nn.sigmoid(gates[:, 1 * H:2 * H])
        g_g = jnp.tanh(gates[:, 2 * H:3 * H])
        o_g = jax.nn.sigmoid(gates[:, 3 * H:4 * H])
        return i_g, f_g, g_g, o_g

    def l1_step(t, h1, c1):
        off = pl.multiple_of(t * Bb, Bb)
        gates = gx_sc[pl.ds(off, Bb), :] + jnp.dot(
            h1.astype(jnp.bfloat16), whh1_ref[...],
            preferred_element_type=jnp.float32)
        i_g, f_g, g_g, o_g = gate_split(gates)
        c1n = f_g * c1 + i_g * g_g
        h1n = o_g * jnp.tanh(c1n)
        return h1n, c1n

    def l2_step(t_out, h1_in, h2, c2):
        gates = (jnp.dot(h1_in.astype(jnp.bfloat16), wih2_ref[...],
                         preferred_element_type=jnp.float32)
                 + jnp.dot(h2.astype(jnp.bfloat16), whh2_ref[...],
                           preferred_element_type=jnp.float32)
                 + b2b)
        i_g, f_g, g_g, o_g = gate_split(gates)
        c2n = f_g * c2 + i_g * g_g
        h2n = o_g * jnp.tanh(c2n)
        off = pl.multiple_of(t_out * Bb, Bb)
        h2seq_sc[pl.ds(off, Bb), :] = h2n          # f32 -> full-vreg stores
        return h2n, c2n

    h1 = h0_ref[0, :, :]
    c1 = c0_ref[0, :, :]
    h2 = h0_ref[1, :, :]
    c2 = c0_ref[1, :, :]

    # ---- Wavefront: prologue (layer-1 step 0), steady state (layer-2 step
    #      t-1 and layer-1 step t are independent per iteration), epilogue
    #      (layer-2 step T-1).
    h1, c1 = l1_step(0, h1, c1)

    def body(t, carry):
        h1, c1, h2, c2 = carry
        h2n, c2n = l2_step(t - 1, h1, h2, c2)      # consumes h1_{t-1}
        h1n, c1n = l1_step(t, h1, c1)              # produces h1_t
        return (h1n, c1n, h2n, c2n)

    unroll_amt = True if T <= 8 else 8             # bounded unroll at large T
    h1, c1, h2, c2 = lax.fori_loop(1, T, body, (h1, c1, h2, c2),
                                   unroll=unroll_amt)

    h2, c2 = l2_step(T - 1, h1, h2, c2)

    hn_ref[0, :, :] = h1
    cn_ref[0, :, :] = c1
    hn_ref[1, :, :] = h2
    cn_ref[1, :, :] = c2

    # ---- Fused FC projection: (T*Bb, H) @ (H, V) + (1, V).
    #      One-time bf16 cast of the whole slab feeds the MXU.
    logits_ref[...] = (jnp.dot(h2seq_sc[...].astype(jnp.bfloat16),
                               fcw_ref[...],
                               preferred_element_type=jnp.float32)
                       + fcb_ref[...])


def _nbytes(shape, itemsize):
    n = 1
    for s in shape:
        n *= s
    return n * itemsize


def _fused_call(x_blocks, w_ih1, w_hh1, b1, w_ih2, w_hh2, b2,
                fc_w, fc_b, h0, c0):
    nblk, TB, E = x_blocks.shape
    L, B, H = h0.shape
    V = fc_w.shape[-1]
    Bb = BBLK

    def const2(r, c):
        return pl.BlockSpec((r, c), lambda i: (0, 0))

    in_specs = [
        pl.BlockSpec((None, TB, E), lambda i: (i, 0, 0)),   # x (per batch blk)
        const2(E, 4 * H),                                   # w_ih1
        const2(H, 4 * H),                                   # w_hh1
        const2(1, 4 * H),                                   # b1
        const2(H, 4 * H),                                   # w_ih2
        const2(H, 4 * H),                                   # w_hh2
        const2(1, 4 * H),                                   # b2
        const2(H, V),                                       # fc_w
        const2(1, V),                                       # fc_b
        pl.BlockSpec((L, Bb, H), lambda i: (0, i, 0)),      # h0
        pl.BlockSpec((L, Bb, H), lambda i: (0, i, 0)),      # c0
    ]
    out_specs = [
        pl.BlockSpec((None, TB, V), lambda i: (i, 0, 0)),   # logits
        pl.BlockSpec((L, Bb, H), lambda i: (0, i, 0)),      # h_n
        pl.BlockSpec((L, Bb, H), lambda i: (0, i, 0)),      # c_n
    ]

    # Explicit VMEM budget (double-buffered blocks + scratch), clamped to the
    # smallest physical VMEM across generations (v7x: 64 MiB).
    blocks = [
        ((TB, E), 2),
        ((E, 4 * H), 2), ((H, 4 * H), 2), ((1, 4 * H), 4),
        ((H, 4 * H), 2), ((H, 4 * H), 2), ((1, 4 * H), 4),
        ((H, V), 2), ((1, V), 4),
        ((L, Bb, H), 4), ((L, Bb, H), 4),
        ((TB, V), 4), ((L, Bb, H), 4), ((L, Bb, H), 4),
    ]
    scratch = [((TB, 4 * H), 4), ((TB, H), 4)]
    est = (2 * sum(_nbytes(s, it) for s, it in blocks)
           + sum(_nbytes(s, it) for s, it in scratch)
           + (4 << 20))
    vmem_limit = int(min(max(est, 32 << 20), 64 << 20))

    grid_spec = pltpu.PrefetchScalarGridSpec(
        num_scalar_prefetch=0,
        grid=(nblk,),
        in_specs=in_specs,
        out_specs=out_specs,
        scratch_shapes=[
            pltpu.VMEM((TB, 4 * H), jnp.float32),   # hoisted layer-1 gates
            pltpu.VMEM((TB, H), jnp.float32),       # layer-2 hidden sequence
        ],
    )
    return pl.pallas_call(
        lstm_lm_fused_kernel,
        out_shape=(jax.ShapeDtypeStruct((nblk, TB, V), jnp.float32),
                   jax.ShapeDtypeStruct((L, B, H), jnp.float32),
                   jax.ShapeDtypeStruct((L, B, H), jnp.float32)),
        grid_spec=grid_spec,
        compiler_params=pltpu.CompilerParams(
            dimension_semantics=("parallel",),      # batch blocks -> megacore
            vmem_limit_bytes=vmem_limit),
    )(x_blocks, w_ih1, w_hh1, b1, w_ih2, w_hh2, b2, fc_w, fc_b, h0, c0)


# ----------------------------------------------------------------------------
# Public forward (batch-first API, matching the PyTorch module; eval mode)
# ----------------------------------------------------------------------------
def lstm_lm_forward(params, token_ids, hidden=None):
    """token_ids: (B, T) int32 -> (logits (B,T,V), (h_n (L,B,H), c_n (L,B,H)))."""
    emb = params["embedding"]                       # (vocab, E) f32
    B, T = token_ids.shape
    L = len(params["lstm"])
    assert L == 2, "fused kernel implements the module's num_layers=2"
    H = params["lstm"][0]["w_hh"].shape[0]
    E = emb.shape[1]
    V = params["fc_w"].shape[-1]
    Bb = BBLK
    # Layout preconditions (fail loudly rather than trip the (8,128) rule).
    assert B % Bb == 0 and E % 128 == 0 and H % 128 == 0 and V % 128 == 0
    nblk = B // Bb

    # Gather embeddings directly in (batch-block, time, batch-in-block) order:
    # only the tiny id tensor is transposed, never the activation slab.
    ids = token_ids.reshape(nblk, Bb, T).transpose(0, 2, 1)   # (nblk, T, Bb)
    x = jnp.take(emb, ids, axis=0)                            # (nblk, T, Bb, E)
    x_blocks = x.reshape(nblk, T * Bb, E).astype(jnp.bfloat16)

    if hidden is None:
        h0 = jnp.zeros((L, B, H), jnp.float32)
        c0 = jnp.zeros((L, B, H), jnp.float32)
    else:
        h0, c0 = hidden

    p1, p2 = params["lstm"]
    bf = lambda a: a.astype(jnp.bfloat16)
    logits_blk, h_n, c_n = _fused_call(
        x_blocks,
        bf(p1["w_ih"]), bf(p1["w_hh"]), p1["b"],
        bf(p2["w_ih"]), bf(p2["w_hh"]), p2["b"],
        bf(params["fc_w"]), params["fc_b"],
        h0, c0)

    # Caller contract is batch_first=True -> reorder back to (B, T, V).
    logits = (logits_blk.reshape(nblk, T, Bb, V)
              .transpose(0, 2, 1, 3).reshape(B, T, V))
    return logits, (h_n, c_n)


# ----------------------------------------------------------------------------
# Deterministic parameter construction (PyTorch-like, transposed for TPU)
# ----------------------------------------------------------------------------
def init_params(key, vocab_size, embedding_dim, hidden_dim, num_layers):
    keys = jax.random.split(key, 4 + 4 * num_layers)
    ki = iter(keys)
    scale = 1.0 / np.sqrt(hidden_dim)

    params = {
        "embedding": 0.1 * jax.random.normal(
            next(ki), (vocab_size, embedding_dim), jnp.float32),
        "lstm": [],
        # PyTorch fc.weight is (V, H); stored transposed (H, V).
        "fc_w": jax.random.uniform(next(ki), (hidden_dim, vocab_size),
                                   jnp.float32, -scale, scale),
        "fc_b": jax.random.uniform(next(ki), (1, vocab_size),
                                   jnp.float32, -scale, scale),
    }
    for l in range(num_layers):
        d_in = embedding_dim if l == 0 else hidden_dim
        # PyTorch weight_ih_l{l}: (4H, d_in); stored transposed (d_in, 4H).
        w_ih = jax.random.uniform(next(ki), (d_in, 4 * hidden_dim),
                                  jnp.float32, -scale, scale)
        w_hh = jax.random.uniform(next(ki), (hidden_dim, 4 * hidden_dim),
                                  jnp.float32, -scale, scale)
        b_ih = jax.random.uniform(next(ki), (4 * hidden_dim,),
                                  jnp.float32, -scale, scale)
        b_hh = jax.random.uniform(next(ki), (4 * hidden_dim,),
                                  jnp.float32, -scale, scale)
        params["lstm"].append({
            "w_ih": w_ih,
            "w_hh": w_hh,
            "b": (b_ih + b_hh).reshape(1, 4 * hidden_dim),
        })
    return params


# ----------------------------------------------------------------------------
# Pure-JAX f32 reference (sanity check)
# ----------------------------------------------------------------------------
def lstm_lm_reference(params, token_ids):
    emb = params["embedding"]
    B, T = token_ids.shape
    L = len(params["lstm"])
    H = params["lstm"][0]["w_hh"].shape[0]
    x = jnp.take(emb, token_ids, axis=0)            # (B, T, E)

    h_finals, c_finals = [], []
    for l in range(L):
        p = params["lstm"][l]
        h = jnp.zeros((B, H), jnp.float32)
        c = jnp.zeros((B, H), jnp.float32)
        outs = []
        for t in range(T):
            gates = x[:, t, :] @ p["w_ih"] + h @ p["w_hh"] + p["b"]
            i_g = jax.nn.sigmoid(gates[:, 0 * H:1 * H])
            f_g = jax.nn.sigmoid(gates[:, 1 * H:2 * H])
            g_g = jnp.tanh(gates[:, 2 * H:3 * H])
            o_g = jax.nn.sigmoid(gates[:, 3 * H:4 * H])
            c = f_g * c + i_g * g_g
            h = o_g * jnp.tanh(c)
            outs.append(h)
        x = jnp.stack(outs, axis=1)                 # (B, T, H)
        h_finals.append(h)
        c_finals.append(c)
    logits = x @ params["fc_w"] + params["fc_b"]
    return logits, (jnp.stack(h_finals), jnp.stack(c_finals))


# ----------------------------------------------------------------------------
if __name__ == "__main__":
    # Small, TPU-tile-friendly shapes consistent with the module's forward.
    # B=16 -> two batch blocks -> exercises the "parallel" grid axis (megacore
    # on v7x, DMA/compute overlap between blocks everywhere).
    VOCAB, EMB, HID, LAYERS = 128, 128, 128, 2
    B, T = 16, 8

    key = jax.random.PRNGKey(0)
    k_params, k_tokens = jax.random.split(key)
    params = init_params(k_params, VOCAB, EMB, HID, LAYERS)
    token_ids = jax.random.randint(k_tokens, (B, T), 0, VOCAB, dtype=jnp.int32)

    logits, (h_n, c_n) = jax.block_until_ready(
        lstm_lm_forward(params, token_ids))

    assert logits.shape == (B, T, VOCAB)
    assert h_n.shape == (LAYERS, B, HID) and c_n.shape == (LAYERS, B, HID)

    ref_logits, (ref_h, ref_c) = lstm_lm_reference(params, token_ids)
    np.testing.assert_allclose(np.asarray(logits), np.asarray(ref_logits),
                               atol=2e-2, rtol=2e-2)
    np.testing.assert_allclose(np.asarray(h_n), np.asarray(ref_h),
                               atol=2e-2, rtol=2e-2)
    np.testing.assert_allclose(np.asarray(c_n), np.asarray(ref_c),
                               atol=2e-2, rtol=2e-2)

    print("KERNEL_OK")
</pallas_src>

<mosaic_0001>
module attributes {stable_mosaic.version = 11 : i64} {
  func.func @lstm_lm_fused_kernel(%arg0: i32, %arg1: memref<1x64x128xbf16, #tpu.memory_space<vmem>>, %arg2: memref<128x512xbf16, #tpu.memory_space<vmem>>, %arg3: memref<128x512xbf16, #tpu.memory_space<vmem>>, %arg4: memref<1x512xf32, #tpu.memory_space<vmem>>, %arg5: memref<128x512xbf16, #tpu.memory_space<vmem>>, %arg6: memref<128x512xbf16, #tpu.memory_space<vmem>>, %arg7: memref<1x512xf32, #tpu.memory_space<vmem>>, %arg8: memref<128x128xbf16, #tpu.memory_space<vmem>>, %arg9: memref<1x128xf32, #tpu.memory_space<vmem>>, %arg10: memref<2x8x128xf32, #tpu.memory_space<vmem>>, %arg11: memref<2x8x128xf32, #tpu.memory_space<vmem>>, %arg12: memref<1x64x128xf32, #tpu.memory_space<vmem>>, %arg13: memref<2x8x128xf32, #tpu.memory_space<vmem>>, %arg14: memref<2x8x128xf32, #tpu.memory_space<vmem>>, %arg15: memref<64x512xf32, #tpu.memory_space<vmem>>, %arg16: memref<64x128xf32, #tpu.memory_space<vmem>>) attributes {dimension_semantics = [#tpu.dimension_semantics<parallel>], iteration_bounds = array<i64: 2>, scalar_prefetch = 0 : i64, scratch_operands = 2 : i64, tpu.core_type = #tpu.core_type<tc>, window_params = [{transform_indices = @transform_0, window_bounds = array<i64: 1, 64, 128>}, {pipeline_mode = #tpu.pipeline_mode<synchronous>, transform_indices = @transform_1, window_bounds = array<i64: 128, 512>}, {pipeline_mode = #tpu.pipeline_mode<synchronous>, transform_indices = @transform_2, window_bounds = array<i64: 128, 512>}, {pipeline_mode = #tpu.pipeline_mode<synchronous>, transform_indices = @transform_3, window_bounds = array<i64: 1, 512>}, {pipeline_mode = #tpu.pipeline_mode<synchronous>, transform_indices = @transform_4, window_bounds = array<i64: 128, 512>}, {pipeline_mode = #tpu.pipeline_mode<synchronous>, transform_indices = @transform_5, window_bounds = array<i64: 128, 512>}, {pipeline_mode = #tpu.pipeline_mode<synchronous>, transform_indices = @transform_6, window_bounds = array<i64: 1, 512>}, {pipeline_mode = #tpu.pipeline_mode<synchronous>, transform_indices = @transform_7, window_bounds = array<i64: 128, 128>}, {pipeline_mode = #tpu.pipeline_mode<synchronous>, transform_indices = @transform_8, window_bounds = array<i64: 1, 128>}, {transform_indices = @transform_9, window_bounds = array<i64: 2, 8, 128>}, {transform_indices = @transform_10, window_bounds = array<i64: 2, 8, 128>}, {transform_indices = @transform_11, window_bounds = array<i64: 1, 64, 128>}, {transform_indices = @transform_12, window_bounds = array<i64: 2, 8, 128>}, {transform_indices = @transform_13, window_bounds = array<i64: 2, 8, 128>}]} {
    %c0 = arith.constant 0 : index
    %c0_0 = arith.constant 0 : index
    %c0_1 = arith.constant 0 : index
    %0 = vector.load %arg1[%c0, %c0_0, %c0_1] : memref<1x64x128xbf16, #tpu.memory_space<vmem>>, vector<1x64x128xbf16>
    %1 = vector.shape_cast %0 : vector<1x64x128xbf16> to vector<64x128xbf16>
    %c0_2 = arith.constant 0 : index
    %c0_3 = arith.constant 0 : index
    %2 = vector.load %arg2[%c0_2, %c0_3] : memref<128x512xbf16, #tpu.memory_space<vmem>>, vector<128x512xbf16>
    %cst = arith.constant dense<0.000000e+00> : vector<64x512xf32>
    %3 = tpu.matmul %1, %2, %cst {dimension_numbers = #tpu.dot_dimension_numbers<[1], [0], [0], [1], [0, 0, 1, 1], [], []>} : vector<64x128xbf16>, vector<128x512xbf16>, vector<64x512xf32> -> vector<64x512xf32>
    %c0_4 = arith.constant 0 : index
    %c0_5 = arith.constant 0 : index
    %4 = vector.load %arg4[%c0_4, %c0_5] : memref<1x512xf32, #tpu.memory_space<vmem>>, vector<1x512xf32>
    %5 = vector.broadcast %4 : vector<1x512xf32> to vector<64x512xf32>
    %6 = arith.addf %3, %5 : vector<64x512xf32>
    %c0_6 = arith.constant 0 : index
    %c0_7 = arith.constant 0 : index
    %7 = vector.load %arg15[%c0_6, %c0_7] : memref<64x512xf32, #tpu.memory_space<vmem>>, vector<64x512xf32>
    tpu.vector_store %arg15[%c0_6, %c0_7], %6 {strides = array<i32>} : memref<64x512xf32, #tpu.memory_space<vmem>>, vector<64x512xf32>,
    %c0_8 = arith.constant 0 : index
    %c0_9 = arith.constant 0 : index
    %8 = vector.load %arg7[%c0_8, %c0_9] : memref<1x512xf32, #tpu.memory_space<vmem>>, vector<1x512xf32>
    %9 = vector.shape_cast %8 : vector<1x512xf32> to vector<1x512xf32>
    %10 = vector.broadcast %9 : vector<1x512xf32> to vector<8x512xf32>
    %c0_10 = arith.constant 0 : index
    %c0_11 = arith.constant 0 : index
    %c0_12 = arith.constant 0 : index
    %11 = vector.load %arg10[%c0_10, %c0_11, %c0_12] : memref<2x8x128xf32, #tpu.memory_space<vmem>>, vector<1x8x128xf32>
    %12 = vector.shape_cast %11 : vector<1x8x128xf32> to vector<8x128xf32>
    %c0_13 = arith.constant 0 : index
    %c0_14 = arith.constant 0 : index
    %c0_15 = arith.constant 0 : index
    %13 = vector.load %arg11[%c0_13, %c0_14, %c0_15] : memref<2x8x128xf32, #tpu.memory_space<vmem>>, vector<1x8x128xf32>
    %14 = vector.shape_cast %13 : vector<1x8x128xf32> to vector<8x128xf32>
    %c1 = arith.constant 1 : index
    %c0_16 = arith.constant 0 : index
    %c0_17 = arith.constant 0 : index
    %15 = vector.load %arg10[%c1, %c0_16, %c0_17] : memref<2x8x128xf32, #tpu.memory_space<vmem>>, vector<1x8x128xf32>
    %16 = vector.shape_cast %15 : vector<1x8x128xf32> to vector<8x128xf32>
    %c1_18 = arith.constant 1 : index
    %c0_19 = arith.constant 0 : index
    %c0_20 = arith.constant 0 : index
    %17 = vector.load %arg11[%c1_18, %c0_19, %c0_20] : memref<2x8x128xf32, #tpu.memory_space<vmem>>, vector<1x8x128xf32>
    %18 = vector.shape_cast %17 : vector<1x8x128xf32> to vector<8x128xf32>
    %c0_i32 = arith.constant 0 : i32
    %19 = tpu.assume_multiple %c0_i32, 8 : i32
    %20 = arith.index_cast %19 : i32 to index
    %c0_21 = arith.constant 0 : index
    %21 = vector.load %arg15[%20, %c0_21] : memref<64x512xf32, #tpu.memory_space<vmem>>, vector<8x512xf32>
    %22 = arith.truncf %12 : vector<8x128xf32> to vector<8x128xbf16>
    %c0_22 = arith.constant 0 : index
    %c0_23 = arith.constant 0 : index
    %23 = vector.load %arg3[%c0_22, %c0_23] : memref<128x512xbf16, #tpu.memory_space<vmem>>, vector<128x512xbf16>
    %cst_24 = arith.constant dense<0.000000e+00> : vector<8x512xf32>
    %24 = tpu.matmul %22, %23, %cst_24 {dimension_numbers = #tpu.dot_dimension_numbers<[1], [0], [0], [1], [0, 0, 1, 1], [], []>} : vector<8x128xbf16>, vector<128x512xbf16>, vector<8x512xf32> -> vector<8x512xf32>
    %25 = arith.addf %21, %24 : vector<8x512xf32>
    %26 = vector.extract_strided_slice %25 {offsets = [0, 0], sizes = [8, 128], strides = [1, 1]} : vector<8x512xf32> to vector<8x128xf32>
    %27 = arith.negf %26 : vector<8x128xf32>
    %28 = math.exp %27 : vector<8x128xf32>
    %cst_25 = arith.constant 1.000000e+00 : f32
    %29 = vector.broadcast %cst_25 : f32 to vector<8x128xf32>
    %30 = arith.addf %29, %28 : vector<8x128xf32>
    %31 = arith.divf %29, %30 : vector<8x128xf32>
    %32 = vector.extract_strided_slice %25 {offsets = [0, 128], sizes = [8, 128], strides = [1, 1]} : vector<8x512xf32> to vector<8x128xf32>
    %33 = arith.negf %32 : vector<8x128xf32>
    %34 = math.exp %33 : vector<8x128xf32>
    %cst_26 = arith.constant 1.000000e+00 : f32
    %35 = vector.broadcast %cst_26 : f32 to vector<8x128xf32>
    %36 = arith.addf %35, %34 : vector<8x128xf32>
    %37 = arith.divf %35, %36 : vector<8x128xf32>
    %38 = vector.extract_strided_slice %25 {offsets = [0, 256], sizes = [8, 128], strides = [1, 1]} : vector<8x512xf32> to vector<8x128xf32>
    %39 = math.tanh %38 : vector<8x128xf32>
    %40 = vector.extract_strided_slice %25 {offsets = [0, 384], sizes = [8, 128], strides = [1, 1]} : vector<8x512xf32> to vector<8x128xf32>
    %41 = arith.negf %40 : vector<8x128xf32>
    %42 = math.exp %41 : vector<8x128xf32>
    %cst_27 = arith.constant 1.000000e+00 : f32
    %43 = vector.broadcast %cst_27 : f32 to vector<8x128xf32>
    %44 = arith.addf %43, %42 : vector<8x128xf32>
    %45 = arith.divf %43, %44 : vector<8x128xf32>
    %46 = arith.mulf %37, %14 : vector<8x128xf32>
    %47 = arith.mulf %31, %39 : vector<8x128xf32>
    %48 = arith.addf %46, %47 : vector<8x128xf32>
    %49 = math.tanh %48 : vector<8x128xf32>
    %50 = arith.mulf %45, %49 : vector<8x128xf32>
    %c1_i32 = arith.constant 1 : i32
    %c1_i32_28 = arith.constant 1 : i32
    %51 = arith.subi %c1_i32, %c1_i32_28 : i32
    %52 = arith.truncf %50 : vector<8x128xf32> to vector<8x128xbf16>
    %c0_29 = arith.constant 0 : index
    %c0_30 = arith.constant 0 : index
    %53 = vector.load %arg5[%c0_29, %c0_30] : memref<128x512xbf16, #tpu.memory_space<vmem>>, vector<128x512xbf16>
    %cst_31 = arith.constant dense<0.000000e+00> : vector<8x512xf32>
    %54 = tpu.matmul %52, %53, %cst_31 {dimension_numbers = #tpu.dot_dimension_numbers<[1], [0], [0], [1], [0, 0, 1, 1], [], []>} : vector<8x128xbf16>, vector<128x512xbf16>, vector<8x512xf32> -> vector<8x512xf32>
    %55 = arith.truncf %16 : vector<8x128xf32> to vector<8x128xbf16>
    %c0_32 = arith.constant 0 : index
    %c0_33 = arith.constant 0 : index
    %56 = vector.load %arg6[%c0_32, %c0_33] : memref<128x512xbf16, #tpu.memory_space<vmem>>, vector<128x512xbf16>
    %cst_34 = arith.constant dense<0.000000e+00> : vector<8x512xf32>
    %57 = tpu.matmul %55, %56, %cst_34 {dimension_numbers = #tpu.dot_dimension_numbers<[1], [0], [0], [1], [0, 0, 1, 1], [], []>} : vector<8x128xbf16>, vector<128x512xbf16>, vector<8x512xf32> -> vector<8x512xf32>
    %58 = arith.addf %54, %57 : vector<8x512xf32>
    %59 = arith.addf %58, %10 : vector<8x512xf32>
    %60 = vector.extract_strided_slice %59 {offsets = [0, 0], sizes = [8, 128], strides = [1, 1]} : vector<8x512xf32> to vector<8x128xf32>
    %61 = arith.negf %60 : vector<8x128xf32>
    %62 = math.exp %61 : vector<8x128xf32>
    %cst_35 = arith.constant 1.000000e+00 : f32
    %63 = vector.broadcast %cst_35 : f32 to vector<8x128xf32>
    %64 = arith.addf %63, %62 : vector<8x128xf32>
    %65 = arith.divf %63, %64 : vector<8x128xf32>
    %66 = vector.extract_strided_slice %59 {offsets = [0, 128], sizes = [8, 128], strides = [1, 1]} : vector<8x512xf32> to vector<8x128xf32>
    %67 = arith.negf %66 : vector<8x128xf32>
    %68 = math.exp %67 : vector<8x128xf32>
    %cst_36 = arith.constant 1.000000e+00 : f32
    %69 = vector.broadcast %cst_36 : f32 to vector<8x128xf32>
    %70 = arith.addf %69, %68 : vector<8x128xf32>
    %71 = arith.divf %69, %70 : vector<8x128xf32>
    %72 = vector.extract_strided_slice %59 {offsets = [0, 256], sizes = [8, 128], strides = [1, 1]} : vector<8x512xf32> to vector<8x128xf32>
    %73 = math.tanh %72 : vector<8x128xf32>
    %74 = vector.extract_strided_slice %59 {offsets = [0, 384], sizes = [8, 128], strides = [1, 1]} : vector<8x512xf32> to vector<8x128xf32>
    %75 = arith.negf %74 : vector<8x128xf32>
    %76 = math.exp %75 : vector<8x128xf32>
    %cst_37 = arith.constant 1.000000e+00 : f32
    %77 = vector.broadcast %cst_37 : f32 to vector<8x128xf32>
    %78 = arith.addf %77, %76 : vector<8x128xf32>
    %79 = arith.divf %77, %78 : vector<8x128xf32>
    %80 = arith.mulf %71, %18 : vector<8x128xf32>
    %81 = arith.mulf %65, %73 : vector<8x128xf32>
    %82 = arith.addf %80, %81 : vector<8x128xf32>
    %83 = math.tanh %82 : vector<8x128xf32>
    %84 = arith.mulf %79, %83 : vector<8x128xf32>
    %c8_i32 = arith.constant 8 : i32
    %85 = arith.muli %51, %c8_i32 : i32
    %86 = tpu.assume_multiple %85, 8 : i32
    %87 = arith.index_cast %86 : i32 to index
    %c0_38 = arith.constant 0 : index
    %88 = vector.load %arg16[%87, %c0_38] : memref<64x128xf32, #tpu.memory_space<vmem>>, vector<8x128xf32>
    tpu.vector_store %arg16[%87, %c0_38], %84 {strides = array<i32>} : memref<64x128xf32, #tpu.memory_space<vmem>>, vector<8x128xf32>,
    %c8_i32_39 = arith.constant 8 : i32
    %89 = arith.muli %c1_i32, %c8_i32_39 : i32
    %90 = tpu.assume_multiple %89, 8 : i32
    %91 = arith.index_cast %90 : i32 to index
    %c0_40 = arith.constant 0 : index
    %92 = vector.load %arg15[%91, %c0_40] : memref<64x512xf32, #tpu.memory_space<vmem>>, vector<8x512xf32>
    %93 = arith.truncf %50 : vector<8x128xf32> to vector<8x128xbf16>
    %c0_41 = arith.constant 0 : index
    %c0_42 = arith.constant 0 : index
    %94 = vector.load %arg3[%c0_41, %c0_42] : memref<128x512xbf16, #tpu.memory_space<vmem>>, vector<128x512xbf16>
    %cst_43 = arith.constant dense<0.000000e+00> : vector<8x512xf32>
    %95 = tpu.matmul %93, %94, %cst_43 {dimension_numbers = #tpu.dot_dimension_numbers<[1], [0], [0], [1], [0, 0, 1, 1], [], []>} : vector<8x128xbf16>, vector<128x512xbf16>, vector<8x512xf32> -> vector<8x512xf32>
    %96 = arith.addf %92, %95 : vector<8x512xf32>
    %97 = vector.extract_strided_slice %96 {offsets = [0, 0], sizes = [8, 128], strides = [1, 1]} : vector<8x512xf32> to vector<8x128xf32>
    %98 = arith.negf %97 : vector<8x128xf32>
    %99 = math.exp %98 : vector<8x128xf32>
    %cst_44 = arith.constant 1.000000e+00 : f32
    %100 = vector.broadcast %cst_44 : f32 to vector<8x128xf32>
    %101 = arith.addf %100, %99 : vector<8x128xf32>
    %102 = arith.divf %100, %101 : vector<8x128xf32>
    %103 = vector.extract_strided_slice %96 {offsets = [0, 128], sizes = [8, 128], strides = [1, 1]} : vector<8x512xf32> to vector<8x128xf32>
    %104 = arith.negf %103 : vector<8x128xf32>
    %105 = math.exp %104 : vector<8x128xf32>
    %cst_45 = arith.constant 1.000000e+00 : f32
    %106 = vector.broadcast %cst_45 : f32 to vector<8x128xf32>
    %107 = arith.addf %106, %105 : vector<8x128xf32>
    %108 = arith.divf %106, %107 : vector<8x128xf32>
    %109 = vector.extract_strided_slice %96 {offsets = [0, 256], sizes = [8, 128], strides = [1, 1]} : vector<8x512xf32> to vector<8x128xf32>
    %110 = math.tanh %109 : vector<8x128xf32>
    %111 = vector.extract_strided_slice %96 {offsets = [0, 384], sizes = [8, 128], strides = [1, 1]} : vector<8x512xf32> to vector<8x128xf32>
    %112 = arith.negf %111 : vector<8x128xf32>
    %113 = math.exp %112 : vector<8x128xf32>
    %cst_46 = arith.constant 1.000000e+00 : f32
    %114 = vector.broadcast %cst_46 : f32 to vector<8x128xf32>
    %115 = arith.addf %114, %113 : vector<8x128xf32>
    %116 = arith.divf %114, %115 : vector<8x128xf32>
    %117 = arith.mulf %108, %48 : vector<8x128xf32>
    %118 = arith.mulf %102, %110 : vector<8x128xf32>
    %119 = arith.addf %117, %118 : vector<8x128xf32>
    %120 = math.tanh %119 : vector<8x128xf32>
    %121 = arith.mulf %116, %120 : vector<8x128xf32>
    %c2_i32 = arith.constant 2 : i32
    %c1_i32_47 = arith.constant 1 : i32
    %122 = arith.subi %c2_i32, %c1_i32_47 : i32
    %123 = arith.truncf %121 : vector<8x128xf32> to vector<8x128xbf16>
    %c0_48 = arith.constant 0 : index
    %c0_49 = arith.constant 0 : index
    %124 = vector.load %arg5[%c0_48, %c0_49] : memref<128x512xbf16, #tpu.memory_space<vmem>>, vector<128x512xbf16>
    %cst_50 = arith.constant dense<0.000000e+00> : vector<8x512xf32>
    %125 = tpu.matmul %123, %124, %cst_50 {dimension_numbers = #tpu.dot_dimension_numbers<[1], [0], [0], [1], [0, 0, 1, 1], [], []>} : vector<8x128xbf16>, vector<128x512xbf16>, vector<8x512xf32> -> vector<8x512xf32>
    %126 = arith.truncf %84 : vector<8x128xf32> to vector<8x128xbf16>
    %c0_51 = arith.constant 0 : index
    %c0_52 = arith.constant 0 : index
    %127 = vector.load %arg6[%c0_51, %c0_52] : memref<128x512xbf16, #tpu.memory_space<vmem>>, vector<128x512xbf16>
    %cst_53 = arith.constant dense<0.000000e+00> : vector<8x512xf32>
    %128 = tpu.matmul %126, %127, %cst_53 {dimension_numbers = #tpu.dot_dimension_numbers<[1], [0], [0], [1], [0, 0, 1, 1], [], []>} : vector<8x128xbf16>, vector<128x512xbf16>, vector<8x512xf32> -> vector<8x512xf32>
    %129 = arith.addf %125, %128 : vector<8x512xf32>
    %130 = arith.addf %129, %10 : vector<8x512xf32>
    %131 = vector.extract_strided_slice %130 {offsets = [0, 0], sizes = [8, 128], strides = [1, 1]} : vector<8x512xf32> to vector<8x128xf32>
    %132 = arith.negf %131 : vector<8x128xf32>
    %133 = math.exp %132 : vector<8x128xf32>
    %cst_54 = arith.constant 1.000000e+00 : f32
    %134 = vector.broadcast %cst_54 : f32 to vector<8x128xf32>
    %135 = arith.addf %134, %133 : vector<8x128xf32>
    %136 = arith.divf %134, %135 : vector<8x128xf32>
    %137 = vector.extract_strided_slice %130 {offsets = [0, 128], sizes = [8, 128], strides = [1, 1]} : vector<8x512xf32> to vector<8x128xf32>
    %138 = arith.negf %137 : vector<8x128xf32>
    %139 = math.exp %138 : vector<8x128xf32>
    %cst_55 = arith.constant 1.000000e+00 : f32
    %140 = vector.broadcast %cst_55 : f32 to vector<8x128xf32>
    %141 = arith.addf %140, %139 : vector<8x128xf32>
    %142 = arith.divf %140, %141 : vector<8x128xf32>
    %143 = vector.extract_strided_slice %130 {offsets = [0, 256], sizes = [8, 128], strides = [1, 1]} : vector<8x512xf32> to vector<8x128xf32>
    %144 = math.tanh %143 : vector<8x128xf32>
    %145 = vector.extract_strided_slice %130 {offsets = [0, 384], sizes = [8, 128], strides = [1, 1]} : vector<8x512xf32> to vector<8x128xf32>
    %146 = arith.negf %145 : vector<8x128xf32>
    %147 = math.exp %146 : vector<8x128xf32>
    %cst_56 = arith.constant 1.000000e+00 : f32
    %148 = vector.broadcast %cst_56 : f32 to vector<8x128xf32>
    %149 = arith.addf %148, %147 : vector<8x128xf32>
    %150 = arith.divf %148, %149 : vector<8x128xf32>
    %151 = arith.mulf %142, %82 : vector<8x128xf32>
    %152 = arith.mulf %136, %144 : vector<8x128xf32>
    %153 = arith.addf %151, %152 : vector<8x128xf32>
    %154 = math.tanh %153 : vector<8x128xf32>
    %155 = arith.mulf %150, %154 : vector<8x128xf32>
    %c8_i32_57 = arith.constant 8 : i32
    %156 = arith.muli %122, %c8_i32_57 : i32
    %157 = tpu.assume_multiple %156, 8 : i32
    %158 = arith.index_cast %157 : i32 to index
    %c0_58 = arith.constant 0 : index
    %159 = vector.load %arg16[%158, %c0_58] : memref<64x128xf32, #tpu.memory_space<vmem>>, vector<8x128xf32>
    tpu.vector_store %arg16[%158, %c0_58], %155 {strides = array<i32>} : memref<64x128xf32, #tpu.memory_space<vmem>>, vector<8x128xf32>,
    %c8_i32_59 = arith.constant 8 : i32
    %160 = arith.muli %c2_i32, %c8_i32_59 : i32
    %161 = tpu.assume_multiple %160, 8 : i32
    %162 = arith.index_cast %161 : i32 to index
    %c0_60 = arith.constant 0 : index
    %163 = vector.load %arg15[%162, %c0_60] : memref<64x512xf32, #tpu.memory_space<vmem>>, vector<8x512xf32>
    %164 = arith.truncf %121 : vector<8x128xf32> to vector<8x128xbf16>
    %c0_61 = arith.constant 0 : index
    %c0_62 = arith.constant 0 : index
    %165 = vector.load %arg3[%c0_61, %c0_62] : memref<128x512xbf16, #tpu.memory_space<vmem>>, vector<128x512xbf16>
    %cst_63 = arith.constant dense<0.000000e+00> : vector<8x512xf32>
    %166 = tpu.matmul %164, %165, %cst_63 {dimension_numbers = #tpu.dot_dimension_numbers<[1], [0], [0], [1], [0, 0, 1, 1], [], []>} : vector<8x128xbf16>, vector<128x512xbf16>, vector<8x512xf32> -> vector<8x512xf32>
    %167 = arith.addf %163, %166 : vector<8x512xf32>
    %168 = vector.extract_strided_slice %167 {offsets = [0, 0], sizes = [8, 128], strides = [1, 1]} : vector<8x512xf32> to vector<8x128xf32>
    %169 = arith.negf %168 : vector<8x128xf32>
    %170 = math.exp %169 : vector<8x128xf32>
    %cst_64 = arith.constant 1.000000e+00 : f32
    %171 = vector.broadcast %cst_64 : f32 to vector<8x128xf32>
    %172 = arith.addf %171, %170 : vector<8x128xf32>
    %173 = arith.divf %171, %172 : vector<8x128xf32>
    %174 = vector.extract_strided_slice %167 {offsets = [0, 128], sizes = [8, 128], strides = [1, 1]} : vector<8x512xf32> to vector<8x128xf32>
    %175 = arith.negf %174 : vector<8x128xf32>
    %176 = math.exp %175 : vector<8x128xf32>
    %cst_65 = arith.constant 1.000000e+00 : f32
    %177 = vector.broadcast %cst_65 : f32 to vector<8x128xf32>
    %178 = arith.addf %177, %176 : vector<8x128xf32>
    %179 = arith.divf %177, %178 : vector<8x128xf32>
    %180 = vector.extract_strided_slice %167 {offsets = [0, 256], sizes = [8, 128], strides = [1, 1]} : vector<8x512xf32> to vector<8x128xf32>
    %181 = math.tanh %180 : vector<8x128xf32>
    %182 = vector.extract_strided_slice %167 {offsets = [0, 384], sizes = [8, 128], strides = [1, 1]} : vector<8x512xf32> to vector<8x128xf32>
    %183 = arith.negf %182 : vector<8x128xf32>
    %184 = math.exp %183 : vector<8x128xf32>
    %cst_66 = arith.constant 1.000000e+00 : f32
    %185 = vector.broadcast %cst_66 : f32 to vector<8x128xf32>
    %186 = arith.addf %185, %184 : vector<8x128xf32>
    %187 = arith.divf %185, %186 : vector<8x128xf32>
    %188 = arith.mulf %179, %119 : vector<8x128xf32>
    %189 = arith.mulf %173, %181 : vector<8x128xf32>
    %190 = arith.addf %188, %189 : vector<8x128xf32>
    %191 = math.tanh %190 : vector<8x128xf32>
    %192 = arith.mulf %187, %191 : vector<8x128xf32>
    %c3_i32 = arith.constant 3 : i32
    %c1_i32_67 = arith.constant 1 : i32
    %193 = arith.subi %c3_i32, %c1_i32_67 : i32
    %194 = arith.truncf %192 : vector<8x128xf32> to vector<8x128xbf16>
    %c0_68 = arith.constant 0 : index
    %c0_69 = arith.constant 0 : index
    %195 = vector.load %arg5[%c0_68, %c0_69] : memref<128x512xbf16, #tpu.memory_space<vmem>>, vector<128x512xbf16>
    %cst_70 = arith.constant dense<0.000000e+00> : vector<8x512xf32>
    %196 = tpu.matmul %194, %195, %cst_70 {dimension_numbers = #tpu.dot_dimension_numbers<[1], [0], [0], [1], [0, 0, 1, 1], [], []>} : vector<8x128xbf16>, vector<128x512xbf16>, vector<8x512xf32> -> vector<8x512xf32>
    %197 = arith.truncf %155 : vector<8x128xf32> to vector<8x128xbf16>
    %c0_71 = arith.constant 0 : index
    %c0_72 = arith.constant 0 : index
    %198 = vector.load %arg6[%c0_71, %c0_72] : memref<128x512xbf16, #tpu.memory_space<vmem>>, vector<128x512xbf16>
    %cst_73 = arith.constant dense<0.000000e+00> : vector<8x512xf32>
    %199 = tpu.matmul %197, %198, %cst_73 {dimension_numbers = #tpu.dot_dimension_numbers<[1], [0], [0], [1], [0, 0, 1, 1], [], []>} : vector<8x128xbf16>, vector<128x512xbf16>, vector<8x512xf32> -> vector<8x512xf32>
    %200 = arith.addf %196, %199 : vector<8x512xf32>
    %201 = arith.addf %200, %10 : vector<8x512xf32>
    %202 = vector.extract_strided_slice %201 {offsets = [0, 0], sizes = [8, 128], strides = [1, 1]} : vector<8x512xf32> to vector<8x128xf32>
    %203 = arith.negf %202 : vector<8x128xf32>
    %204 = math.exp %203 : vector<8x128xf32>
    %cst_74 = arith.constant 1.000000e+00 : f32
    %205 = vector.broadcast %cst_74 : f32 to vector<8x128xf32>
    %206 = arith.addf %205, %204 : vector<8x128xf32>
    %207 = arith.divf %205, %206 : vector<8x128xf32>
    %208 = vector.extract_strided_slice %201 {offsets = [0, 128], sizes = [8, 128], strides = [1, 1]} : vector<8x512xf32> to vector<8x128xf32>
    %209 = arith.negf %208 : vector<8x128xf32>
    %210 = math.exp %209 : vector<8x128xf32>
    %cst_75 = arith.constant 1.000000e+00 : f32
    %211 = vector.broadcast %cst_75 : f32 to vector<8x128xf32>
    %212 = arith.addf %211, %210 : vector<8x128xf32>
    %213 = arith.divf %211, %212 : vector<8x128xf32>
    %214 = vector.extract_strided_slice %201 {offsets = [0, 256], sizes = [8, 128], strides = [1, 1]} : vector<8x512xf32> to vector<8x128xf32>
    %215 = math.tanh %214 : vector<8x128xf32>
    %216 = vector.extract_strided_slice %201 {offsets = [0, 384], sizes = [8, 128], strides = [1, 1]} : vector<8x512xf32> to vector<8x128xf32>
    %217 = arith.negf %216 : vector<8x128xf32>
    %218 = math.exp %217 : vector<8x128xf32>
    %cst_76 = arith.constant 1.000000e+00 : f32
    %219 = vector.broadcast %cst_76 : f32 to vector<8x128xf32>
    %220 = arith.addf %219, %218 : vector<8x128xf32>
    %221 = arith.divf %219, %220 : vector<8x128xf32>
    %222 = arith.mulf %213, %153 : vector<8x128xf32>
    %223 = arith.mulf %207, %215 : vector<8x128xf32>
    %224 = arith.addf %222, %223 : vector<8x128xf32>
    %225 = math.tanh %224 : vector<8x128xf32>
    %226 = arith.mulf %221, %225 : vector<8x128xf32>
    %c8_i32_77 = arith.constant 8 : i32
    %227 = arith.muli %193, %c8_i32_77 : i32
    %228 = tpu.assume_multiple %227, 8 : i32
    %229 = arith.index_cast %228 : i32 to index
    %c0_78 = arith.constant 0 : index
    %230 = vector.load %arg16[%229, %c0_78] : memref<64x128xf32, #tpu.memory_space<vmem>>, vector<8x128xf32>
    tpu.vector_store %arg16[%229, %c0_78], %226 {strides = array<i32>} : memref<64x128xf32, #tpu.memory_space<vmem>>, vector<8x128xf32>,
    %c8_i32_79 = arith.constant 8 : i32
    %231 = arith.muli %c3_i32, %c8_i32_79 : i32
    %232 = tpu.assume_multiple %231, 8 : i32
    %233 = arith.index_cast %232 : i32 to index
    %c0_80 = arith.constant 0 : index
    %234 = vector.load %arg15[%233, %c0_80] : memref<64x512xf32, #tpu.memory_space<vmem>>, vector<8x512xf32>
    %235 = arith.truncf %192 : vector<8x128xf32> to vector<8x128xbf16>
    %c0_81 = arith.constant 0 : index
    %c0_82 = arith.constant 0 : index
    %236 = vector.load %arg3[%c0_81, %c0_82] : memref<128x512xbf16, #tpu.memory_space<vmem>>, vector<128x512xbf16>
    %cst_83 = arith.constant dense<0.000000e+00> : vector<8x512xf32>
    %237 = tpu.matmul %235, %236, %cst_83 {dimension_numbers = #tpu.dot_dimension_numbers<[1], [0], [0], [1], [0, 0, 1, 1], [], []>} : vector<8x128xbf16>, vector<128x512xbf16>, vector<8x512xf32> -> vector<8x512xf32>
    %238 = arith.addf %234, %237 : vector<8x512xf32>
    %239 = vector.extract_strided_slice %238 {offsets = [0, 0], sizes = [8, 128], strides = [1, 1]} : vector<8x512xf32> to vector<8x128xf32>
    %240 = arith.negf %239 : vector<8x128xf32>
    %241 = math.exp %240 : vector<8x128xf32>
    %cst_84 = arith.constant 1.000000e+00 : f32
    %242 = vector.broadcast %cst_84 : f32 to vector<8x128xf32>
    %243 = arith.addf %242, %241 : vector<8x128xf32>
    %244 = arith.divf %242, %243 : vector<8x128xf32>
    %245 = vector.extract_strided_slice %238 {offsets = [0, 128], sizes = [8, 128], strides = [1, 1]} : vector<8x512xf32> to vector<8x128xf32>
    %246 = arith.negf %245 : vector<8x128xf32>
    %247 = math.exp %246 : vector<8x128xf32>
    %cst_85 = arith.constant 1.000000e+00 : f32
    %248 = vector.broadcast %cst_85 : f32 to vector<8x128xf32>
    %249 = arith.addf %248, %247 : vector<8x128xf32>
    %250 = arith.divf %248, %249 : vector<8x128xf32>
    %251 = vector.extract_strided_slice %238 {offsets = [0, 256], sizes = [8, 128], strides = [1, 1]} : vector<8x512xf32> to vector<8x128xf32>
    %252 = math.tanh %251 : vector<8x128xf32>
    %253 = vector.extract_strided_slice %238 {offsets = [0, 384], sizes = [8, 128], strides = [1, 1]} : vector<8x512xf32> to vector<8x128xf32>
    %254 = arith.negf %253 : vector<8x128xf32>
    %255 = math.exp %254 : vector<8x128xf32>
    %cst_86 = arith.constant 1.000000e+00 : f32
    %256 = vector.broadcast %cst_86 : f32 to vector<8x128xf32>
    %257 = arith.addf %256, %255 : vector<8x128xf32>
    %258 = arith.divf %256, %257 : vector<8x128xf32>
    %259 = arith.mulf %250, %190 : vector<8x128xf32>
    %260 = arith.mulf %244, %252 : vector<8x128xf32>
    %261 = arith.addf %259, %260 : vector<8x128xf32>
    %262 = math.tanh %261 : vector<8x128xf32>
    %263 = arith.mulf %258, %262 : vector<8x128xf32>
    %c4_i32 = arith.constant 4 : i32
    %c1_i32_87 = arith.constant 1 : i32
    %264 = arith.subi %c4_i32, %c1_i32_87 : i32
    %265 = arith.truncf %263 : vector<8x128xf32> to vector<8x128xbf16>
    %c0_88 = arith.constant 0 : index
    %c0_89 = arith.constant 0 : index
    %266 = vector.load %arg5[%c0_88, %c0_89] : memref<128x512xbf16, #tpu.memory_space<vmem>>, vector<128x512xbf16>
    %cst_90 = arith.constant dense<0.000000e+00> : vector<8x512xf32>
    %267 = tpu.matmul %265, %266, %cst_90 {dimension_numbers = #tpu.dot_dimension_numbers<[1], [0], [0], [1], [0, 0, 1, 1], [], []>} : vector<8x128xbf16>, vector<128x512xbf16>, vector<8x512xf32> -> vector<8x512xf32>
    %268 = arith.truncf %226 : vector<8x128xf32> to vector<8x128xbf16>
    %c0_91 = arith.constant 0 : index
    %c0_92 = arith.constant 0 : index
    %269 = vector.load %arg6[%c0_91, %c0_92] : memref<128x512xbf16, #tpu.memory_space<vmem>>, vector<128x512xbf16>
    %cst_93 = arith.constant dense<0.000000e+00> : vector<8x512xf32>
    %270 = tpu.matmul %268, %269, %cst_93 {dimension_numbers = #tpu.dot_dimension_numbers<[1], [0], [0], [1], [0, 0, 1, 1], [], []>} : vector<8x128xbf16>, vector<128x512xbf16>, vector<8x512xf32> -> vector<8x512xf32>
    %271 = arith.addf %267, %270 : vector<8x512xf32>
    %272 = arith.addf %271, %10 : vector<8x512xf32>
    %273 = vector.extract_strided_slice %272 {offsets = [0, 0], sizes = [8, 128], strides = [1, 1]} : vector<8x512xf32> to vector<8x128xf32>
    %274 = arith.negf %273 : vector<8x128xf32>
    %275 = math.exp %274 : vector<8x128xf32>
    %cst_94 = arith.constant 1.000000e+00 : f32
    %276 = vector.broadcast %cst_94 : f32 to vector<8x128xf32>
    %277 = arith.addf %276, %275 : vector<8x128xf32>
    %278 = arith.divf %276, %277 : vector<8x128xf32>
    %279 = vector.extract_strided_slice %272 {offsets = [0, 128], sizes = [8, 128], strides = [1, 1]} : vector<8x512xf32> to vector<8x128xf32>
    %280 = arith.negf %279 : vector<8x128xf32>
    %281 = math.exp %280 : vector<8x128xf32>
    %cst_95 = arith.constant 1.000000e+00 : f32
    %282 = vector.broadcast %cst_95 : f32 to vector<8x128xf32>
    %283 = arith.addf %282, %281 : vector<8x128xf32>
    %284 = arith.divf %282, %283 : vector<8x128xf32>
    %285 = vector.extract_strided_slice %272 {offsets = [0, 256], sizes = [8, 128], strides = [1, 1]} : vector<8x512xf32> to vector<8x128xf32>
    %286 = math.tanh %285 : vector<8x128xf32>
    %287 = vector.extract_strided_slice %272 {offsets = [0, 384], sizes = [8, 128], strides = [1, 1]} : vector<8x512xf32> to vector<8x128xf32>
    %288 = arith.negf %287 : vector<8x128xf32>
    %289 = math.exp %288 : vector<8x128xf32>
    %cst_96 = arith.constant 1.000000e+00 : f32
    %290 = vector.broadcast %cst_96 : f32 to vector<8x128xf32>
    %291 = arith.addf %290, %289 : vector<8x128xf32>
    %292 = arith.divf %290, %291 : vector<8x128xf32>
    %293 = arith.mulf %284, %224 : vector<8x128xf32>
    %294 = arith.mulf %278, %286 : vector<8x128xf32>
    %295 = arith.addf %293, %294 : vector<8x128xf32>
    %296 = math.tanh %295 : vector<8x128xf32>
    %297 = arith.mulf %292, %296 : vector<8x128xf32>
    %c8_i32_97 = arith.constant 8 : i32
    %298 = arith.muli %264, %c8_i32_97 : i32
    %299 = tpu.assume_multiple %298, 8 : i32
    %300 = arith.index_cast %299 : i32 to index
    %c0_98 = arith.constant 0 : index
    %301 = vector.load %arg16[%300, %c0_98] : memref<64x128xf32, #tpu.memory_space<vmem>>, vector<8x128xf32>
    tpu.vector_store %arg16[%300, %c0_98], %297 {strides = array<i32>} : memref<64x128xf32, #tpu.memory_space<vmem>>, vector<8x128xf32>,
    %c8_i32_99 = arith.constant 8 : i32
    %302 = arith.muli %c4_i32, %c8_i32_99 : i32
    %303 = tpu.assume_multiple %302, 8 : i32
    %304 = arith.index_cast %303 : i32 to index
    %c0_100 = arith.constant 0 : index
    %305 = vector.load %arg15[%304, %c0_100] : memref<64x512xf32, #tpu.memory_space<vmem>>, vector<8x512xf32>
    %306 = arith.truncf %263 : vector<8x128xf32> to vector<8x128xbf16>
    %c0_101 = arith.constant 0 : index
    %c0_102 = arith.constant 0 : index
    %307 = vector.load %arg3[%c0_101, %c0_102] : memref<128x512xbf16, #tpu.memory_space<vmem>>, vector<128x512xbf16>
    %cst_103 = arith.constant dense<0.000000e+00> : vector<8x512xf32>
    %308 = tpu.matmul %306, %307, %cst_103 {dimension_numbers = #tpu.dot_dimension_numbers<[1], [0], [0], [1], [0, 0, 1, 1], [], []>} : vector<8x128xbf16>, vector<128x512xbf16>, vector<8x512xf32> -> vector<8x512xf32>
    %309 = arith.addf %305, %308 : vector<8x512xf32>
    %310 = vector.extract_strided_slice %309 {offsets = [0, 0], sizes = [8, 128], strides = [1, 1]} : vector<8x512xf32> to vector<8x128xf32>
    %311 = arith.negf %310 : vector<8x128xf32>
    %312 = math.exp %311 : vector<8x128xf32>
    %cst_104 = arith.constant 1.000000e+00 : f32
    %313 = vector.broadcast %cst_104 : f32 to vector<8x128xf32>
    %314 = arith.addf %313, %312 : vector<8x128xf32>
    %315 = arith.divf %313, %314 : vector<8x128xf32>
    %316 = vector.extract_strided_slice %309 {offsets = [0, 128], sizes = [8, 128], strides = [1, 1]} : vector<8x512xf32> to vector<8x128xf32>
    %317 = arith.negf %316 : vector<8x128xf32>
    %318 = math.exp %317 : vector<8x128xf32>
    %cst_105 = arith.constant 1.000000e+00 : f32
    %319 = vector.broadcast %cst_105 : f32 to vector<8x128xf32>
    %320 = arith.addf %319, %318 : vector<8x128xf32>
    %321 = arith.divf %319, %320 : vector<8x128xf32>
    %322 = vector.extract_strided_slice %309 {offsets = [0, 256], sizes = [8, 128], strides = [1, 1]} : vector<8x512xf32> to vector<8x128xf32>
    %323 = math.tanh %322 : vector<8x128xf32>
    %324 = vector.extract_strided_slice %309 {offsets = [0, 384], sizes = [8, 128], strides = [1, 1]} : vector<8x512xf32> to vector<8x128xf32>
    %325 = arith.negf %324 : vector<8x128xf32>
    %326 = math.exp %325 : vector<8x128xf32>
    %cst_106 = arith.constant 1.000000e+00 : f32
    %327 = vector.broadcast %cst_106 : f32 to vector<8x128xf32>
    %328 = arith.addf %327, %326 : vector<8x128xf32>
    %329 = arith.divf %327, %328 : vector<8x128xf32>
    %330 = arith.mulf %321, %261 : vector<8x128xf32>
    %331 = arith.mulf %315, %323 : vector<8x128xf32>
    %332 = arith.addf %330, %331 : vector<8x128xf32>
    %333 = math.tanh %332 : vector<8x128xf32>
    %334 = arith.mulf %329, %333 : vector<8x128xf32>
    %c5_i32 = arith.constant 5 : i32
    %c1_i32_107 = arith.constant 1 : i32
    %335 = arith.subi %c5_i32, %c1_i32_107 : i32
    %336 = arith.truncf %334 : vector<8x128xf32> to vector<8x128xbf16>
    %c0_108 = arith.constant 0 : index
    %c0_109 = arith.constant 0 : index
    %337 = vector.load %arg5[%c0_108, %c0_109] : memref<128x512xbf16, #tpu.memory_space<vmem>>, vector<128x512xbf16>
    %cst_110 = arith.constant dense<0.000000e+00> : vector<8x512xf32>
    %338 = tpu.matmul %336, %337, %cst_110 {dimension_numbers = #tpu.dot_dimension_numbers<[1], [0], [0], [1], [0, 0, 1, 1], [], []>} : vector<8x128xbf16>, vector<128x512xbf16>, vector<8x512xf32> -> vector<8x512xf32>
    %339 = arith.truncf %297 : vector<8x128xf32> to vector<8x128xbf16>
    %c0_111 = arith.constant 0 : index
    %c0_112 = arith.constant 0 : index
    %340 = vector.load %arg6[%c0_111, %c0_112] : memref<128x512xbf16, #tpu.memory_space<vmem>>, vector<128x512xbf16>
    %cst_113 = arith.constant dense<0.000000e+00> : vector<8x512xf32>
    %341 = tpu.matmul %339, %340, %cst_113 {dimension_numbers = #tpu.dot_dimension_numbers<[1], [0], [0], [1], [0, 0, 1, 1], [], []>} : vector<8x128xbf16>, vector<128x512xbf16>, vector<8x512xf32> -> vector<8x512xf32>
    %342 = arith.addf %338, %341 : vector<8x512xf32>
    %343 = arith.addf %342, %10 : vector<8x512xf32>
    %344 = vector.extract_strided_slice %343 {offsets = [0, 0], sizes = [8, 128], strides = [1, 1]} : vector<8x512xf32> to vector<8x128xf32>
    %345 = arith.negf %344 : vector<8x128xf32>
    %346 = math.exp %345 : vector<8x128xf32>
    %cst_114 = arith.constant 1.000000e+00 : f32
    %347 = vector.broadcast %cst_114 : f32 to vector<8x128xf32>
    %348 = arith.addf %347, %346 : vector<8x128xf32>
    %349 = arith.divf %347, %348 : vector<8x128xf32>
    %350 = vector.extract_strided_slice %343 {offsets = [0, 128], sizes = [8, 128], strides = [1, 1]} : vector<8x512xf32> to vector<8x128xf32>
    %351 = arith.negf %350 : vector<8x128xf32>
    %352 = math.exp %351 : vector<8x128xf32>
    %cst_115 = arith.constant 1.000000e+00 : f32
    %353 = vector.broadcast %cst_115 : f32 to vector<8x128xf32>
    %354 = arith.addf %353, %352 : vector<8x128xf32>
    %355 = arith.divf %353, %354 : vector<8x128xf32>
    %356 = vector.extract_strided_slice %343 {offsets = [0, 256], sizes = [8, 128], strides = [1, 1]} : vector<8x512xf32> to vector<8x128xf32>
    %357 = math.tanh %356 : vector<8x128xf32>
    %358 = vector.extract_strided_slice %343 {offsets = [0, 384], sizes = [8, 128], strides = [1, 1]} : vector<8x512xf32> to vector<8x128xf32>
    %359 = arith.negf %358 : vector<8x128xf32>
    %360 = math.exp %359 : vector<8x128xf32>
    %cst_116 = arith.constant 1.000000e+00 : f32
    %361 = vector.broadcast %cst_116 : f32 to vector<8x128xf32>
    %362 = arith.addf %361, %360 : vector<8x128xf32>
    %363 = arith.divf %361, %362 : vector<8x128xf32>
    %364 = arith.mulf %355, %295 : vector<8x128xf32>
    %365 = arith.mulf %349, %357 : vector<8x128xf32>
    %366 = arith.addf %364, %365 : vector<8x128xf32>
    %367 = math.tanh %366 : vector<8x128xf32>
    %368 = arith.mulf %363, %367 : vector<8x128xf32>
    %c8_i32_117 = arith.constant 8 : i32
    %369 = arith.muli %335, %c8_i32_117 : i32
    %370 = tpu.assume_multiple %369, 8 : i32
    %371 = arith.index_cast %370 : i32 to index
    %c0_118 = arith.constant 0 : index
    %372 = vector.load %arg16[%371, %c0_118] : memref<64x128xf32, #tpu.memory_space<vmem>>, vector<8x128xf32>
    tpu.vector_store %arg16[%371, %c0_118], %368 {strides = array<i32>} : memref<64x128xf32, #tpu.memory_space<vmem>>, vector<8x128xf32>,
    %c8_i32_119 = arith.constant 8 : i32
    %373 = arith.muli %c5_i32, %c8_i32_119 : i32
    %374 = tpu.assume_multiple %373, 8 : i32
    %375 = arith.index_cast %374 : i32 to index
    %c0_120 = arith.constant 0 : index
    %376 = vector.load %arg15[%375, %c0_120] : memref<64x512xf32, #tpu.memory_space<vmem>>, vector<8x512xf32>
    %377 = arith.truncf %334 : vector<8x128xf32> to vector<8x128xbf16>
    %c0_121 = arith.constant 0 : index
    %c0_122 = arith.constant 0 : index
    %378 = vector.load %arg3[%c0_121, %c0_122] : memref<128x512xbf16, #tpu.memory_space<vmem>>, vector<128x512xbf16>
    %cst_123 = arith.constant dense<0.000000e+00> : vector<8x512xf32>
    %379 = tpu.matmul %377, %378, %cst_123 {dimension_numbers = #tpu.dot_dimension_numbers<[1], [0], [0], [1], [0, 0, 1, 1], [], []>} : vector<8x128xbf16>, vector<128x512xbf16>, vector<8x512xf32> -> vector<8x512xf32>
    %380 = arith.addf %376, %379 : vector<8x512xf32>
    %381 = vector.extract_strided_slice %380 {offsets = [0, 0], sizes = [8, 128], strides = [1, 1]} : vector<8x512xf32> to vector<8x128xf32>
    %382 = arith.negf %381 : vector<8x128xf32>
    %383 = math.exp %382 : vector<8x128xf32>
    %cst_124 = arith.constant 1.000000e+00 : f32
    %384 = vector.broadcast %cst_124 : f32 to vector<8x128xf32>
    %385 = arith.addf %384, %383 : vector<8x128xf32>
    %386 = arith.divf %384, %385 : vector<8x128xf32>
    %387 = vector.extract_strided_slice %380 {offsets = [0, 128], sizes = [8, 128], strides = [1, 1]} : vector<8x512xf32> to vector<8x128xf32>
    %388 = arith.negf %387 : vector<8x128xf32>
    %389 = math.exp %388 : vector<8x128xf32>
    %cst_125 = arith.constant 1.000000e+00 : f32
    %390 = vector.broadcast %cst_125 : f32 to vector<8x128xf32>
    %391 = arith.addf %390, %389 : vector<8x128xf32>
    %392 = arith.divf %390, %391 : vector<8x128xf32>
    %393 = vector.extract_strided_slice %380 {offsets = [0, 256], sizes = [8, 128], strides = [1, 1]} : vector<8x512xf32> to vector<8x128xf32>
    %394 = math.tanh %393 : vector<8x128xf32>
    %395 = vector.extract_strided_slice %380 {offsets = [0, 384], sizes = [8, 128], strides = [1, 1]} : vector<8x512xf32> to vector<8x128xf32>
    %396 = arith.negf %395 : vector<8x128xf32>
    %397 = math.exp %396 : vector<8x128xf32>
    %cst_126 = arith.constant 1.000000e+00 : f32
    %398 = vector.broadcast %cst_126 : f32 to vector<8x128xf32>
    %399 = arith.addf %398, %397 : vector<8x128xf32>
    %400 = arith.divf %398, %399 : vector<8x128xf32>
    %401 = arith.mulf %392, %332 : vector<8x128xf32>
    %402 = arith.mulf %386, %394 : vector<8x128xf32>
    %403 = arith.addf %401, %402 : vector<8x128xf32>
    %404 = math.tanh %403 : vector<8x128xf32>
    %405 = arith.mulf %400, %404 : vector<8x128xf32>
    %c6_i32 = arith.constant 6 : i32
    %c1_i32_127 = arith.constant 1 : i32
    %406 = arith.subi %c6_i32, %c1_i32_127 : i32
    %407 = arith.truncf %405 : vector<8x128xf32> to vector<8x128xbf16>
    %c0_128 = arith.constant 0 : index
    %c0_129 = arith.constant 0 : index
    %408 = vector.load %arg5[%c0_128, %c0_129] : memref<128x512xbf16, #tpu.memory_space<vmem>>, vector<128x512xbf16>
    %cst_130 = arith.constant dense<0.000000e+00> : vector<8x512xf32>
    %409 = tpu.matmul %407, %408, %cst_130 {dimension_numbers = #tpu.dot_dimension_numbers<[1], [0], [0], [1], [0, 0, 1, 1], [], []>} : vector<8x128xbf16>, vector<128x512xbf16>, vector<8x512xf32> -> vector<8x512xf32>
    %410 = arith.truncf %368 : vector<8x128xf32> to vector<8x128xbf16>
    %c0_131 = arith.constant 0 : index
    %c0_132 = arith.constant 0 : index
    %411 = vector.load %arg6[%c0_131, %c0_132] : memref<128x512xbf16, #tpu.memory_space<vmem>>, vector<128x512xbf16>
    %cst_133 = arith.constant dense<0.000000e+00> : vector<8x512xf32>
    %412 = tpu.matmul %410, %411, %cst_133 {dimension_numbers = #tpu.dot_dimension_numbers<[1], [0], [0], [1], [0, 0, 1, 1], [], []>} : vector<8x128xbf16>, vector<128x512xbf16>, vector<8x512xf32> -> vector<8x512xf32>
    %413 = arith.addf %409, %412 : vector<8x512xf32>
    %414 = arith.addf %413, %10 : vector<8x512xf32>
    %415 = vector.extract_strided_slice %414 {offsets = [0, 0], sizes = [8, 128], strides = [1, 1]} : vector<8x512xf32> to vector<8x128xf32>
    %416 = arith.negf %415 : vector<8x128xf32>
    %417 = math.exp %416 : vector<8x128xf32>
    %cst_134 = arith.constant 1.000000e+00 : f32
    %418 = vector.broadcast %cst_134 : f32 to vector<8x128xf32>
    %419 = arith.addf %418, %417 : vector<8x128xf32>
    %420 = arith.divf %418, %419 : vector<8x128xf32>
    %421 = vector.extract_strided_slice %414 {offsets = [0, 128], sizes = [8, 128], strides = [1, 1]} : vector<8x512xf32> to vector<8x128xf32>
    %422 = arith.negf %421 : vector<8x128xf32>
    %423 = math.exp %422 : vector<8x128xf32>
    %cst_135 = arith.constant 1.000000e+00 : f32
    %424 = vector.broadcast %cst_135 : f32 to vector<8x128xf32>
    %425 = arith.addf %424, %423 : vector<8x128xf32>
    %426 = arith.divf %424, %425 : vector<8x128xf32>
    %427 = vector.extract_strided_slice %414 {offsets = [0, 256], sizes = [8, 128], strides = [1, 1]} : vector<8x512xf32> to vector<8x128xf32>
    %428 = math.tanh %427 : vector<8x128xf32>
    %429 = vector.extract_strided_slice %414 {offsets = [0, 384], sizes = [8, 128], strides = [1, 1]} : vector<8x512xf32> to vector<8x128xf32>
    %430 = arith.negf %429 : vector<8x128xf32>
    %431 = math.exp %430 : vector<8x128xf32>
    %cst_136 = arith.constant 1.000000e+00 : f32
    %432 = vector.broadcast %cst_136 : f32 to vector<8x128xf32>
    %433 = arith.addf %432, %431 : vector<8x128xf32>
    %434 = arith.divf %432, %433 : vector<8x128xf32>
    %435 = arith.mulf %426, %366 : vector<8x128xf32>
    %436 = arith.mulf %420, %428 : vector<8x128xf32>
    %437 = arith.addf %435, %436 : vector<8x128xf32>
    %438 = math.tanh %437 : vector<8x128xf32>
    %439 = arith.mulf %434, %438 : vector<8x128xf32>
    %c8_i32_137 = arith.constant 8 : i32
    %440 = arith.muli %406, %c8_i32_137 : i32
    %441 = tpu.assume_multiple %440, 8 : i32
    %442 = arith.index_cast %441 : i32 to index
    %c0_138 = arith.constant 0 : index
    %443 = vector.load %arg16[%442, %c0_138] : memref<64x128xf32, #tpu.memory_space<vmem>>, vector<8x128xf32>
    tpu.vector_store %arg16[%442, %c0_138], %439 {strides = array<i32>} : memref<64x128xf32, #tpu.memory_space<vmem>>, vector<8x128xf32>,
    %c8_i32_139 = arith.constant 8 : i32
    %444 = arith.muli %c6_i32, %c8_i32_139 : i32
    %445 = tpu.assume_multiple %444, 8 : i32
    %446 = arith.index_cast %445 : i32 to index
    %c0_140 = arith.constant 0 : index
    %447 = vector.load %arg15[%446, %c0_140] : memref<64x512xf32, #tpu.memory_space<vmem>>, vector<8x512xf32>
    %448 = arith.truncf %405 : vector<8x128xf32> to vector<8x128xbf16>
    %c0_141 = arith.constant 0 : index
    %c0_142 = arith.constant 0 : index
    %449 = vector.load %arg3[%c0_141, %c0_142] : memref<128x512xbf16, #tpu.memory_space<vmem>>, vector<128x512xbf16>
    %cst_143 = arith.constant dense<0.000000e+00> : vector<8x512xf32>
    %450 = tpu.matmul %448, %449, %cst_143 {dimension_numbers = #tpu.dot_dimension_numbers<[1], [0], [0], [1], [0, 0, 1, 1], [], []>} : vector<8x128xbf16>, vector<128x512xbf16>, vector<8x512xf32> -> vector<8x512xf32>
    %451 = arith.addf %447, %450 : vector<8x512xf32>
    %452 = vector.extract_strided_slice %451 {offsets = [0, 0], sizes = [8, 128], strides = [1, 1]} : vector<8x512xf32> to vector<8x128xf32>
    %453 = arith.negf %452 : vector<8x128xf32>
    %454 = math.exp %453 : vector<8x128xf32>
    %cst_144 = arith.constant 1.000000e+00 : f32
    %455 = vector.broadcast %cst_144 : f32 to vector<8x128xf32>
    %456 = arith.addf %455, %454 : vector<8x128xf32>
    %457 = arith.divf %455, %456 : vector<8x128xf32>
    %458 = vector.extract_strided_slice %451 {offsets = [0, 128], sizes = [8, 128], strides = [1, 1]} : vector<8x512xf32> to vector<8x128xf32>
    %459 = arith.negf %458 : vector<8x128xf32>
    %460 = math.exp %459 : vector<8x128xf32>
    %cst_145 = arith.constant 1.000000e+00 : f32
    %461 = vector.broadcast %cst_145 : f32 to vector<8x128xf32>
    %462 = arith.addf %461, %460 : vector<8x128xf32>
    %463 = arith.divf %461, %462 : vector<8x128xf32>
    %464 = vector.extract_strided_slice %451 {offsets = [0, 256], sizes = [8, 128], strides = [1, 1]} : vector<8x512xf32> to vector<8x128xf32>
    %465 = math.tanh %464 : vector<8x128xf32>
    %466 = vector.extract_strided_slice %451 {offsets = [0, 384], sizes = [8, 128], strides = [1, 1]} : vector<8x512xf32> to vector<8x128xf32>
    %467 = arith.negf %466 : vector<8x128xf32>
    %468 = math.exp %467 : vector<8x128xf32>
    %cst_146 = arith.constant 1.000000e+00 : f32
    %469 = vector.broadcast %cst_146 : f32 to vector<8x128xf32>
    %470 = arith.addf %469, %468 : vector<8x128xf32>
    %471 = arith.divf %469, %470 : vector<8x128xf32>
    %472 = arith.mulf %463, %403 : vector<8x128xf32>
    %473 = arith.mulf %457, %465 : vector<8x128xf32>
    %474 = arith.addf %472, %473 : vector<8x128xf32>
    %475 = math.tanh %474 : vector<8x128xf32>
    %476 = arith.mulf %471, %475 : vector<8x128xf32>
    %c7_i32 = arith.constant 7 : i32
    %c1_i32_147 = arith.constant 1 : i32
    %477 = arith.subi %c7_i32, %c1_i32_147 : i32
    %478 = arith.truncf %476 : vector<8x128xf32> to vector<8x128xbf16>
    %c0_148 = arith.constant 0 : index
    %c0_149 = arith.constant 0 : index
    %479 = vector.load %arg5[%c0_148, %c0_149] : memref<128x512xbf16, #tpu.memory_space<vmem>>, vector<128x512xbf16>
    %cst_150 = arith.constant dense<0.000000e+00> : vector<8x512xf32>
    %480 = tpu.matmul %478, %479, %cst_150 {dimension_numbers = #tpu.dot_dimension_numbers<[1], [0], [0], [1], [0, 0, 1, 1], [], []>} : vector<8x128xbf16>, vector<128x512xbf16>, vector<8x512xf32> -> vector<8x512xf32>
    %481 = arith.truncf %439 : vector<8x128xf32> to vector<8x128xbf16>
    %c0_151 = arith.constant 0 : index
    %c0_152 = arith.constant 0 : index
    %482 = vector.load %arg6[%c0_151, %c0_152] : memref<128x512xbf16, #tpu.memory_space<vmem>>, vector<128x512xbf16>
    %cst_153 = arith.constant dense<0.000000e+00> : vector<8x512xf32>
    %483 = tpu.matmul %481, %482, %cst_153 {dimension_numbers = #tpu.dot_dimension_numbers<[1], [0], [0], [1], [0, 0, 1, 1], [], []>} : vector<8x128xbf16>, vector<128x512xbf16>, vector<8x512xf32> -> vector<8x512xf32>
    %484 = arith.addf %480, %483 : vector<8x512xf32>
    %485 = arith.addf %484, %10 : vector<8x512xf32>
    %486 = vector.extract_strided_slice %485 {offsets = [0, 0], sizes = [8, 128], strides = [1, 1]} : vector<8x512xf32> to vector<8x128xf32>
    %487 = arith.negf %486 : vector<8x128xf32>
    %488 = math.exp %487 : vector<8x128xf32>
    %cst_154 = arith.constant 1.000000e+00 : f32
    %489 = vector.broadcast %cst_154 : f32 to vector<8x128xf32>
    %490 = arith.addf %489, %488 : vector<8x128xf32>
    %491 = arith.divf %489, %490 : vector<8x128xf32>
    %492 = vector.extract_strided_slice %485 {offsets = [0, 128], sizes = [8, 128], strides = [1, 1]} : vector<8x512xf32> to vector<8x128xf32>
    %493 = arith.negf %492 : vector<8x128xf32>
    %494 = math.exp %493 : vector<8x128xf32>
    %cst_155 = arith.constant 1.000000e+00 : f32
    %495 = vector.broadcast %cst_155 : f32 to vector<8x128xf32>
    %496 = arith.addf %495, %494 : vector<8x128xf32>
    %497 = arith.divf %495, %496 : vector<8x128xf32>
    %498 = vector.extract_strided_slice %485 {offsets = [0, 256], sizes = [8, 128], strides = [1, 1]} : vector<8x512xf32> to vector<8x128xf32>
    %499 = math.tanh %498 : vector<8x128xf32>
    %500 = vector.extract_strided_slice %485 {offsets = [0, 384], sizes = [8, 128], strides = [1, 1]} : vector<8x512xf32> to vector<8x128xf32>
    %501 = arith.negf %500 : vector<8x128xf32>
    %502 = math.exp %501 : vector<8x128xf32>
    %cst_156 = arith.constant 1.000000e+00 : f32
    %503 = vector.broadcast %cst_156 : f32 to vector<8x128xf32>
    %504 = arith.addf %503, %502 : vector<8x128xf32>
    %505 = arith.divf %503, %504 : vector<8x128xf32>
    %506 = arith.mulf %497, %437 : vector<8x128xf32>
    %507 = arith.mulf %491, %499 : vector<8x128xf32>
    %508 = arith.addf %506, %507 : vector<8x128xf32>
    %509 = math.tanh %508 : vector<8x128xf32>
    %510 = arith.mulf %505, %509 : vector<8x128xf32>
    %c8_i32_157 = arith.constant 8 : i32
    %511 = arith.muli %477, %c8_i32_157 : i32
    %512 = tpu.assume_multiple %511, 8 : i32
    %513 = arith.index_cast %512 : i32 to index
    %c0_158 = arith.constant 0 : index
    %514 = vector.load %arg16[%513, %c0_158] : memref<64x128xf32, #tpu.memory_space<vmem>>, vector<8x128xf32>
    tpu.vector_store %arg16[%513, %c0_158], %510 {strides = array<i32>} : memref<64x128xf32, #tpu.memory_space<vmem>>, vector<8x128xf32>,
    %c8_i32_159 = arith.constant 8 : i32
    %515 = arith.muli %c7_i32, %c8_i32_159 : i32
    %516 = tpu.assume_multiple %515, 8 : i32
    %517 = arith.index_cast %516 : i32 to index
    %c0_160 = arith.constant 0 : index
    %518 = vector.load %arg15[%517, %c0_160] : memref<64x512xf32, #tpu.memory_space<vmem>>, vector<8x512xf32>
    %519 = arith.truncf %476 : vector<8x128xf32> to vector<8x128xbf16>
    %c0_161 = arith.constant 0 : index
    %c0_162 = arith.constant 0 : index
    %520 = vector.load %arg3[%c0_161, %c0_162] : memref<128x512xbf16, #tpu.memory_space<vmem>>, vector<128x512xbf16>
    %cst_163 = arith.constant dense<0.000000e+00> : vector<8x512xf32>
    %521 = tpu.matmul %519, %520, %cst_163 {dimension_numbers = #tpu.dot_dimension_numbers<[1], [0], [0], [1], [0, 0, 1, 1], [], []>} : vector<8x128xbf16>, vector<128x512xbf16>, vector<8x512xf32> -> vector<8x512xf32>
    %522 = arith.addf %518, %521 : vector<8x512xf32>
    %523 = vector.extract_strided_slice %522 {offsets = [0, 0], sizes = [8, 128], strides = [1, 1]} : vector<8x512xf32> to vector<8x128xf32>
    %524 = arith.negf %523 : vector<8x128xf32>
    %525 = math.exp %524 : vector<8x128xf32>
    %cst_164 = arith.constant 1.000000e+00 : f32
    %526 = vector.broadcast %cst_164 : f32 to vector<8x128xf32>
    %527 = arith.addf %526, %525 : vector<8x128xf32>
    %528 = arith.divf %526, %527 : vector<8x128xf32>
    %529 = vector.extract_strided_slice %522 {offsets = [0, 128], sizes = [8, 128], strides = [1, 1]} : vector<8x512xf32> to vector<8x128xf32>
    %530 = arith.negf %529 : vector<8x128xf32>
    %531 = math.exp %530 : vector<8x128xf32>
    %cst_165 = arith.constant 1.000000e+00 : f32
    %532 = vector.broadcast %cst_165 : f32 to vector<8x128xf32>
    %533 = arith.addf %532, %531 : vector<8x128xf32>
    %534 = arith.divf %532, %533 : vector<8x128xf32>
    %535 = vector.extract_strided_slice %522 {offsets = [0, 256], sizes = [8, 128], strides = [1, 1]} : vector<8x512xf32> to vector<8x128xf32>
    %536 = math.tanh %535 : vector<8x128xf32>
    %537 = vector.extract_strided_slice %522 {offsets = [0, 384], sizes = [8, 128], strides = [1, 1]} : vector<8x512xf32> to vector<8x128xf32>
    %538 = arith.negf %537 : vector<8x128xf32>
    %539 = math.exp %538 : vector<8x128xf32>
    %cst_166 = arith.constant 1.000000e+00 : f32
    %540 = vector.broadcast %cst_166 : f32 to vector<8x128xf32>
    %541 = arith.addf %540, %539 : vector<8x128xf32>
    %542 = arith.divf %540, %541 : vector<8x128xf32>
    %543 = arith.mulf %534, %474 : vector<8x128xf32>
    %544 = arith.mulf %528, %536 : vector<8x128xf32>
    %545 = arith.addf %543, %544 : vector<8x128xf32>
    %546 = math.tanh %545 : vector<8x128xf32>
    %547 = arith.mulf %542, %546 : vector<8x128xf32>
    %c7_i32_167 = arith.constant 7 : i32
    %548 = arith.truncf %547 : vector<8x128xf32> to vector<8x128xbf16>
    %c0_168 = arith.constant 0 : index
    %c0_169 = arith.constant 0 : index
    %549 = vector.load %arg5[%c0_168, %c0_169] : memref<128x512xbf16, #tpu.memory_space<vmem>>, vector<128x512xbf16>
    %cst_170 = arith.constant dense<0.000000e+00> : vector<8x512xf32>
    %550 = tpu.matmul %548, %549, %cst_170 {dimension_numbers = #tpu.dot_dimension_numbers<[1], [0], [0], [1], [0, 0, 1, 1], [], []>} : vector<8x128xbf16>, vector<128x512xbf16>, vector<8x512xf32> -> vector<8x512xf32>
    %551 = arith.truncf %510 : vector<8x128xf32> to vector<8x128xbf16>
    %c0_171 = arith.constant 0 : index
    %c0_172 = arith.constant 0 : index
    %552 = vector.load %arg6[%c0_171, %c0_172] : memref<128x512xbf16, #tpu.memory_space<vmem>>, vector<128x512xbf16>
    %cst_173 = arith.constant dense<0.000000e+00> : vector<8x512xf32>
    %553 = tpu.matmul %551, %552, %cst_173 {dimension_numbers = #tpu.dot_dimension_numbers<[1], [0], [0], [1], [0, 0, 1, 1], [], []>} : vector<8x128xbf16>, vector<128x512xbf16>, vector<8x512xf32> -> vector<8x512xf32>
    %554 = arith.addf %550, %553 : vector<8x512xf32>
    %555 = arith.addf %554, %10 : vector<8x512xf32>
    %556 = vector.extract_strided_slice %555 {offsets = [0, 0], sizes = [8, 128], strides = [1, 1]} : vector<8x512xf32> to vector<8x128xf32>
    %557 = arith.negf %556 : vector<8x128xf32>
    %558 = math.exp %557 : vector<8x128xf32>
    %cst_174 = arith.constant 1.000000e+00 : f32
    %559 = vector.broadcast %cst_174 : f32 to vector<8x128xf32>
    %560 = arith.addf %559, %558 : vector<8x128xf32>
    %561 = arith.divf %559, %560 : vector<8x128xf32>
    %562 = vector.extract_strided_slice %555 {offsets = [0, 128], sizes = [8, 128], strides = [1, 1]} : vector<8x512xf32> to vector<8x128xf32>
    %563 = arith.negf %562 : vector<8x128xf32>
    %564 = math.exp %563 : vector<8x128xf32>
    %cst_175 = arith.constant 1.000000e+00 : f32
    %565 = vector.broadcast %cst_175 : f32 to vector<8x128xf32>
    %566 = arith.addf %565, %564 : vector<8x128xf32>
    %567 = arith.divf %565, %566 : vector<8x128xf32>
    %568 = vector.extract_strided_slice %555 {offsets = [0, 256], sizes = [8, 128], strides = [1, 1]} : vector<8x512xf32> to vector<8x128xf32>
    %569 = math.tanh %568 : vector<8x128xf32>
    %570 = vector.extract_strided_slice %555 {offsets = [0, 384], sizes = [8, 128], strides = [1, 1]} : vector<8x512xf32> to vector<8x128xf32>
    %571 = arith.negf %570 : vector<8x128xf32>
    %572 = math.exp %571 : vector<8x128xf32>
    %cst_176 = arith.constant 1.000000e+00 : f32
    %573 = vector.broadcast %cst_176 : f32 to vector<8x128xf32>
    %574 = arith.addf %573, %572 : vector<8x128xf32>
    %575 = arith.divf %573, %574 : vector<8x128xf32>
    %576 = arith.mulf %567, %508 : vector<8x128xf32>
    %577 = arith.mulf %561, %569 : vector<8x128xf32>
    %578 = arith.addf %576, %577 : vector<8x128xf32>
    %579 = math.tanh %578 : vector<8x128xf32>
    %580 = arith.mulf %575, %579 : vector<8x128xf32>
    %c56_i32 = arith.constant 56 : i32
    %581 = tpu.assume_multiple %c56_i32, 8 : i32
    %582 = arith.index_cast %581 : i32 to index
    %c0_177 = arith.constant 0 : index
    %583 = vector.load %arg16[%582, %c0_177] : memref<64x128xf32, #tpu.memory_space<vmem>>, vector<8x128xf32>
    tpu.vector_store %arg16[%582, %c0_177], %580 {strides = array<i32>} : memref<64x128xf32, #tpu.memory_space<vmem>>, vector<8x128xf32>,
    %c0_178 = arith.constant 0 : index
    %c0_179 = arith.constant 0 : index
    %c0_180 = arith.constant 0 : index
    %584 = vector.load %arg13[%c0_178, %c0_179, %c0_180] : memref<2x8x128xf32, #tpu.memory_space<vmem>>, vector<1x8x128xf32>
    %585 = vector.shape_cast %584 : vector<1x8x128xf32> to vector<8x128xf32>
    %586 = vector.shape_cast %547 : vector<8x128xf32> to vector<1x8x128xf32>
    tpu.vector_store %arg13[%c0_178, %c0_179, %c0_180], %586 {strides = array<i32>} : memref<2x8x128xf32, #tpu.memory_space<vmem>>, vector<1x8x128xf32>,
    %c0_181 = arith.constant 0 : index
    %c0_182 = arith.constant 0 : index
    %c0_183 = arith.constant 0 : index
    %587 = vector.load %arg14[%c0_181, %c0_182, %c0_183] : memref<2x8x128xf32, #tpu.memory_space<vmem>>, vector<1x8x128xf32>
    %588 = vector.shape_cast %587 : vector<1x8x128xf32> to vector<8x128xf32>
    %589 = vector.shape_cast %545 : vector<8x128xf32> to vector<1x8x128xf32>
    tpu.vector_store %arg14[%c0_181, %c0_182, %c0_183], %589 {strides = array<i32>} : memref<2x8x128xf32, #tpu.memory_space<vmem>>, vector<1x8x128xf32>,
    %c1_184 = arith.constant 1 : index
    %c0_185 = arith.constant 0 : index
    %c0_186 = arith.constant 0 : index
    %590 = vector.load %arg13[%c1_184, %c0_185, %c0_186] : memref<2x8x128xf32, #tpu.memory_space<vmem>>, vector<1x8x128xf32>
    %591 = vector.shape_cast %590 : vector<1x8x128xf32> to vector<8x128xf32>
    %592 = vector.shape_cast %580 : vector<8x128xf32> to vector<1x8x128xf32>
    tpu.vector_store %arg13[%c1_184, %c0_185, %c0_186], %592 {strides = array<i32>} : memref<2x8x128xf32, #tpu.memory_space<vmem>>, vector<1x8x128xf32>,
    %c1_187 = arith.constant 1 : index
    %c0_188 = arith.constant 0 : index
    %c0_189 = arith.constant 0 : index
    %593 = vector.load %arg14[%c1_187, %c0_188, %c0_189] : memref<2x8x128xf32, #tpu.memory_space<vmem>>, vector<1x8x128xf32>
    %594 = vector.shape_cast %593 : vector<1x8x128xf32> to vector<8x128xf32>
    %595 = vector.shape_cast %578 : vector<8x128xf32> to vector<1x8x128xf32>
    tpu.vector_store %arg14[%c1_187, %c0_188, %c0_189], %595 {strides = array<i32>} : memref<2x8x128xf32, #tpu.memory_space<vmem>>, vector<1x8x128xf32>,
    %c0_190 = arith.constant 0 : index
    %c0_191 = arith.constant 0 : index
    %596 = vector.load %arg16[%c0_190, %c0_191] : memref<64x128xf32, #tpu.memory_space<vmem>>, vector<64x128xf32>
    %597 = arith.truncf %596 : vector<64x128xf32> to vector<64x128xbf16>
    %c0_192 = arith.constant 0 : index
    %c0_193 = arith.constant 0 : index
    %598 = vector.load %arg8[%c0_192, %c0_193] : memref<128x128xbf16, #tpu.memory_space<vmem>>, vector<128x128xbf16>
    %cst_194 = arith.constant dense<0.000000e+00> : vector<64x128xf32>
    %599 = tpu.matmul %597, %598, %cst_194 {dimension_numbers = #tpu.dot_dimension_numbers<[1], [0], [0], [1], [0, 0, 1, 1], [], []>} : vector<64x128xbf16>, vector<128x128xbf16>, vector<64x128xf32> -> vector<64x128xf32>
    %c0_195 = arith.constant 0 : index
    %c0_196 = arith.constant 0 : index
    %600 = vector.load %arg9[%c0_195, %c0_196] : memref<1x128xf32, #tpu.memory_space<vmem>>, vector<1x128xf32>
    %601 = vector.broadcast %600 : vector<1x128xf32> to vector<64x128xf32>
    %602 = arith.addf %599, %601 : vector<64x128xf32>
    %c0_197 = arith.constant 0 : index
    %c0_198 = arith.constant 0 : index
    %c0_199 = arith.constant 0 : index
    %603 = vector.load %arg12[%c0_197, %c0_198, %c0_199] : memref<1x64x128xf32, #tpu.memory_space<vmem>>, vector<1x64x128xf32>
    %604 = vector.shape_cast %603 : vector<1x64x128xf32> to vector<64x128xf32>
    %605 = vector.shape_cast %602 : vector<64x128xf32> to vector<1x64x128xf32>
    tpu.vector_store %arg12[%c0_197, %c0_198, %c0_199], %605 {strides = array<i32>} : memref<1x64x128xf32, #tpu.memory_space<vmem>>, vector<1x64x128xf32>,
    return
  }
  func.func @transform_0(%arg0: i32) -> (i32, i32, i32) {
    %c0_i32 = arith.constant 0 : i32
    %c0_i32_0 = arith.constant 0 : i32
    %c0_i32_1 = arith.constant 0 : i32
    return %arg0, %c0_i32, %c0_i32_0 : i32, i32, i32
  }
  func.func @transform_1(%arg0: i32) -> (i32, i32) {
    %c0_i32 = arith.constant 0 : i32
    %c0_i32_0 = arith.constant 0 : i32
    %c0_i32_1 = arith.constant 0 : i32
    return %c0_i32, %c0_i32_0 : i32, i32
  }
  func.func @transform_2(%arg0: i32) -> (i32, i32) {
    %c0_i32 = arith.constant 0 : i32
    %c0_i32_0 = arith.constant 0 : i32
    %c0_i32_1 = arith.constant 0 : i32
    return %c0_i32, %c0_i32_0 : i32, i32
  }
  func.func @transform_3(%arg0: i32) -> (i32, i32) {
    %c0_i32 = arith.constant 0 : i32
    %c0_i32_0 = arith.constant 0 : i32
    %c0_i32_1 = arith.constant 0 : i32
    return %c0_i32, %c0_i32_0 : i32, i32
  }
  func.func @transform_4(%arg0: i32) -> (i32, i32) {
    %c0_i32 = arith.constant 0 : i32
    %c0_i32_0 = arith.constant 0 : i32
    %c0_i32_1 = arith.constant 0 : i32
    return %c0_i32, %c0_i32_0 : i32, i32
  }
  func.func @transform_5(%arg0: i32) -> (i32, i32) {
    %c0_i32 = arith.constant 0 : i32
    %c0_i32_0 = arith.constant 0 : i32
    %c0_i32_1 = arith.constant 0 : i32
    return %c0_i32, %c0_i32_0 : i32, i32
  }
  func.func @transform_6(%arg0: i32) -> (i32, i32) {
    %c0_i32 = arith.constant 0 : i32
    %c0_i32_0 = arith.constant 0 : i32
    %c0_i32_1 = arith.constant 0 : i32
    return %c0_i32, %c0_i32_0 : i32, i32
  }
  func.func @transform_7(%arg0: i32) -> (i32, i32) {
    %c0_i32 = arith.constant 0 : i32
    %c0_i32_0 = arith.constant 0 : i32
    %c0_i32_1 = arith.constant 0 : i32
    return %c0_i32, %c0_i32_0 : i32, i32
  }
  func.func @transform_8(%arg0: i32) -> (i32, i32) {
    %c0_i32 = arith.constant 0 : i32
    %c0_i32_0 = arith.constant 0 : i32
    %c0_i32_1 = arith.constant 0 : i32
    return %c0_i32, %c0_i32_0 : i32, i32
  }
  func.func @transform_9(%arg0: i32) -> (i32, i32, i32) {
    %c0_i32 = arith.constant 0 : i32
    %c0_i32_0 = arith.constant 0 : i32
    %c0_i32_1 = arith.constant 0 : i32
    return %c0_i32, %arg0, %c0_i32_0 : i32, i32, i32
  }
  func.func @transform_10(%arg0: i32) -> (i32, i32, i32) {
    %c0_i32 = arith.constant 0 : i32
    %c0_i32_0 = arith.constant 0 : i32
    %c0_i32_1 = arith.constant 0 : i32
    return %c0_i32, %arg0, %c0_i32_0 : i32, i32, i32
  }
  func.func @transform_11(%arg0: i32) -> (i32, i32, i32) {
    %c0_i32 = arith.constant 0 : i32
    %c0_i32_0 = arith.constant 0 : i32
    %c0_i32_1 = arith.constant 0 : i32
    return %arg0, %c0_i32, %c0_i32_0 : i32, i32, i32
  }
  func.func @transform_12(%arg0: i32) -> (i32, i32, i32) {
    %c0_i32 = arith.constant 0 : i32
    %c0_i32_0 = arith.constant 0 : i32
    %c0_i32_1 = arith.constant 0 : i32
    return %c0_i32, %arg0, %c0_i32_0 : i32, i32, i32
  }
  func.func @transform_13(%arg0: i32) -> (i32, i32, i32) {
    %c0_i32 = arith.constant 0 : i32
    %c0_i32_0 = arith.constant 0 : i32
    %c0_i32_1 = arith.constant 0 : i32
    return %c0_i32, %arg0, %c0_i32_0 : i32, i32, i32
  }
}

</mosaic_0001>

<bundles_post_ra>
// kernel: tpu_custom_call.1
= control target key start
LH: loop header
LB: loop body
LE: loop exit
PB: predicated region body
PF: predicated region fallthrough
CT: control target
= control target key end

     0   :  { %s13434_s0 = inlined_call_operand.hbm [shape: bf16[2,64,128], index: 0, kind: input, shape index: {}]   ;;  %s13435_s1 = inlined_call_operand.hbm [shape: bf16[128,512], index: 1, kind: input, shape index: {}]   ;;  %s13436_s2 = inlined_call_operand.hbm [shape: bf16[128,512], index: 2, kind: input, shape index: {}]   ;;  %s13437_s3 = inlined_call_operand.hbm [shape: f32[1,512], index: 3, kind: input, shape index: {}]   ;;  %s13438_s4 = inlined_call_operand.hbm [shape: bf16[128,512], index: 4, kind: input, shape index: {}]   ;;  %s13439_s5 = inlined_call_operand.hbm [shape: bf16[128,512], index: 5, kind: input, shape index: {}]   ;;  %s13440_s6 = inlined_call_operand.hbm [shape: f32[1,512], index: 6, kind: input, shape index: {}]   ;;  %s13441_s7 = inlined_call_operand.hbm [shape: bf16[128,128], index: 7, kind: input, shape index: {}]   ;;  %s13442_s8 = inlined_call_operand.vmem [shape: f32[1,128], index: 8, kind: input, shape index: {}]   ;;  %s13443_s9 = inlined_call_operand.vmem [shape: f32[2,16,128], index: 9, kind: input, shape index: {}]   ;;  %s13444_s10 = inlined_call_operand.hbm [shape: f32[2,16,128], index: 10, kind: input, shape index: {}]   ;;  %s13445_s11 = inlined_call_operand.hbm [shape: f32[2,64,128], index: 11, kind: output, shape index: {0}]   ;;  %s13446_s12 = inlined_call_operand.hbm [shape: f32[2,16,128], index: 12, kind: output, shape index: {1}]   ;;  %s13447_s13 = inlined_call_operand.hbm [shape: f32[2,16,128], index: 13, kind: output, shape index: {2}]  }
   0x1   :  { %13601 = sst [smem:[#allocation91_spill]] %s13434_s0 }
   0x2   :  { %13602 = sst [smem:[#allocation92_spill]] %s13435_s1 }
   0x3   :  { %13603 = sst [smem:[#allocation93_spill]] %s13437_s3 }
   0x4   :  { %13604 = sst [smem:[#allocation94_spill]] %s13442_s8 }
   0x5   :  { %13605 = sst [smem:[#allocation95_spill]] %s13445_s11 }
   0x6   :  { %13606 = sst [smem:[#allocation96_spill]] %s13446_s12 }
   0x7   :  { %13607 = sst [smem:[#allocation97_spill]] %s13447_s13 }
   0x8   :  { %19 = vsyncpa [#allocation5], 0 }
   0x9   :  { %21 = vsyncpa [#allocation5 + $0x1], 0 }
   0xa   :  { %22 = vsyncpa [#allocation8], 0 }
   0xb   :  { %23 = vsyncpa [#allocation11], 0 }
   0xc   :  { %24 = vsyncpa [#allocation14], 0 }
   0xd   :  { %25 = vsyncpa [#allocation17], 0 }
   0xe   :  { %26 = vsyncpa [#allocation6], 0 }
   0xf   :  { %28 = vsyncpa [#allocation6 + $0x1], 0 }
  0x10   :  { %29 = vsyncpa [#allocation22], 0 }
  0x11   :  { %31 = vsyncpa [#allocation22 + $0x1], 0  ;;  %s11203_s25 = smov 0   ;;  %s11205_s26 = smov 0  }
  0x12   :  { %s11207_s27 = smov 0   ;;  %s11209_s28 = smov 0  }
  0x13 LB: > { %13608 = sst [smem:[#allocation32_spill]] %s11094_s25  ;;  %s11224_s29 = sadd.s32 4294967295, %s11106_s28   ;;  %s11106_s28 = sphi %s11209_s28, %s13952_s28   ;;  %s11102_s27 = sphi %s11207_s27, %s13956_s27   ;;  %s11098_s26 = sphi %s11205_s26, %s13955_s26   ;;  %s11094_s25 = sphi %s11203_s25, %s13954_s25  }
  0x14   : > { %s13448_s30 = sadd.s32 4294967294, %s11106_s28   ;;  %s11228_s14 = sadd.s32 1, %s11106_s28  }
  0x15   : > { %13609 = sst [smem:[#allocation33_spill]] %s11228_s14  ;;  %s44_s15 = sadd.s32 1, %s11102_s27 }
  0x16   : > { %s41_s16 = ssub.s32 %s11106_s28, %s11228_s14  ;;  %p51_p0 = scmp.ne.s32.totalorder %s11102_s27, %s11098_s26 }
  0x17   : > { %p42_p1 = scmp.eq.s32.totalorder %s41_s16, 0  ;;  %p52_p2 = scmp.eq.s32.totalorder %s11106_s28, 0 }
  0x18   : > { %p57_p3 = scmp.ne.s32.totalorder %s11098_s26, %s11094_s25  ;;  %p13455_p4 = scmp.eq.s32.totalorder %s11224_s29, 0 }
  0x19   : > { %s11240_s17 = scalar_select %p42_p1, %s11102_s27, %s44_s15  }
  0x1a   : > { %p11242_p5 = por %p52_p2, %p51_p0  ;;  %p11248_p6 = por %p13455_p4, %p57_p3 }
  0x1b   : > { %13610 = sst [smem:[#allocation34_spill]] %s11240_s17  ;;  %p301_p7 = scmp.eq.s32.totalorder %s11224_s29, 1 }
  0x1c   : > { %s13611_s18 = scalar_select %p11242_p5, 1, 0 }
  0x1d   : > { %s13612_s19 = scalar_select %p11248_p6, 1, 0 }
  0x1e   : > { %p307_p8 = scmp.eq.s32.totalorder %s13448_s30, 1  ;;  %p8697_p9 = scmp.ge.s32.totalorder %s11106_s28, 1 }
  0x1f   : > { %13613 = sst [smem:[#allocation35_spill]] %s13612_s19  ;;  %p366_p10 = scmp.lt.s32.totalorder %s11106_s28, 3 }
  0x20   : > { %p11257_p11 = por %p301_p7, %p51_p0  ;;  %p11261_p12 = por %p307_p8, %p57_p3 }
  0x21   : > { %p11265_p13 = pnand %p8697_p9, %p366_p10  ;;  %s11108_s23 = smov [#allocation7]  }
  0x22   : > { %s13614_s20 = scalar_select %p11257_p11, 1, 0 }
  0x23   : > { %s13616_s21 = scalar_select %p11261_p12, 1, 0 }
  0x24   : > { %13615 = sst [smem:[#allocation36_spill]] %s13614_s20  ;;  %p9677_p1 = pneg %p11265_p13 }
  0x25   : > { %13617 = sst [smem:[#allocation37_spill]] %s13616_s21  ;;  %s378_s24 = sshll.u32 %s11108_s23, 4  ;;  %s379_s24 = int_to_ptr.vmem [resolvable:$true] %s378_s24 }
  0x26   : > { %s13618_s22 = scalar_select %p11265_p13, 1, 0 }
  0x27   : > { %p11273_p2 = pnand %p9677_p1, %p13455_p4  ;;  %s11109_s16 = smov [#allocation10]  }
  0x28   : > { %s405_s30 = sshll.u32 %s11109_s16, 4  ;;  %s13620_s1 = sld [smem:[#allocation92_spill]]  ;;  %s11277_s30 = int_to_ptr.vmem [resolvable:$true] %s405_s30 }
  0x29   : > { %p11287_p3 = pneg %p11273_p2 }
  0x2e   : > { %s10708_s21 = scalar_lea.hbm %s13620_s1, 4096 }
  0x2f   : > { %p10709_p0 = scmp.ne.s32.totalorder %s13620_s1, %s10708_s21  ;;  %p10715_p9 = scmp.lt.u32.totalorder %s10708_s21, %s13620_s1 }
  0x31   : > { %p10711_p7 = pnand %p11287_p3, %p10709_p0 }
  0x33   : > { %p10712_p8 = pneg %p10711_p7 }
  0x35   : > { %p10717_p10 = pnand %p10715_p9, %p10712_p8 }
  0x37   : > { %10720 = shalt.err (!%p10717_p10)
}
  0x38   : > { %s10721_s14 = scalar_lea.vmem %s379_s24, 4096  ;;  %p10729_p11 = scmp.lt.s32.totalorder %s379_s24, %s379_s24 }
  0x39   : > { %p10722_p1 = scmp.ne.s32.totalorder %s379_s24, %s10721_s14  ;;  %p10730_p6 = scmp.lt.s32.totalorder %s10721_s14, %s10721_s14 }
  0x3b   : > { %p10724_p4 = pnand %p10722_p1, %p11287_p3  ;;  %p10731_p13 = por %p10730_p6, %p10729_p11 }
  0x3d   : > { %p10725_p12 = pneg %p10724_p4 }
  0x3f   : > { %p10732_p5 = pnand %p10731_p13, %p10725_p12 }
  0x41   : > { %10735 = shalt.err (!%p10732_p5)
}
  0x42   : > { %s13466_s11 = smov 256   ;;  %s13468_s25 = smov 16  }
  0x43   : > { %9680 = dma.hbm_to_vmem [thread:$0]  (!%p11273_p2), %s13620_s1, 4096, %s379_s24, [#allocation8], %s13466_s11, %s13466_s11, %s13468_s25  }
  0x44   : > { %s13622_s3 = sld [smem:[#allocation93_spill]] }
  0x4a   : > { %s10736_s12 = scalar_lea.hbm %s13622_s3, 64 }
  0x4b   : > { %p10737_p4 = scmp.ne.s32.totalorder %s13622_s3, %s10736_s12  ;;  %p10743_p11 = scmp.lt.u32.totalorder %s10736_s12, %s13622_s3 }
  0x4d   : > { %p10739_p5 = pnand %p10737_p4, %p11287_p3 }
  0x4f   : > { %p10740_p6 = pneg %p10739_p5 }
  0x51   : > { %p10745_p12 = pnand %p10743_p11, %p10740_p6 }
  0x53   : > { %10748 = shalt.err (!%p10745_p12)
}
  0x54   : > { %s10749_s24 = scalar_lea.vmem %s11277_s30, 64  ;;  %p10757_p8 = scmp.lt.s32.totalorder %s11277_s30, %s11277_s30 }
  0x55   : > { %p10750_p13 = scmp.ne.s32.totalorder %s11277_s30, %s10749_s24  ;;  %p10758_p9 = scmp.lt.s32.totalorder %s10749_s24, %s10749_s24 }
  0x57   : > { %p10752_p0 = pnand %p10750_p13, %p11287_p3  ;;  %p10759_p10 = por %p10758_p9, %p10757_p8 }
  0x59   : > { %p10753_p7 = pneg %p10752_p0 }
  0x5b   : > { %p10760_p1 = pnand %p10759_p10, %p10753_p7 }
  0x5d   : > { %10763 = shalt.err (!%p10760_p1)
}
  0x5e   : > { %9686 = dma.hbm_to_vmem [thread:$0]  (!%p11273_p2), %s13622_s3, 64, %s11277_s30, [#allocation11]  }
  0x5f   : > { %s11112_s19 = smov [#allocation13]   ;;  %s11113_s13 = smov [#allocation9]  }
  0x60   : > { %s428_s20 = sshll.u32 %s11112_s19, 4  ;;  %s391_s17 = sshll.u32 %s11113_s13, 4  ;;  %s429_s20 = int_to_ptr.vmem [resolvable:$true] %s428_s20  ;;  %s392_s17 = int_to_ptr.vmem [resolvable:$true] %s391_s17 }
  0x61   : > { %s10764_s14 = scalar_lea.hbm %s13439_s5, 4096 }
  0x62   : > { %p10765_p4 = scmp.ne.s32.totalorder %s13439_s5, %s10764_s14  ;;  %p10771_p11 = scmp.lt.u32.totalorder %s10764_s14, %s13439_s5 }
  0x64   : > { %p10767_p5 = pnand %p10765_p4, %p11287_p3 }
  0x66   : > { %p10768_p6 = pneg %p10767_p5 }
  0x68   : > { %p10773_p12 = pnand %p10771_p11, %p10768_p6 }
  0x6a   : > { %10776 = shalt.err (!%p10773_p12)
}
  0x6b   : > { %s10777_s30 = scalar_lea.vmem %s429_s20, 4096  ;;  %p10785_p8 = scmp.lt.s32.totalorder %s429_s20, %s429_s20 }
  0x6c   : > { %p10778_p13 = scmp.ne.s32.totalorder %s429_s20, %s10777_s30  ;;  %p10786_p9 = scmp.lt.s32.totalorder %s10777_s30, %s10777_s30 }
  0x6e   : > { %p10780_p0 = pnand %p10778_p13, %p11287_p3  ;;  %p10787_p10 = por %p10786_p9, %p10785_p8 }
  0x70   : > { %p10781_p7 = pneg %p10780_p0 }
  0x72   : > { %p10788_p1 = pnand %p10787_p10, %p10781_p7 }
  0x74   : > { %10791 = shalt.err (!%p10788_p1)
}
  0x75   : > { %s13623_s11 = smov 16   ;;  %s13624_s12 = smov 256  }
  0x76   : > { %9692 = dma.hbm_to_vmem [thread:$0]  (!%p11273_p2), %s13439_s5, 4096, %s429_s20, [#allocation14], %s13624_s12, %s13624_s12, %s13623_s11  }
  0x77   : > { %s10792_s16 = scalar_lea.hbm %s13436_s2, 4096 }
  0x78   : > { %p10793_p4 = scmp.ne.s32.totalorder %s13436_s2, %s10792_s16  ;;  %p10799_p11 = scmp.lt.u32.totalorder %s10792_s16, %s13436_s2 }
  0x7a   : > { %p10795_p5 = pnand %p10793_p4, %p11287_p3 }
  0x7c   : > { %p10796_p6 = pneg %p10795_p5 }
  0x7e   : > { %p10801_p12 = pnand %p10799_p11, %p10796_p6 }
  0x80   : > { %10804 = shalt.err (!%p10801_p12)
}
  0x81   : > { %s10805_s25 = scalar_lea.vmem %s392_s17, 4096  ;;  %p10813_p8 = scmp.lt.s32.totalorder %s392_s17, %s392_s17 }
  0x82   : > { %p10806_p13 = scmp.ne.s32.totalorder %s392_s17, %s10805_s25  ;;  %p10814_p9 = scmp.lt.s32.totalorder %s10805_s25, %s10805_s25 }
  0x84   : > { %p10808_p0 = pnand %p10806_p13, %p11287_p3  ;;  %p10815_p10 = por %p10814_p9, %p10813_p8 }
  0x86   : > { %p10809_p7 = pneg %p10808_p0 }
  0x88   : > { %p10816_p1 = pnand %p10815_p10, %p10809_p7 }
  0x8a   : > { %10819 = shalt.err (!%p10816_p1)
}
  0x8b   : > { %9683 = dma.hbm_to_vmem [thread:$0]  (!%p11273_p2), %s13436_s2, 4096, %s392_s17, [#allocation8], %s13624_s12, %s13624_s12, %s13623_s11  }
  0x8c   : > { %s11114_s13 = smov [#allocation12]   ;;  %s11115_s16 = smov [#allocation15]  }
  0x8d   : > { %s415_s21 = sshll.u32 %s11114_s13, 4  ;;  %s442_s14 = sshll.u32 %s11115_s16, 4  ;;  %s416_s21 = int_to_ptr.vmem [resolvable:$true] %s415_s21  ;;  %s443_s14 = int_to_ptr.vmem [resolvable:$true] %s442_s14 }
  0x8e   : > { %s10820_s30 = scalar_lea.hbm %s13438_s4, 4096 }
  0x8f   : > { %p10821_p4 = scmp.ne.s32.totalorder %s13438_s4, %s10820_s30  ;;  %p10827_p11 = scmp.lt.u32.totalorder %s10820_s30, %s13438_s4 }
  0x91   : > { %p10823_p5 = pnand %p10821_p4, %p11287_p3 }
  0x93   : > { %p10824_p6 = pneg %p10823_p5 }
  0x95   : > { %p10829_p12 = pnand %p10827_p11, %p10824_p6 }
  0x97   : > { %10832 = shalt.err (!%p10829_p12)
}
  0x98   : > { %s10833_s17 = scalar_lea.vmem %s416_s21, 4096  ;;  %p10841_p8 = scmp.lt.s32.totalorder %s416_s21, %s416_s21 }
  0x99   : > { %p10834_p13 = scmp.ne.s32.totalorder %s416_s21, %s10833_s17  ;;  %p10842_p9 = scmp.lt.s32.totalorder %s10833_s17, %s10833_s17 }
  0x9b   : > { %p10836_p0 = pnand %p10834_p13, %p11287_p3  ;;  %p10843_p10 = por %p10842_p9, %p10841_p8 }
  0x9d   : > { %p10837_p7 = pneg %p10836_p0 }
  0x9f   : > { %p10844_p1 = pnand %p10843_p10, %p10837_p7 }
  0xa1   : > { %10847 = shalt.err (!%p10844_p1)
}
  0xa2   : > { %9689 = dma.hbm_to_vmem [thread:$0]  (!%p11273_p2), %s13438_s4, 4096, %s416_s21, [#allocation11], %s13624_s12, %s13624_s12, %s13623_s11  }
  0xa3   : > { %s10848_s16 = scalar_lea.hbm %s13440_s6, 64 }
  0xa4   : > { %p10849_p4 = scmp.ne.s32.totalorder %s13440_s6, %s10848_s16  ;;  %p10855_p11 = scmp.lt.u32.totalorder %s10848_s16, %s13440_s6 }
  0xa6   : > { %p10851_p5 = pnand %p10849_p4, %p11287_p3 }
  0xa8   : > { %p10852_p6 = pneg %p10851_p5 }
  0xaa   : > { %p10857_p12 = pnand %p10855_p11, %p10852_p6 }
  0xac   : > { %10860 = shalt.err (!%p10857_p12)
}
  0xad   : > { %s10861_s20 = scalar_lea.vmem %s443_s14, 64  ;;  %p10869_p8 = scmp.lt.s32.totalorder %s443_s14, %s443_s14 }
  0xae   : > { %p10862_p13 = scmp.ne.s32.totalorder %s443_s14, %s10861_s20  ;;  %p10870_p9 = scmp.lt.s32.totalorder %s10861_s20, %s10861_s20 }
  0xb0   : > { %p10864_p0 = pnand %p10862_p13, %p11287_p3  ;;  %p10871_p10 = por %p10870_p9, %p10869_p8 }
  0xb2   : > { %p10865_p7 = pneg %p10864_p0 }
  0xb4   : > { %p10872_p1 = pnand %p10871_p10, %p10865_p7 }
  0xb6   : > { %10875 = shalt.err (!%p10872_p1)
}
  0xb7   : > { %9695 = dma.hbm_to_vmem [thread:$0]  (!%p11273_p2), %s13440_s6, 64, %s443_s14, [#allocation14]  }
  0xb8   : > { %s11116_s21 = smov [#allocation16]   ;;  %s10876_s19 = scalar_lea.hbm %s13441_s7, 1024 }
  0xb9   : > { %s452_s17 = sshll.u32 %s11116_s21, 4  ;;  %p10877_p4 = scmp.ne.s32.totalorder %s13441_s7, %s10876_s19  ;;  %s453_s17 = int_to_ptr.vmem [resolvable:$true] %s452_s17 }
  0xba   : > { %p10883_p11 = scmp.lt.u32.totalorder %s10876_s19, %s13441_s7 }
  0xbb   : > { %p10879_p5 = pnand %p10877_p4, %p11287_p3 }
  0xbd   : > { %p10880_p6 = pneg %p10879_p5 }
  0xbf   : > { %p10885_p12 = pnand %p10883_p11, %p10880_p6 }
  0xc1   : > { %10888 = shalt.err (!%p10885_p12)
}
  0xc2   : > { %s10889_s14 = scalar_lea.vmem %s453_s17, 1024  ;;  %p10897_p8 = scmp.lt.s32.totalorder %s453_s17, %s453_s17 }
  0xc3   : > { %p10890_p13 = scmp.ne.s32.totalorder %s453_s17, %s10889_s14  ;;  %p10898_p9 = scmp.lt.s32.totalorder %s10889_s14, %s10889_s14 }
  0xc5   : > { %p10892_p0 = pnand %p10890_p13, %p11287_p3  ;;  %p10899_p10 = por %p10898_p9, %p10897_p8 }
  0xc7   : > { %p10893_p7 = pneg %p10892_p0 }
  0xc9   : > { %p10900_p1 = pnand %p10899_p10, %p10893_p7 }
  0xcb   : > { %10903 = shalt.err (!%p10900_p1)
}
  0xcc   : > { %s11117_s30 = smov 64   ;;  %s11118_s25 = smov 4  }
  0xcd   : > { %9698 = dma.hbm_to_vmem [thread:$0]  (!%p11273_p2), %s13441_s7, 1024, %s453_s17, [#allocation17], %s11117_s30, %s11117_s30, %s11118_s25  }
  0xce   : > { %p8705_p4 = scmp.ge.s32.totalorder %s11106_s28, 2 }
  0xcf   : > { %s469_s23 = sand.u32 (!%p8705_p4), 1, %s11106_s28   ;;  %s11433_s12 = sand.u32 (!%p8705_p4), 1, %s11102_s27  }
  0xd0   : > { %465 = sbr.rel (%p8705_p4) target bundleno = 272 (0x110), region = 48  ;;  %s8706_s21 = sshll.u32 (!%p8705_p4), %s11433_s12, 5 }
  0xd1   : > { %s9601_s1 = sshll.u32 (!%p8705_p4), %s11106_s28, 9  ;;  %s13625_s0 = sld [smem:[#allocation91_spill]] (!%p8705_p4) }
  0xd2   : > { %s473_s17 = scalar_lea.vmem (!%p8705_p4), [#allocation4], %s8706_s21  ;;  %s11444_s16 = scalar_lea.sflag (!%p8705_p4), [#allocation5], %s469_s23 }
  0xd3   : > { %s480_s13 = sshll.u32 (!%p8705_p4), %s473_s17, 4  ;;  %p13626_p3 = scmp.ne.s32.totalorder (!%p8705_p4), %s13611_s18, 0  ;;  %s11442_s13 = int_to_ptr.vmem [resolvable:$true] %s480_s13 }
  0xd7   : > { %s11440_s19 = scalar_lea.hbm %s13625_s0, %s9601_s1  ;;  %s10908_s30 = scalar_lea.hbm %s13625_s0, 1024 }
  0xd8   : > { %s10904_s24 = scalar_lea.hbm %s11440_s19, 512  ;;  %p10909_p11 = scmp.lt.u32.totalorder %s11440_s19, %s13625_s0 }
  0xd9   : > { %p10905_p2 = scmp.ne.s32.totalorder %s11440_s19, %s10904_s24  ;;  %p10910_p12 = scmp.lt.u32.totalorder %s10908_s30, %s10904_s24 }
  0xda   : > { %p10912_p0 = scmp.lt.u32.totalorder %s10904_s24, %s11440_s19 }
  0xdb   : > { %p10906_p5 = pnand %p10905_p2, %p13626_p3  ;;  %p10911_p13 = por %p10910_p12, %p10909_p11 }
  0xdd   : > { %p10907_p6 = pneg %p10906_p5  ;;  %p10913_p7 = por %p10912_p0, %p10911_p13 }
  0xdf   : > { %p10914_p8 = pnand %p10913_p7, %p10907_p6 }
  0xe1   : > { %10917 = shalt.err (!%p10914_p8)
}
  0xe2   : > { %s10918_s11 = scalar_lea.vmem %s11442_s13, 512  ;;  %s11119_s23 = smov [#allocation4]  }
  0xe3   : > { %p10919_p9 = scmp.ne.s32.totalorder %s11442_s13, %s10918_s11  ;;  %s10922_s21 = sshll.u32 %s11119_s23, 4  ;;  %s10923_s21 = int_to_ptr.vmem [resolvable:$false] %s10922_s21 }
  0xe4   : > { %s10924_s1 = scalar_lea.vmem %s10923_s21, 1024  ;;  %p10925_p2 = scmp.lt.s32.totalorder %s11442_s13, %s10923_s21 }
  0xe5   : > { %p10920_p10 = pnand %p10919_p9, %p13626_p3  ;;  %p10926_p5 = scmp.lt.s32.totalorder %s10924_s1, %s10918_s11 }
  0xe7   : > { %p10921_p1 = pneg %p10920_p10  ;;  %p10927_p11 = por %p10926_p5, %p10925_p2 }
  0xe9   : > { %p10928_p12 = pnand %p10927_p11, %p10921_p1 }
  0xeb   : > { %10931 = shalt.err (!%p10928_p12)
}
  0xec   : > { %s11120_s15 = smov 64   ;;  %s11121_s3 = smov 4  }
  0xed   : > { %9653 = dma.hbm_to_vmem [thread:$0]  (%p13626_p3), %s11440_s19, 512, %s11442_s13, %s11444_s16, %s11120_s15, %s11120_s15, %s11121_s3  }
  0xee   : > { %489 = sbr.rel (!%p13626_p3) target bundleno = 245 (0xf5), region = 56  ;;  %s8709_s17 = sshll.u32 (%p13626_p3), %s11433_s12, 4 }
  0xef   : > { %s8710_s24 = sshll.u32 (%p13626_p3), %s11106_s28, 3  ;;  %s493_s25 = scalar_lea.vmem (%p13626_p3), [#allocation18], %s8709_s17 }
  0xf0   : > { %s495_s30 = scalar_lea.vmem (%p13626_p3), %s13443_s9, %s8710_s24 }
  0xf1   : > { %v525_v0 = vld [vmem:[%s495_s30] sm:$0xff] (%p13626_p3)  ;;  %v527_v1 = vld [vmem:[%s495_s30 + $0x10] sm:$0xff] (%p13626_p3) }
  0xf2   : > { %526 = vst [vmem:[%s493_s25] sm:$0xff] (%p13626_p3), %v525_v0  ;;  %528 = vst [vmem:[%s493_s25 + $0x8] sm:$0xff] (%p13626_p3), %v527_v1 }
  0xf5 PF: > { %s8711_s19 = sshll.u32 %s11433_s12, 4  ;;  %s8712_s13 = sshll.u32 %s11106_s28, 7 }
  0xf6   : > { %s11480_s23 = scalar_lea.hbm %s13444_s10, %s8712_s13  ;;  %s539_s21 = scalar_lea.vmem [#allocation19], %s8711_s19 }
  0xf7   : > { %s545_s1 = sshll.u32 %s539_s21, 4  ;;  %s10932_s15 = scalar_lea.hbm %s11480_s23, 256  ;;  %s11482_s1 = int_to_ptr.vmem [resolvable:$true] %s545_s1 }
  0xf8   : > { %p10933_p3 = scmp.ne.s32.totalorder %s11480_s23, %s10932_s15  ;;  %p13627_p6 = scmp.ne.s32.totalorder %s13611_s18, 0 }
  0xf9   : > { %s10936_s17 = scalar_lea.hbm %s13444_s10, 512  ;;  %p10937_p7 = scmp.lt.u32.totalorder %s11480_s23, %s13444_s10 }
  0xfa   : > { %p10934_p13 = pnand %p10933_p3, %p13627_p6  ;;  %p10938_p8 = scmp.lt.u32.totalorder %s10936_s17, %s10932_s15 }
  0xfb   : > { %p10940_p10 = scmp.lt.u32.totalorder %s10932_s15, %s11480_s23 }
  0xfc   : > { %p10935_p0 = pneg %p10934_p13  ;;  %p10939_p9 = por %p10938_p8, %p10937_p7 }
  0xfe   : > { %p10941_p1 = por %p10940_p10, %p10939_p9 }
 0x100   : > { %p10942_p2 = pnand %p10941_p1, %p10935_p0 }
 0x102   : > { %10945 = shalt.err (!%p10942_p2)
}
 0x103   : > { %s10946_s14 = scalar_lea.vmem %s11482_s1, 256  ;;  %s11122_s30 = smov [#allocation19]  }
 0x104   : > { %p10947_p5 = scmp.ne.s32.totalorder %s11482_s1, %s10946_s14  ;;  %s10950_s25 = sshll.u32 %s11122_s30, 4  ;;  %s10951_s25 = int_to_ptr.vmem [resolvable:$false] %s10950_s25 }
 0x105   : > { %s10952_s19 = scalar_lea.vmem %s10951_s25, 512  ;;  %p10953_p3 = scmp.lt.s32.totalorder %s11482_s1, %s10951_s25 }
 0x106   : > { %p10948_p11 = pnand %p10947_p5, %p13627_p6  ;;  %p10954_p13 = scmp.lt.s32.totalorder %s10952_s19, %s10946_s14 }
 0x108   : > { %p10949_p12 = pneg %p10948_p11  ;;  %p10955_p7 = por %p10954_p13, %p10953_p3 }
 0x10a   : > { %p10956_p8 = pnand %p10955_p7, %p10949_p12 }
 0x10c   : > { %10959 = shalt.err (!%p10956_p8)
}
 0x10d   : > { %s11123_s13 = smov 256   ;;  %s11124_s20 = smov 128  }
 0x10e   : > { %s11125_s11 = smov 8  }
 0x10f   : > { %9654 = dma.hbm_to_vmem [thread:$0]  (%p13627_p6), %s11480_s23, 256, %s11482_s1, %s11444_s16, %s11123_s13, %s11124_s20, %s11125_s11  }
 0x110 PF: > { %p13628_p0 = scmp.ne.s32.totalorder %s13618_s22, 0 }
 0x112   : > { %557 = sbr.rel (%p13628_p0) target bundleno = 3199 (0xc7f), region = 98 }
 0x119   : > { %s13629_s21 = sld [smem:[#allocation35_spill]]  ;;  %s559_s15 = sand.u32 1, %s11224_s29  }
 0x11a   : > { %s11510_s12 = sand.u32 1, %s11098_s26   ;;  %s560_s17 = scalar_lea.sflag [#allocation5], %s559_s15 }
 0x11b   : > { %s8714_s3 = sshll.u32 %s11510_s12, 5 }
 0x11c   : > { %s11515_s24 = scalar_lea.vmem [#allocation4], %s8714_s3 }
 0x11f   : > { %p13630_p9 = scmp.ne.s32.totalorder %s13629_s21, 0 }
 0x121   : > { %11061 = dma.done.wait (%p13630_p9), %s560_s17, 512  }
 0x122   : > { %11063 = vsyncadd (%p13630_p9), %s560_s17, 4294966784  ;;  %p13631_p6 = scmp.eq.s32.totalorder %s11224_s29, 0 }
 0x124   : > { %11065 = dma.done.wait (%p13631_p6), [#allocation8], 8192   ;;  %p13632_p10 = pmov %p13631_p6 }
 0x125   : > { %p13633_p1 = pmov %p13631_p6 }
 0x126   : > { %11067 = vsyncadd (%p13632_p10), [#allocation8], 4294959104 }
 0x127   : > { %11069 = dma.done.wait (%p13633_p1), [#allocation11], 4160   ;;  %p13634_p2 = pmov %p13633_p1 }
 0x128   : > { %p13635_p5 = pmov %p13633_p1 }
 0x129   : > { %11071 = vsyncadd (%p13634_p2), [#allocation11], 4294963136 }
 0x12a   : > { %11073 = dma.done.wait (%p13635_p5), [#allocation14], 4160   ;;  %p13636_p11 = pmov %p13633_p1 }
 0x12b   : > { %p13637_p12 = pmov %p13633_p1 }
 0x12c   : > { %11075 = vsyncadd (%p13636_p11), [#allocation14], 4294963136 }
 0x12d   : > { %11077 = dma.done.wait (%p13637_p12), [#allocation17], 1024   ;;  %p13638_p3 = pmov %p13633_p1 }
 0x12e   : > { %s11538_s18 = sshll.u32 %s11510_s12, 4 }
 0x12f   : > { %11079 = vsyncadd (%p13638_p3), [#allocation17], 4294966272  ;;  %s599_s22 = scalar_lea.vmem [#allocation18], %s11538_s18  ;;  %s607_s16 = scalar_lea.vmem [#allocation19], %s11538_s18 }
 0x130   : > { %11081 = dma.done.wait (%p13630_p9), %s560_s17, 256  }
 0x131   : > { %11083 = vsyncadd (%p13630_p9), %s560_s17, 4294967040  ;;  %v13470_v2 = vmov 0   ;;  %v9776_v3 = vld [vmem:[#allocation7 + $0x4] ss:$16 sps:$4 sm:$0xff]   ;;  %v9778_v4 = vld [vmem:[#allocation7] ss:$16 sps:$4 sm:$0xff]  }
 0x132   : > { %948 = vmatprep.mubr.bf16.mxu1 %v13470_v2  ;;  %1354 = vmatprep.mubr.bf16.mxu0 %v13470_v2  ;;  %v9779_v5 = vld [vmem:[#allocation9 + $0x4] ss:$16 sps:$4 sm:$0xff]   ;;  %v9781_v6 = vld [vmem:[#allocation9] ss:$16 sps:$4 sm:$0xff]   ;;  %v9827_v35 = vld [vmem:[#allocation7 + $0xc] ss:$16 sps:$4 sm:$0xff]  }
 0x133   : > { %916 = vmatprep.subr.bf16.mxu1 %v9776_v3  ;;  %v9782_v7 = vld [vmem:[#allocation7 + $0x24] ss:$16 sps:$4 sm:$0xff]   ;;  %v9784_v8 = vld [vmem:[#allocation7 + $0x20] ss:$16 sps:$4 sm:$0xff]   ;;  %1322 = vmatprep.subr.bf16.mxu0 %v9779_v5  ;;  %v1116_v36 = vld [vmem:[%s599_s22] sm:$0xff]  ;;  %s13244_s23 = scalar_lea.vmem [#allocation23], %s11538_s18 }
 0x134   : > { %917 = vmatpush1.bf16.msra.mxu1 %v9778_v4  ;;  %v9785_v9 = vld [vmem:[#allocation9 + $0x24] ss:$16 sps:$4 sm:$0xff]   ;;  %1323 = vmatpush1.bf16.msra.mxu0 %v9781_v6  ;;  %v9787_v10 = vld [vmem:[#allocation9 + $0x20] ss:$16 sps:$4 sm:$0xff]   ;;  %v9825_v38 = vld [vmem:[#allocation7 + $0x8] ss:$16 sps:$4 sm:$0xff]   ;;  %v11551_v39 = vpack.c.bf16 %v1116_v36, %v1116_v36 }
 0x135   : > { %918 = vmatprep.subr.bf16.mxu1 %v9782_v7  ;;  %1324 = vmatprep.subr.bf16.mxu0 %v9785_v9  ;;  %v9788_v11 = vld [vmem:[#allocation7 + $0x44] ss:$16 sps:$4 sm:$0xff]   ;;  %v9790_v12 = vld [vmem:[#allocation7 + $0x40] ss:$16 sps:$4 sm:$0xff]   ;;  %v9830_v40 = vld [vmem:[#allocation7 + $0x2c] ss:$16 sps:$4 sm:$0xff]  }
 0x136   : > { %v9791_v13 = vld [vmem:[#allocation9 + $0x44] ss:$16 sps:$4 sm:$0xff]   ;;  %v9793_v15 = vld [vmem:[#allocation9 + $0x40] ss:$16 sps:$4 sm:$0xff]   ;;  %v9828_v41 = vld [vmem:[#allocation7 + $0x28] ss:$16 sps:$4 sm:$0xff]  }
 0x137   : > { %v9794_v14 = vld [vmem:[#allocation7 + $0x64] ss:$16 sps:$4 sm:$0xff]   ;;  %v9796_v17 = vld [vmem:[#allocation7 + $0x60] ss:$16 sps:$4 sm:$0xff]   ;;  %v9834_v42 = vld [vmem:[#allocation7 + $0x4c] ss:$16 sps:$4 sm:$0xff]  }
 0x138   : > { %919 = vmatpush1.bf16.msra.mxu1 %v9784_v8  ;;  %1325 = vmatpush1.bf16.msra.mxu0 %v9787_v10  ;;  %v9797_v16 = vld [vmem:[#allocation9 + $0x64] ss:$16 sps:$4 sm:$0xff]   ;;  %v9799_v19 = vld [vmem:[#allocation9 + $0x60] ss:$16 sps:$4 sm:$0xff]   ;;  %v9831_v43 = vld [vmem:[%s11515_s24 + $0x8] sm:$0xff]   ;;  %s13260_s1 = scalar_lea.vmem [#allocation21], %s11538_s18 }
 0x139   : > { %920 = vmatprep.subr.bf16.mxu1 %v9788_v11  ;;  %1326 = vmatprep.subr.bf16.mxu0 %v9791_v13  ;;  %v9800_v18 = vld [vmem:[#allocation7 + $0x84] ss:$16 sps:$4 sm:$0xff]   ;;  %v9802_v21 = vld [vmem:[#allocation7 + $0x80] ss:$16 sps:$4 sm:$0xff]   ;;  %v9832_v44 = vld [vmem:[#allocation7 + $0x48] ss:$16 sps:$4 sm:$0xff]  }
 0x13a   : > { %v9803_v20 = vld [vmem:[#allocation9 + $0x84] ss:$16 sps:$4 sm:$0xff]   ;;  %v9805_v23 = vld [vmem:[#allocation9 + $0x80] ss:$16 sps:$4 sm:$0xff]   ;;  %v9837_v45 = vld [vmem:[#allocation7 + $0x6c] ss:$16 sps:$4 sm:$0xff]  }
 0x13b   : > { %v9806_v22 = vld [vmem:[#allocation7 + $0xa4] ss:$16 sps:$4 sm:$0xff]   ;;  %v9808_v25 = vld [vmem:[#allocation7 + $0xa0] ss:$16 sps:$4 sm:$0xff]   ;;  %v9835_v46 = vld [vmem:[#allocation7 + $0x68] ss:$16 sps:$4 sm:$0xff]  }
 0x13c   : > { %921 = vmatpush1.bf16.msra.mxu1 %v9790_v12  ;;  %1327 = vmatpush1.bf16.msra.mxu0 %v9793_v15  ;;  %v9809_v24 = vld [vmem:[#allocation9 + $0xa4] ss:$16 sps:$4 sm:$0xff]   ;;  %v9811_v27 = vld [vmem:[#allocation9 + $0xa0] ss:$16 sps:$4 sm:$0xff]   ;;  %v9841_v47 = vld [vmem:[#allocation7 + $0x8c] ss:$16 sps:$4 sm:$0xff]  }
 0x13d   : > { %922 = vmatprep.subr.bf16.mxu1 %v9794_v14  ;;  %1328 = vmatprep.subr.bf16.mxu0 %v9797_v16  ;;  %v9812_v26 = vld [vmem:[#allocation7 + $0xc4] ss:$16 sps:$4 sm:$0xff]   ;;  %v9814_v29 = vld [vmem:[#allocation7 + $0xc0] ss:$16 sps:$4 sm:$0xff]   ;;  %v9839_v49 = vld [vmem:[#allocation7 + $0x88] ss:$16 sps:$4 sm:$0xff]  }
 0x13e   : > { %v9815_v28 = vld [vmem:[#allocation9 + $0xc4] ss:$16 sps:$4 sm:$0xff]   ;;  %v9817_v31 = vld [vmem:[#allocation9 + $0xc0] ss:$16 sps:$4 sm:$0xff]   ;;  %v9844_v50 = vld [vmem:[#allocation7 + $0xac] ss:$16 sps:$4 sm:$0xff]  }
 0x13f   : > { %v9818_v30 = vld [vmem:[#allocation7 + $0xe4] ss:$16 sps:$4 sm:$0xff]   ;;  %v9820_v33 = vld [vmem:[#allocation7 + $0xe0] ss:$16 sps:$4 sm:$0xff]   ;;  %v9842_v51 = vld [vmem:[#allocation7 + $0xa8] ss:$16 sps:$4 sm:$0xff]  }
 0x140   : > { %923 = vmatpush1.bf16.msra.mxu1 %v9796_v17  ;;  %1329 = vmatpush1.bf16.msra.mxu0 %v9799_v19  ;;  %v9821_v32 = vld [vmem:[#allocation9 + $0xe4] ss:$16 sps:$4 sm:$0xff]   ;;  %v9823_v34 = vld [vmem:[#allocation9 + $0xe0] ss:$16 sps:$4 sm:$0xff]   ;;  %v9848_v52 = vld [vmem:[#allocation7 + $0xcc] ss:$16 sps:$4 sm:$0xff]  }
 0x141   : > { %924 = vmatprep.subr.bf16.mxu1 %v9800_v18  ;;  %1330 = vmatprep.subr.bf16.mxu0 %v9803_v20  ;;  %v9824_v37 = vld [vmem:[%s11515_s24] sm:$0xff]   ;;  %v9838_v48 = vld [vmem:[%s11515_s24 + $0x10] sm:$0xff]   ;;  %v9845_v53 = vld [vmem:[%s11515_s24 + $0x18] sm:$0xff]   ;;  %s8724_s8 = sshll.u32 %s11510_s12, 6  ;;  %s13942_s25 = sld [smem:[#allocation94_spill]] }
 0x142   : > { %v9846_v54 = vld [vmem:[#allocation7 + $0xc8] ss:$16 sps:$4 sm:$0xff]   ;;  %v9851_v55 = vld [vmem:[#allocation7 + $0xec] ss:$16 sps:$4 sm:$0xff]   ;;  %v11570_v11 = vld [vmem:[#allocation13] ss:$16 sps:$4 sm:$0xff]  }
 0x143   : > { %v9849_v56 = vld [vmem:[#allocation7 + $0xe8] ss:$16 sps:$4 sm:$0xff]   ;;  %v9854_v57 = vld [vmem:[#allocation9 + $0xc] ss:$16 sps:$4 sm:$0xff]   ;;  %v11572_v12 = vld [vmem:[#allocation13 + $0xc] ss:$16 sps:$4 sm:$0xff]  }
 0x144   : > { %925 = vmatpush1.bf16.msra.mxu1 %v9802_v21  ;;  %1331 = vmatpush1.bf16.msra.mxu0 %v9805_v23  ;;  %v9852_v58 = vld [vmem:[#allocation9 + $0x8] ss:$16 sps:$4 sm:$0xff]   ;;  %v9857_v59 = vld [vmem:[#allocation9 + $0x2c] ss:$16 sps:$4 sm:$0xff]   ;;  %v11582_v15 = vld [vmem:[#allocation13 + $0x20] ss:$16 sps:$4 sm:$0xff]  }
 0x145   : > { %926 = vmatprep.subr.bf16.mxu1 %v9806_v22  ;;  %1332 = vmatprep.subr.bf16.mxu0 %v9809_v24  ;;  %v9855_v60 = vld [vmem:[#allocation9 + $0x28] ss:$16 sps:$4 sm:$0xff]   ;;  %v9860_v61 = vld [vmem:[#allocation9 + $0x4c] ss:$16 sps:$4 sm:$0xff]   ;;  %v11584_v16 = vld [vmem:[#allocation13 + $0x2c] ss:$16 sps:$4 sm:$0xff]  }
 0x146   : > { %v9858_v62 = vld [vmem:[#allocation9 + $0x48] ss:$16 sps:$4 sm:$0xff]   ;;  %v9863_v63 = vld [vmem:[#allocation9 + $0x6c] ss:$16 sps:$4 sm:$0xff]   ;;  %v11594_v19 = vld [vmem:[#allocation13 + $0x40] ss:$16 sps:$4 sm:$0xff]  }
 0x147   : > { %v9861_v0 = vld [vmem:[#allocation9 + $0x68] ss:$16 sps:$4 sm:$0xff]   ;;  %v9866_v1 = vld [vmem:[#allocation9 + $0x8c] ss:$16 sps:$4 sm:$0xff]   ;;  %v11596_v20 = vld [vmem:[#allocation13 + $0x4c] ss:$16 sps:$4 sm:$0xff]  }
 0x148   : > { %927 = vmatpush1.bf16.msra.mxu1 %v9808_v25  ;;  %1333 = vmatpush1.bf16.msra.mxu0 %v9811_v27  ;;  %v9864_v3 = vld [vmem:[#allocation9 + $0x88] ss:$16 sps:$4 sm:$0xff]   ;;  %v9869_v4 = vld [vmem:[#allocation9 + $0xac] ss:$16 sps:$4 sm:$0xff]   ;;  %v11606_v23 = vld [vmem:[#allocation13 + $0x60] ss:$16 sps:$4 sm:$0xff]  }
 0x149   : > { %928 = vmatprep.subr.bf16.mxu1 %v9812_v26  ;;  %1334 = vmatprep.subr.bf16.mxu0 %v9815_v28  ;;  %v9867_v5 = vld [vmem:[#allocation9 + $0xa8] ss:$16 sps:$4 sm:$0xff]   ;;  %v9872_v6 = vld [vmem:[#allocation9 + $0xcc] ss:$16 sps:$4 sm:$0xff]   ;;  %v11608_v24 = vld [vmem:[#allocation13 + $0x6c] ss:$16 sps:$4 sm:$0xff]  }
 0x14a   : > { %v9870_v7 = vld [vmem:[#allocation9 + $0xc8] ss:$16 sps:$4 sm:$0xff]   ;;  %v9875_v8 = vld [vmem:[#allocation9 + $0xec] ss:$16 sps:$4 sm:$0xff]   ;;  %v11618_v27 = vld [vmem:[#allocation13 + $0x80] ss:$16 sps:$4 sm:$0xff]  }
 0x14b   : > { %v9873_v9 = vld [vmem:[#allocation9 + $0xe8] ss:$16 sps:$4 sm:$0xff]   ;;  %v11575_v13 = vld [vmem:[#allocation13 + $0x8] ss:$16 sps:$4 sm:$0xff]   ;;  %v11620_v28 = vld [vmem:[#allocation13 + $0x8c] ss:$16 sps:$4 sm:$0xff]  }
 0x14c   : > { %929 = vmatpush1.bf16.msra.mxu1 %v9814_v29  ;;  %1335 = vmatpush1.bf16.msra.mxu0 %v9817_v31  ;;  %v11568_v10 = vld [vmem:[#allocation13 + $0x4] ss:$16 sps:$4 sm:$0xff]   ;;  %v11587_v17 = vld [vmem:[#allocation13 + $0x28] ss:$16 sps:$4 sm:$0xff]   ;;  %v11630_v31 = vld [vmem:[#allocation13 + $0xa0] ss:$16 sps:$4 sm:$0xff]  }
 0x14d   : > { %930 = vmatprep.subr.bf16.mxu1 %v9818_v30  ;;  %1336 = vmatprep.subr.bf16.mxu0 %v9821_v32  ;;  %v11580_v14 = vld [vmem:[#allocation13 + $0x24] ss:$16 sps:$4 sm:$0xff]   ;;  %v11599_v21 = vld [vmem:[#allocation13 + $0x48] ss:$16 sps:$4 sm:$0xff]   ;;  %v11632_v32 = vld [vmem:[#allocation13 + $0xac] ss:$16 sps:$4 sm:$0xff]  }
 0x14e   : > { %v11592_v18 = vld [vmem:[#allocation13 + $0x44] ss:$16 sps:$4 sm:$0xff]   ;;  %v11611_v25 = vld [vmem:[#allocation13 + $0x68] ss:$16 sps:$4 sm:$0xff]   ;;  %v11644_v36 = vld [vmem:[#allocation13 + $0xcc] ss:$16 sps:$4 sm:$0xff]  }
 0x14f   : > { %v11604_v22 = vld [vmem:[#allocation13 + $0x64] ss:$16 sps:$4 sm:$0xff]   ;;  %v11623_v29 = vld [vmem:[#allocation13 + $0x88] ss:$16 sps:$4 sm:$0xff]   ;;  %s13284_s19 = scalar_lea.vmem [#allocation20], %s8724_s8  ;;  %s13943_s13 = sld [smem:[#allocation36_spill]] }
 0x150   : > { %931 = vmatpush1.bf16.msra.mxu1 %v9820_v33  ;;  %1337 = vmatpush1.bf16.msra.mxu0 %v9823_v34  ;;  %v11616_v26 = vld [vmem:[#allocation13 + $0x84] ss:$16 sps:$4 sm:$0xff]   ;;  %v11635_v33 = vld [vmem:[#allocation13 + $0xa8] ss:$16 sps:$4 sm:$0xff]   ;;  %s8435_s20 = sshll.u32 %s13260_s1, 4  ;;  %s9597_s11 = sshll.u32 %s11224_s29, 7  ;;  %s13296_s20 = int_to_ptr.vmem [resolvable:$true] %s8435_s20 }
 0x151   : > { %989 = vmatprep.subr.bf16.mxu1 %v9827_v35  ;;  %1658 = vmatprep.subr.bf16.mxu0 %v11568_v10  ;;  %v11628_v30 = vld [vmem:[#allocation13 + $0xa4] ss:$16 sps:$4 sm:$0xff]   ;;  %v11642_v35 = vld [vmem:[#allocation13 + $0xc0] ss:$16 sps:$4 sm:$0xff]   ;;  %s13944_s17 = sld [smem:[#allocation96_spill]]  ;;  %s13308_s18 = scalar_lea.sflag [#allocation22], %s559_s15 }
 0x152   : > { %v11640_v34 = vld [vmem:[#allocation13 + $0xc4] ss:$16 sps:$4 sm:$0xff]  }
 0x153   : > { %949 = vmatmul.mubr.bf16.vlgmr.msra.gmra.mrb[0].mxu1 %v9824_v37  ;;  %1355 = vmatmul.mubr.bf16.vlgmr.msra.gmra.mrb[0].mxu0 %v11551_v39 }
 0x154   : > { %990 = vmatpush1.bf16.msra.mxu1 %v9825_v38  ;;  %958 = vmatprep.mubr.bf16.mxu1 %v13470_v2  ;;  %v11652_v38 = vld [vmem:[#allocation13 + $0xe4] ss:$16 sps:$4 sm:$0xff]  }
 0x155   : > { %991 = vmatprep.subr.bf16.mxu1 %v9830_v40  ;;  %1690 = vmatprep.mubr.bf16.mxu0 %v13470_v2  ;;  %v11656_v40 = vld [vmem:[#allocation13 + $0xec] ss:$16 sps:$4 sm:$0xff]   ;;  %p13945_p7 = scmp.ne.s32.totalorder %s13943_s13, 0 }
 0x156   : > { %1659 = vmatpush1.bf16.msra.mxu0 %v11570_v11 }
 0x157   : > { %1660 = vmatprep.subr.bf16.mxu0 %v11580_v14  ;;  %s13304_s24 = scalar_lea.hbm %s13944_s17, %s9597_s11 }
 0x158   : > { %992 = vmatpush1.bf16.msra.mxu1 %v9828_v41  ;;  %v11659_v41 = vld [vmem:[#allocation13 + $0xe8] ss:$16 sps:$4 sm:$0xff]  }
 0x159   : > { %993 = vmatprep.subr.bf16.mxu1 %v9834_v42  ;;  %v8763_v42 = vld [vmem:[%s599_s22 + $0x8] sm:$0xff]  ;;  %s10960_s22 = scalar_lea.vmem %s13296_s20, 256 }
 0x15a   : > { %1661 = vmatpush1.bf16.msra.mxu0 %v11582_v15  ;;  %p10961_p13 = scmp.ne.s32.totalorder %s13296_s20, %s10960_s22 }
 0x15b   : > { %959 = vmatmul.mubr.bf16.gmra.mrb[4].mxu1 %v9831_v43  ;;  %1662 = vmatprep.subr.bf16.mxu0 %v11592_v18 }
 0x15c   : > { %994 = vmatpush1.bf16.msra.mxu1 %v9832_v44  ;;  %968 = vmatprep.mubr.bf16.mxu1 %v13470_v2  ;;  %v11666_v44 = vld [vmem:[#allocation12 + $0x4] ss:$16 sps:$4 sm:$0xff]   ;;  %p10962_p8 = pnand %p10961_p13, %p13945_p7 }
 0x15d   : > { %995 = vmatprep.subr.bf16.mxu1 %v9837_v45  ;;  %v11668_v45 = vld [vmem:[#allocation12 + $0xc] ss:$16 sps:$4 sm:$0xff]  }
 0x15e   : > { %1663 = vmatpush1.bf16.msra.mxu0 %v11594_v19  ;;  %p10963_p0 = pneg %p10962_p8 }
 0x15f   : > { %1664 = vmatprep.subr.bf16.mxu0 %v11604_v22 }
 0x160   : > { %996 = vmatpush1.bf16.msra.mxu1 %v9835_v46  ;;  %v11670_v46 = vld [vmem:[#allocation12] ss:$16 sps:$4 sm:$0xff]  }
 0x161   : > { %997 = vmatprep.subr.bf16.mxu1 %v9841_v47  ;;  %v11672_v47 = vld [vmem:[#allocation12 + $0x8] ss:$16 sps:$4 sm:$0xff]  }
 0x162   : > { %1665 = vmatpush1.bf16.msra.mxu0 %v11606_v23 }
 0x163   : > { %969 = vmatmul.mubr.bf16.gmra.mrb[8].mxu1 %v9838_v48  ;;  %1666 = vmatprep.subr.bf16.mxu0 %v11616_v26 }
 0x164   : > { %998 = vmatpush1.bf16.msra.mxu1 %v9839_v49  ;;  %978 = vmatprep.mubr.bf16.mxu1 %v13470_v2  ;;  %v11680_v49 = vld [vmem:[#allocation12 + $0x2c] ss:$16 sps:$4 sm:$0xff]  }
 0x165   : > { %999 = vmatprep.subr.bf16.mxu1 %v9844_v50  ;;  %v11683_v50 = vld [vmem:[#allocation12 + $0x20] ss:$16 sps:$4 sm:$0xff]  }
 0x166   : > { %1667 = vmatpush1.bf16.msra.mxu0 %v11618_v27  ;;  %13639 = vst [vmem:[#allocation38_spill] sm:$0xff] %v11683_v50 }
 0x167   : > { %1668 = vmatprep.subr.bf16.mxu0 %v11628_v30 }
 0x168   : > { %1000 = vmatpush1.bf16.msra.mxu1 %v9842_v51  ;;  %v11685_v51 = vld [vmem:[#allocation12 + $0x28] ss:$16 sps:$4 sm:$0xff]  }
 0x169   : > { %1001 = vmatprep.subr.bf16.mxu1 %v9848_v52  ;;  %13640 = vst [vmem:[#allocation39_spill] sm:$0xff] %v11685_v51  ;;  %v11692_v52 = vld [vmem:[#allocation12 + $0x44] ss:$16 sps:$4 sm:$0xff]  }
 0x16a   : > { %1669 = vmatpush1.bf16.msra.mxu0 %v11630_v31  ;;  %13641 = vst [vmem:[#allocation40_spill] sm:$0xff] %v11692_v52 }
 0x16b   : > { %979 = vmatmul.mubr.bf16.gmra.mrb[12].mxu1 %v9845_v53  ;;  %1670 = vmatprep.subr.bf16.mxu0 %v11640_v34 }
 0x16c   : > { %1002 = vmatpush1.bf16.msra.mxu1 %v9846_v54  ;;  %1021 = vmatprep.mubr.bf16.mxu1 %v13470_v2  ;;  %v11696_v54 = vld [vmem:[#allocation12 + $0x40] ss:$16 sps:$4 sm:$0xff]  }
 0x16d   : > { %1003 = vmatprep.subr.bf16.mxu1 %v9851_v55  ;;  %13643 = vst [vmem:[#allocation42_spill] sm:$0xff] %v11696_v54  ;;  %v11698_v55 = vld [vmem:[#allocation12 + $0x48] ss:$16 sps:$4 sm:$0xff]  }
 0x16e   : > { %1671 = vmatpush1.bf16.msra.mxu0 %v11642_v35  ;;  %13644 = vst [vmem:[#allocation43_spill] sm:$0xff] %v11698_v55 }
 0x16f   : > { %1672 = vmatprep.subr.bf16.mxu0 %v11652_v38 }
 0x170   : > { %1004 = vmatpush1.bf16.msra.mxu1 %v9849_v56  ;;  %v11704_v56 = vld [vmem:[#allocation12 + $0x64] ss:$16 sps:$4 sm:$0xff]  }
 0x171   : > { %1363 = vmatprep.subr.bf16.mxu1 %v9854_v57  ;;  %13645 = vst [vmem:[#allocation44_spill] sm:$0xff] %v11704_v56  ;;  %v11706_v57 = vld [vmem:[#allocation12 + $0x6c] ss:$16 sps:$4 sm:$0xff]  }
 0x172   : > { %13646 = vst [vmem:[#allocation45_spill] sm:$0xff] %v11706_v57 }
 0x173   : > { %1022 = vmatmul.mubr.bf16.vlgmr.msra.gmra.mrb[16].mxu1 %v9824_v37  ;;  %v11647_v37 = vld [vmem:[#allocation13 + $0xc8] ss:$16 sps:$4 sm:$0xff]  }
 0x174   : > { %1364 = vmatpush1.bf16.msra.mxu1 %v9852_v58  ;;  %1031 = vmatprep.mubr.bf16.mxu1 %v13470_v2  ;;  %v11708_v58 = vld [vmem:[#allocation12 + $0x60] ss:$16 sps:$4 sm:$0xff]  }
 0x175   : > { %1365 = vmatprep.subr.bf16.mxu1 %v9857_v59  ;;  %13647 = vst [vmem:[#allocation46_spill] sm:$0xff] %v11708_v58  ;;  %v11710_v59 = vld [vmem:[#allocation12 + $0x68] ss:$16 sps:$4 sm:$0xff]  }
 0x176   : > { %13648 = vst [vmem:[#allocation47_spill] sm:$0xff] %v11710_v59 }
 0x178   : > { %1366 = vmatpush1.bf16.msra.mxu1 %v9855_v60  ;;  %v11716_v60 = vld [vmem:[#allocation12 + $0x84] ss:$16 sps:$4 sm:$0xff]  }
 0x179   : > { %1367 = vmatprep.subr.bf16.mxu1 %v9860_v61  ;;  %13649 = vst [vmem:[#allocation48_spill] sm:$0xff] %v11716_v60  ;;  %v11718_v61 = vld [vmem:[#allocation12 + $0x8c] ss:$16 sps:$4 sm:$0xff]  }
 0x17a   : > { %13650 = vst [vmem:[#allocation49_spill] sm:$0xff] %v11718_v61 }
 0x17b   : > { %1032 = vmatmul.mubr.bf16.gmra.mrb[20].mxu1 %v9831_v43  ;;  %v1465_v43 = vpack.c.bf16 %v8763_v42, %v8763_v42  ;;  %v11752_v42 = vld [vmem:[#allocation12 + $0xec] ss:$16 sps:$4 sm:$0xff]  }
 0x17c   : > { %1368 = vmatpush1.bf16.msra.mxu1 %v9858_v62  ;;  %1041 = vmatprep.mubr.bf16.mxu1 %v13470_v2  ;;  %v11720_v62 = vld [vmem:[#allocation12 + $0x80] ss:$16 sps:$4 sm:$0xff]   ;;  %13662 = vst [vmem:[#allocation61_spill] sm:$0xff] %v11752_v42 }
 0x17d   : > { %1369 = vmatprep.subr.bf16.mxu1 %v9863_v63  ;;  %13651 = vst [vmem:[#allocation50_spill] sm:$0xff] %v11720_v62  ;;  %v11722_v63 = vld [vmem:[#allocation12 + $0x88] ss:$16 sps:$4 sm:$0xff]  }
 0x17e   : > { %13652 = vst [vmem:[#allocation51_spill] sm:$0xff] %v11722_v63 }
 0x180   : > { %1370 = vmatpush1.bf16.msra.mxu1 %v9861_v0  ;;  %v11728_v0 = vld [vmem:[#allocation12 + $0xa0] ss:$16 sps:$4 sm:$0xff]  }
 0x181   : > { %1371 = vmatprep.subr.bf16.mxu1 %v9866_v1  ;;  %13653 = vst [vmem:[#allocation52_spill] sm:$0xff] %v11728_v0  ;;  %v11730_v1 = vld [vmem:[#allocation12 + $0xa4] ss:$16 sps:$4 sm:$0xff]  }
 0x182   : > { %13654 = vst [vmem:[#allocation53_spill] sm:$0xff] %v11730_v1 }
 0x183   : > { %1042 = vmatmul.mubr.bf16.gmra.mrb[24].mxu1 %v9838_v48  ;;  %v11678_v48 = vld [vmem:[#allocation12 + $0x24] ss:$16 sps:$4 sm:$0xff]  }
 0x184   : > { %1372 = vmatpush1.bf16.msra.mxu1 %v9864_v3  ;;  %1051 = vmatprep.mubr.bf16.mxu1 %v13470_v2  ;;  %v11732_v3 = vld [vmem:[#allocation12 + $0xa8] ss:$16 sps:$4 sm:$0xff]  }
 0x185   : > { %1373 = vmatprep.subr.bf16.mxu1 %v9869_v4  ;;  %13655 = vst [vmem:[#allocation54_spill] sm:$0xff] %v11732_v3  ;;  %v11734_v4 = vld [vmem:[#allocation12 + $0xac] ss:$16 sps:$4 sm:$0xff]  }
 0x186   : > { %13656 = vst [vmem:[#allocation55_spill] sm:$0xff] %v11734_v4 }
 0x188   : > { %1374 = vmatpush1.bf16.msra.mxu1 %v9867_v5  ;;  %v11736_v5 = vld [vmem:[#allocation12 + $0xc4] ss:$16 sps:$4 sm:$0xff]  }
 0x189   : > { %1375 = vmatprep.subr.bf16.mxu1 %v9872_v6  ;;  %13657 = vst [vmem:[#allocation56_spill] sm:$0xff] %v11736_v5  ;;  %v11739_v6 = vld [vmem:[#allocation12 + $0xcc] ss:$16 sps:$4 sm:$0xff]  }
 0x18a   : > { %13658 = vst [vmem:[#allocation57_spill] sm:$0xff] %v11739_v6 }
 0x18b   : > { %1052 = vmatmul.mubr.bf16.gmra.mrb[28].mxu1 %v9845_v53  ;;  %v11694_v53 = vld [vmem:[#allocation12 + $0x4c] ss:$16 sps:$4 sm:$0xff]  }
 0x18c   : > { %1376 = vmatpush1.bf16.msra.mxu1 %v9870_v7  ;;  %1395 = vmatprep.mubr.bf16.mxu1 %v13470_v2  ;;  %13642 = vst [vmem:[#allocation41_spill] sm:$0xff] %v11694_v53  ;;  %v11743_v7 = vld [vmem:[#allocation12 + $0xc0] ss:$16 sps:$4 sm:$0xff]  }
 0x18d   : > { %1377 = vmatprep.subr.bf16.mxu1 %v9875_v8  ;;  %13659 = vst [vmem:[#allocation58_spill] sm:$0xff] %v11743_v7  ;;  %v11747_v8 = vld [vmem:[#allocation12 + $0xc8] ss:$16 sps:$4 sm:$0xff]  }
 0x18e   : > { %13660 = vst [vmem:[#allocation59_spill] sm:$0xff] %v11747_v8 }
 0x190   : > { %1378 = vmatpush1.bf16.msra.mxu1 %v9873_v9  ;;  %v11749_v9 = vld [vmem:[#allocation12 + $0xe4] ss:$16 sps:$4 sm:$0xff]  }
 0x191   : > { %1699 = vmatprep.subr.bf16.mxu1 %v11572_v12  ;;  %13661 = vst [vmem:[#allocation60_spill] sm:$0xff] %v11749_v9 }
 0x193   : > { %1396 = vmatmul.mubr.bf16.vlgmr.msra.gmra.mrb[32].mxu1 %v11551_v39  ;;  %v11654_v39 = vld [vmem:[#allocation13 + $0xe0] ss:$16 sps:$4 sm:$0xff]  }
 0x194   : > { %1731 = vmatprep.mubr.bf16.mxu1 %v13470_v2  ;;  %1700 = vmatpush1.bf16.msra.mxu1 %v11575_v13 }
 0x195   : > { %1701 = vmatprep.subr.bf16.mxu1 %v11584_v16  ;;  %1673 = vmatpush1.bf16.msra.mxu0 %v11654_v39 }
 0x196   : > { %1900 = vmatprep.subr.bf16.mxu0 %v11666_v44 }
 0x198   : > { %1702 = vmatpush1.bf16.msra.mxu1 %v11587_v17  ;;  %1691 = vmatmul.mubr.bf16.vlgmr.msra.gmra.mrb[4].mxu0 %v1465_v43 }
 0x199   : > { %1703 = vmatprep.subr.bf16.mxu1 %v11596_v20  ;;  %1901 = vmatpush1.bf16.msra.mxu0 %v11670_v46 }
 0x19a   : > { %1932 = vmatprep.mubr.bf16.mxu0 %v13470_v2  ;;  %1902 = vmatprep.subr.bf16.mxu0 %v11678_v48 }
 0x19c   : > { %1704 = vmatpush1.bf16.msra.mxu1 %v11599_v21 }
 0x19d   : > { %1705 = vmatprep.subr.bf16.mxu1 %v11608_v24  ;;  %1903 = vmatpush1.bf16.msra.mxu0 %v11683_v50 }
 0x19e   : > { %1904 = vmatprep.subr.bf16.mxu0 %v11692_v52 }
 0x1a0   : > { %1706 = vmatpush1.bf16.msra.mxu1 %v11611_v25 }
 0x1a1   : > { %1707 = vmatprep.subr.bf16.mxu1 %v11620_v28  ;;  %1905 = vmatpush1.bf16.msra.mxu0 %v11696_v54 }
 0x1a2   : > { %1906 = vmatprep.subr.bf16.mxu0 %v11704_v56 }
 0x1a4   : > { %1708 = vmatpush1.bf16.msra.mxu1 %v11623_v29 }
 0x1a5   : > { %1709 = vmatprep.subr.bf16.mxu1 %v11632_v32  ;;  %1907 = vmatpush1.bf16.msra.mxu0 %v11708_v58 }
 0x1a6   : > { %1908 = vmatprep.subr.bf16.mxu0 %v11716_v60 }
 0x1a8   : > { %1710 = vmatpush1.bf16.msra.mxu1 %v11635_v33 }
 0x1a9   : > { %1711 = vmatprep.subr.bf16.mxu1 %v11644_v36  ;;  %1909 = vmatpush1.bf16.msra.mxu0 %v11720_v62 }
 0x1aa   : > { %1910 = vmatprep.subr.bf16.mxu0 %v11730_v1 }
 0x1ac   : > { %1712 = vmatpush1.bf16.msra.mxu1 %v11647_v37 }
 0x1ad   : > { %1713 = vmatprep.subr.bf16.mxu1 %v11656_v40  ;;  %1911 = vmatpush1.bf16.msra.mxu0 %v11728_v0 }
 0x1ae   : > { %1912 = vmatprep.subr.bf16.mxu0 %v11736_v5 }
 0x1b0   : > { %1714 = vmatpush1.bf16.msra.mxu1 %v11659_v41 }
 0x1b1   : > { %1941 = vmatprep.subr.bf16.mxu1 %v11668_v45  ;;  %1913 = vmatpush1.bf16.msra.mxu0 %v11743_v7  ;;  %v712_v7 = vlaneseq }
 0x1b2   : > { %1914 = vmatprep.subr.bf16.mxu0 %v11749_v9  ;;  %v710_v9 = vld [vmem:[#allocation10] sm:$0xf] }
 0x1b3   : > { %1732 = vmatmul.mubr.bf16.vlgmr.msra.gmra.mrb[36].mxu1 %v1465_v43  ;;  %v11755_v43 = vld [vmem:[#allocation12 + $0xe0] ss:$16 sps:$4 sm:$0xff]   ;;  %v11767_v5 = vshrl.u32 %v712_v7, 7 }
 0x1b4   : > { %1942 = vmatpush1.bf16.msra.mxu1 %v11672_v47  ;;  %1973 = vmatprep.mubr.bf16.mxu1 %v13470_v2  ;;  %13663 = vst [vmem:[#allocation62_spill] sm:$0xff] %v11755_v43  ;;  %v11759_v2 = vld [vmem:[#allocation12 + $0xe8] ss:$16 sps:$4 sm:$0xff]  }
 0x1b5   : > { %1943 = vmatprep.subr.bf16.mxu1 %v11680_v49  ;;  %13664 = vst [vmem:[#allocation63_spill] sm:$0xff] %v11759_v2  ;;  %1915 = vmatpush1.bf16.msra.mxu0 %v11755_v43  ;;  %v13495_v0 = vsub.s32 1, %v11767_v5 }
 0x1b7   : > { %v719_v43 = vrot.slane %v710_v9, %v13495_v0 }
 0x1b8   : > { %1944 = vmatpush1.bf16.msra.mxu1 %v11685_v51 }
 0x1b9   : > { %1945 = vmatprep.subr.bf16.mxu1 %v11694_v53 }
 0x1bc   : > { %1946 = vmatpush1.bf16.msra.mxu1 %v11698_v55 }
 0x1bd   : > { %1947 = vmatprep.subr.bf16.mxu1 %v11706_v57 }
 0x1c0   : > { %1948 = vmatpush1.bf16.msra.mxu1 %v11710_v59 }
 0x1c1   : > { %1949 = vmatprep.subr.bf16.mxu1 %v11718_v61 }
 0x1c4   : > { %1950 = vmatpush1.bf16.msra.mxu1 %v11722_v63 }
 0x1c5   : > { %1951 = vmatprep.subr.bf16.mxu1 %v11734_v4 }
 0x1c8   : > { %1952 = vmatpush1.bf16.msra.mxu1 %v11732_v3  ;;  %v11761_v3 = vld [vmem:[#allocation9 + $0x4] ss:$16 sps:$4 sm:$0xff]  }
 0x1c9   : > { %1953 = vmatprep.subr.bf16.mxu1 %v11739_v6  ;;  %13665 = vst [vmem:[#allocation64_spill] sm:$0xff] %v11761_v3  ;;  %2210 = vmatprep.subr.bf16.mxu0 %v11761_v3  ;;  %v10692_v6 = vld [vmem:[#allocation9 + $0xc] ss:$16 sps:$4 sm:$0xff]  }
 0x1cc   : > { %1954 = vmatpush1.bf16.msra.mxu1 %v11747_v8  ;;  %v13493_v8 = vsub.s32 0, %v11767_v5 }
 0x1cd   : > { %1955 = vmatprep.subr.bf16.mxu1 %v11752_v42 }
 0x1ce   : > { %v715_v4 = vrot.slane %v710_v9, %v13493_v8 }
 0x1d0   : > { %1956 = vmatpush1.bf16.msra.mxu1 %v11759_v2 }
 0x1d1   : > { %2251 = vmatprep.subr.bf16.mxu1 %v10692_v6 }
 0x226   : > { %v950_v42 = vpop.f32.mrb[0].mxu1  ;;  %v1356_v6 = vpop.f32.mrb[0].mxu0 }
 0x227   : > { %v951_v2 = vadd.f32 %v950_v42, %v715_v4  ;;  %v952_v1 = vpop.f32.mrb[1].mxu1  ;;  %v1358_v60 = vpop.f32.mrb[1].mxu0 }
 0x228   : > { %v953_v3 = vadd.f32 %v952_v1, %v719_v43  ;;  %v954_v63 = vpop.f32.mrb[2].mxu1  ;;  %v1360_v57 = vpop.f32.mrb[2].mxu0 }
 0x229   : > { %v11775_v62 = vadd.f32 %v954_v63, %v715_v4  ;;  %v1404_v7 = vadd.f32 %v1356_v6, %v951_v2  ;;  %v956_v61 = vpop.f32.mrb[3].mxu1  ;;  %v1361_v56 = vpop.f32.mrb[3].mxu0 }
 0x22a   : > { %v11777_v59 = vadd.f32 %v956_v61, %v719_v43  ;;  %v1405_v58 = vadd.f32 %v1358_v60, %v953_v3 }
 0x22e   : > { %v960_v8 = vpop.f32.mrb[4].mxu1 }
 0x22f   : > { %v11779_v55 = vadd.f32 %v960_v8, %v715_v4  ;;  %v962_v0 = vpop.f32.mrb[5].mxu1 }
 0x230   : > { %v11781_v54 = vadd.f32 %v962_v0, %v719_v43  ;;  %v964_v42 = vpop.f32.mrb[6].mxu1 }
 0x231   : > { %13666 = vst [vmem:[#allocation65_spill] sm:$0xff] %v11779_v55  ;;  %v11783_v1 = vadd.f32 %v964_v42, %v715_v4  ;;  %v966_v53 = vpop.f32.mrb[7].mxu1 }
 0x232   : > { %13667 = vst [vmem:[#allocation66_spill] sm:$0xff] %v11781_v54  ;;  %v11785_v63 = vadd.f32 %v966_v53, %v719_v43  ;;  %v8798_v54 = vmul.f32 -1.442695, %v1405_v58 }
 0x233   : > { %13668 = vst [vmem:[#allocation67_spill] sm:$0xff] %v11783_v1 }
 0x234   : > { %13669 = vst [vmem:[#allocation68_spill] sm:$0xff] %v11785_v63  ;;  %10436 = vpow2.f32 %v8798_v54 }
 0x236   : > { %v970_v2 = vpop.f32.mrb[8].mxu1 }
 0x237   : > { %v11787_v6 = vadd.f32 %v970_v2, %v715_v4  ;;  %v972_v61 = vpop.f32.mrb[9].mxu1 }
 0x238   : > { %v11789_v52 = vadd.f32 %v972_v61, %v719_v43  ;;  %v974_v57 = vpop.f32.mrb[10].mxu1  ;;  %v13499_v61 = vsub.s32 2, %v11767_v5 }
 0x239   : > { %13670 = vst [vmem:[#allocation69_spill] sm:$0xff] %v11787_v6  ;;  %v11791_v56 = vadd.f32 %v974_v57, %v715_v4  ;;  %v976_v60 = vpop.f32.mrb[11].mxu1  ;;  %v13500_v57 = vsub.s32 3, %v11767_v5 }
 0x23a   : > { %13671 = vst [vmem:[#allocation70_spill] sm:$0xff] %v11789_v52  ;;  %v11793_v3 = vadd.f32 %v976_v60, %v719_v43  ;;  %v723_v60 = vrot.slane %v710_v9, %v13499_v61 }
 0x23b   : > { %13672 = vst [vmem:[#allocation71_spill] sm:$0xff] %v11791_v56 }
 0x23c   : > { %13673 = vst [vmem:[#allocation72_spill] sm:$0xff] %v11793_v3 }
 0x23e   : > { %v980_v0 = vpop.f32.mrb[12].mxu1 }
 0x23f   : > { %v11795_v8 = vadd.f32 %v980_v0, %v715_v4  ;;  %v982_v42 = vpop.f32.mrb[13].mxu1  ;;  %v727_v0 = vrot.slane %v710_v9, %v13500_v57  ;;  %v8797_v9 = vmul.f32 -1.442695, %v1404_v7 }
 0x240   : > { %v11797_v1 = vadd.f32 %v982_v42, %v719_v43  ;;  %v984_v53 = vpop.f32.mrb[14].mxu1 }
 0x241   : > { %13674 = vst [vmem:[#allocation73_spill] sm:$0xff] %v11795_v8  ;;  %v11799_v63 = vadd.f32 %v984_v53, %v715_v4  ;;  %v986_v2 = vpop.f32.mrb[15].mxu1  ;;  %10438 = vpow2.f32 %v8797_v9 }
 0x242   : > { %13675 = vst [vmem:[#allocation74_spill] sm:$0xff] %v11797_v1  ;;  %v11801_v6 = vadd.f32 %v986_v2, %v719_v43 }
 0x243   : > { %13676 = vst [vmem:[#allocation75_spill] sm:$0xff] %v11799_v63 }
 0x244   : > { %13677 = vst [vmem:[#allocation76_spill] sm:$0xff] %v11801_v6 }
 0x246   : > { %v1023_v56 = vpop.f32.mrb[16].mxu1 }
 0x247   : > { %v1025_v3 = vpop.f32.mrb[17].mxu1 }
 0x248   : > { %v1027_v42 = vpop.f32.mrb[18].mxu1 }
 0x249   : > { %v11809_v1 = vadd.f32 %v1027_v42, %v723_v60  ;;  %v1029_v4 = vpop.f32.mrb[19].mxu1 }
 0x24a   : > { %v11811_v53 = vadd.f32 %v1029_v4, %v727_v0 }
 0x24e   : > { %v1033_v43 = vpop.f32.mrb[20].mxu1 }
 0x24f   : > { %v11813_v2 = vadd.f32 %v1033_v43, %v723_v60  ;;  %v1035_v6 = vpop.f32.mrb[21].mxu1 }
 0x250   : > { %v11815_v63 = vadd.f32 %v1035_v6, %v727_v0  ;;  %v1037_v8 = vpop.f32.mrb[22].mxu1 }
 0x251   : > { %13678 = vst [vmem:[#allocation77_spill] sm:$0xff] %v11813_v2  ;;  %v11817_v52 = vadd.f32 %v1037_v8, %v723_v60  ;;  %v1039_v61 = vpop.f32.mrb[23].mxu1 }
 0x252   : > { %13679 = vst [vmem:[#allocation78_spill] sm:$0xff] %v11815_v63  ;;  %v11819_v55 = vadd.f32 %v1039_v61, %v727_v0  ;;  %v10437_v61 = vpop.eup %10436 }
 0x253   : > { %13680 = vst [vmem:[#allocation79_spill] sm:$0xff] %v11817_v52  ;;  %v10439_v9 = vpop.eup %10438 }
 0x254   : > { %13681 = vst [vmem:[#allocation80_spill] sm:$0xff] %v11819_v55 }
 0x256   : > { %v1043_v42 = vpop.f32.mrb[24].mxu1 }
 0x257   : > { %v11821_v57 = vadd.f32 %v1043_v42, %v723_v60  ;;  %v1045_v4 = vpop.f32.mrb[25].mxu1 }
 0x258   : > { %v11823_v51 = vadd.f32 %v1045_v4, %v727_v0  ;;  %v1047_v43 = vpop.f32.mrb[26].mxu1 }
 0x259   : > { %13682 = vst [vmem:[#allocation81_spill] sm:$0xff] %v11821_v57  ;;  %v11825_v2 = vadd.f32 %v1047_v43, %v723_v60  ;;  %v1049_v6 = vpop.f32.mrb[27].mxu1  ;;  %v1411_v43 = vadd.f32 1.0, %v10439_v9 }
 0x25a   : > { %13683 = vst [vmem:[#allocation82_spill] sm:$0xff] %v11823_v51  ;;  %v11827_v63 = vadd.f32 %v1049_v6, %v727_v0  ;;  %v1417_v51 = vadd.f32 1.0, %v10437_v61  ;;  %v1026_v6 = vadd.f32 %v1025_v3, %v727_v0 }
 0x25b   : > { %13684 = vst [vmem:[#allocation83_spill] sm:$0xff] %v11825_v2  ;;  %v1024_v2 = vadd.f32 %v1023_v56, %v723_v60 }
 0x25c   : > { %13685 = vst [vmem:[#allocation84_spill] sm:$0xff] %v11827_v63  ;;  %10440 = vrcp.f32 %v1417_v51 }
 0x25d   : > { %10442 = vrcp.f32 %v1411_v43  ;;  %v13690_v43 = vmov 0  }
 0x25e   : > { %v1053_v8 = vpop.f32.mrb[28].mxu1 }
 0x25f   : > { %v11829_v52 = vadd.f32 %v1053_v8, %v723_v60  ;;  %v1055_v58 = vpop.f32.mrb[29].mxu1 }
 0x260   : > { %v11831_v7 = vadd.f32 %v1055_v58, %v727_v0  ;;  %v1057_v54 = vpop.f32.mrb[30].mxu1 }
 0x261   : > { %13686 = vst [vmem:[#allocation85_spill] sm:$0xff] %v11829_v52  ;;  %v11833_v42 = vadd.f32 %v1057_v54, %v723_v60  ;;  %v1059_v57 = vpop.f32.mrb[31].mxu1 }
 0x262   : > { %13687 = vst [vmem:[#allocation86_spill] sm:$0xff] %v11831_v7  ;;  %v11835_v4 = vadd.f32 %v1059_v57, %v727_v0  ;;  %v1117_v57 = vld [vmem:[%s607_s16] sm:$0xff]  ;;  %v11842_v0 = vld [vmem:[#allocation9] ss:$16 sps:$4 sm:$0xff]  }
 0x263   : > { %13688 = vst [vmem:[#allocation87_spill] sm:$0xff] %v11833_v42 }
 0x264   : > { %13689 = vst [vmem:[#allocation88_spill] sm:$0xff] %v11835_v4 }
 0x266   : > { %v1397_v63 = vpop.f32.mrb[32].mxu1  ;;  %v10441_v54 = vpop.eup %10440 }
 0x267   : > { %v1406_v8 = vadd.f32 %v1397_v63, %v1024_v2  ;;  %v1399_v52 = vpop.f32.mrb[33].mxu1  ;;  %v10443_v4 = vpop.eup %10442  ;;  %v1427_v42 = vmul.f32 %v10441_v54, %v1117_v57  ;;  %v10693_v2 = vld [vmem:[#allocation9 + $0x8] ss:$16 sps:$4 sm:$0xff]   ;;  %v11862_v54 = vld [vmem:[#allocation9 + $0x64] ss:$16 sps:$4 sm:$0xff]  }
 0x268   : > { %v1407_v55 = vadd.f32 %v1399_v52, %v1026_v6  ;;  %v1401_v58 = vpop.f32.mrb[34].mxu1  ;;  %v10695_v6 = vld [vmem:[#allocation9 + $0x28] ss:$16 sps:$4 sm:$0xff]  }
 0x269   : > { %10444 = vtanh.f32 %v1406_v8  ;;  %v1402_v7 = vpop.f32.mrb[35].mxu1  ;;  %v11859_v8 = vld [vmem:[#allocation9 + $0x40] ss:$16 sps:$4 sm:$0xff]   ;;  %v10696_v58 = vld [vmem:[#allocation9 + $0x4c] ss:$16 sps:$4 sm:$0xff]  }
 0x26a   : > { %v8799_v50 = vmul.f32 -1.442695, %v1407_v55  ;;  %v11846_v55 = vld [vmem:[#allocation9 + $0x24] ss:$16 sps:$4 sm:$0xff]   ;;  %v11851_v7 = vld [vmem:[#allocation9 + $0x20] ss:$16 sps:$4 sm:$0xff]  }
 0x26b   : > { %v10697_v57 = vld [vmem:[#allocation9 + $0x48] ss:$16 sps:$4 sm:$0xff]  }
 0x26c   : > { %10446 = vpow2.f32 %v8799_v50 }
 0x273   : > { %v10445_v61 = vpop.eup %10444 }
 0x274   : > { %v1428_v9 = vmul.f32 %v10445_v61, %v10443_v4  ;;  %v11854_v4 = vld [vmem:[#allocation9 + $0x44] ss:$16 sps:$4 sm:$0xff]   ;;  %v11865_v61 = vld [vmem:[#allocation9 + $0x60] ss:$16 sps:$4 sm:$0xff]  }
 0x276   : > { %v10447_v56 = vpop.eup %10446  ;;  %v11839_v3 = vadd.f32 %v1428_v9, %v1427_v42  ;;  %v10694_v42 = vld [vmem:[#allocation9 + $0x2c] ss:$16 sps:$4 sm:$0xff]  }
 0x277   : > { %v1424_v51 = vadd.f32 1.0, %v10447_v56  ;;  %v10698_v9 = vld [vmem:[#allocation9 + $0x6c] ss:$16 sps:$4 sm:$0xff]   ;;  %v11868_v56 = vld [vmem:[#allocation9 + $0x84] ss:$16 sps:$4 sm:$0xff]  }
 0x278   : > { %10448 = vtanh.f32 %v11839_v3 }
 0x279   : > { %10450 = vrcp.f32 %v1424_v51  ;;  %v10699_v51 = vld [vmem:[#allocation9 + $0x68] ss:$16 sps:$4 sm:$0xff]  }
 0x282   : > { %v10449_v52 = vpop.eup %10448 }
 0x283   : > { %v10451_v63 = vpop.eup %10450 }
 0x284   : > { %v1431_v60 = vmul.f32 %v10451_v63, %v10449_v52  ;;  %v11871_v52 = vld [vmem:[#allocation9 + $0x80] ss:$16 sps:$4 sm:$0xff]   ;;  %v10700_v63 = vld [vmem:[#allocation9 + $0x8c] ss:$16 sps:$4 sm:$0xff]  }
 0x286   : > { %v11844_v50 = vpack.c.bf16 %v1431_v60, %v1431_v60  ;;  %v11874_v60 = vld [vmem:[#allocation9 + $0xa4] ss:$16 sps:$4 sm:$0xff]  }
 0x287   : > { %13691 = vst [vmem:[#allocation89_spill] sm:$0xff] %v11874_v60 }
 0x288   : > { %1933 = vmatmul.mubr.bf16.vlgmr.msra.gmra.mrb[8].mxu0 %v11844_v50  ;;  %1974 = vmatmul.mubr.bf16.vlgmr.msra.gmra.mrb[40].mxu1 %v11844_v50 }
 0x289   : > { %2211 = vmatpush1.bf16.msra.mxu0 %v11842_v0  ;;  %2252 = vmatpush1.bf16.msra.mxu1 %v10693_v2  ;;  %v10701_v2 = vld [vmem:[#allocation9 + $0x88] ss:$16 sps:$4 sm:$0xff]  }
 0x28a   : > { %2212 = vmatprep.subr.bf16.mxu0 %v11846_v55  ;;  %2253 = vmatprep.subr.bf16.mxu1 %v10694_v42  ;;  %v11877_v42 = vld [vmem:[#allocation9 + $0xa0] ss:$16 sps:$4 sm:$0xff]  }
 0x28b   : > { %2242 = vmatprep.mubr.bf16.mxu0 %v13690_v43  ;;  %2283 = vmatprep.mubr.bf16.mxu1 %v13690_v43 }
 0x28d   : > { %2213 = vmatpush1.bf16.msra.mxu0 %v11851_v7  ;;  %2254 = vmatpush1.bf16.msra.mxu1 %v10695_v6  ;;  %v10702_v6 = vld [vmem:[#allocation9 + $0xac] ss:$16 sps:$4 sm:$0xff]  }
 0x28e   : > { %2214 = vmatprep.subr.bf16.mxu0 %v11854_v4  ;;  %2255 = vmatprep.subr.bf16.mxu1 %v10696_v58  ;;  %v11880_v58 = vld [vmem:[#allocation9 + $0xc4] ss:$16 sps:$4 sm:$0xff]  }
 0x291   : > { %2215 = vmatpush1.bf16.msra.mxu0 %v11859_v8  ;;  %2256 = vmatpush1.bf16.msra.mxu1 %v10697_v57  ;;  %v10703_v57 = vld [vmem:[#allocation9 + $0xa8] ss:$16 sps:$4 sm:$0xff]  }
 0x292   : > { %2216 = vmatprep.subr.bf16.mxu0 %v11862_v54  ;;  %2257 = vmatprep.subr.bf16.mxu1 %v10698_v9  ;;  %v11883_v9 = vld [vmem:[#allocation9 + $0xc0] ss:$16 sps:$4 sm:$0xff]  }
 0x295   : > { %2217 = vmatpush1.bf16.msra.mxu0 %v11865_v61  ;;  %2258 = vmatpush1.bf16.msra.mxu1 %v10699_v51  ;;  %v10704_v51 = vld [vmem:[#allocation9 + $0xcc] ss:$16 sps:$4 sm:$0xff]  }
 0x296   : > { %2218 = vmatprep.subr.bf16.mxu0 %v11868_v56  ;;  %2259 = vmatprep.subr.bf16.mxu1 %v10700_v63  ;;  %v11886_v63 = vld [vmem:[#allocation9 + $0xe4] ss:$16 sps:$4 sm:$0xff]  }
 0x299   : > { %2219 = vmatpush1.bf16.msra.mxu0 %v11871_v52  ;;  %2260 = vmatpush1.bf16.msra.mxu1 %v10701_v2  ;;  %v10705_v2 = vld [vmem:[#allocation9 + $0xc8] ss:$16 sps:$4 sm:$0xff]  }
 0x29a   : > { %2220 = vmatprep.subr.bf16.mxu0 %v11874_v60  ;;  %2261 = vmatprep.subr.bf16.mxu1 %v10702_v6  ;;  %v11889_v60 = vld [vmem:[#allocation9 + $0xe0] ss:$16 sps:$4 sm:$0xff]   ;;  %v10706_v6 = vld [vmem:[#allocation9 + $0xec] ss:$16 sps:$4 sm:$0xff]  }
 0x29d   : > { %2221 = vmatpush1.bf16.msra.mxu0 %v11877_v42  ;;  %2262 = vmatpush1.bf16.msra.mxu1 %v10703_v57  ;;  %v10707_v57 = vld [vmem:[#allocation9 + $0xe8] ss:$16 sps:$4 sm:$0xff]  }
 0x29e   : > { %2222 = vmatprep.subr.bf16.mxu0 %v11880_v58  ;;  %2263 = vmatprep.subr.bf16.mxu1 %v10704_v51 }
 0x2a1   : > { %2223 = vmatpush1.bf16.msra.mxu0 %v11883_v9  ;;  %2264 = vmatpush1.bf16.msra.mxu1 %v10705_v2 }
 0x2a2   : > { %2224 = vmatprep.subr.bf16.mxu0 %v11886_v63  ;;  %2265 = vmatprep.subr.bf16.mxu1 %v10706_v6 }
 0x2a5   : > { %2225 = vmatpush1.bf16.msra.mxu0 %v11889_v60  ;;  %2266 = vmatpush1.bf16.msra.mxu1 %v10707_v57 }
 0x2a6   : > { %2546 = vmatprep.subr.bf16.mxu0 %v11568_v10  ;;  %2587 = vmatprep.subr.bf16.mxu1 %v11572_v12  ;;  %v1692_v10 = vpop.f32.mrb[4].mxu0 }
 0x2a8   : > { %2243 = vmatmul.mubr.bf16.vlgmr.msra.gmra.mrb[12].mxu0 %v11844_v50  ;;  %2284 = vmatmul.mubr.bf16.vlgmr.msra.gmra.mrb[44].mxu1 %v11844_v50 }
 0x2a9   : > { %2547 = vmatpush1.bf16.msra.mxu0 %v11570_v11  ;;  %2588 = vmatpush1.bf16.msra.mxu1 %v11575_v13  ;;  %v1694_v11 = vpop.f32.mrb[5].mxu0  ;;  %v1733_v13 = vpop.f32.mrb[36].mxu1 }
 0x2aa   : > { %2548 = vmatprep.subr.bf16.mxu0 %v11580_v14  ;;  %2589 = vmatprep.subr.bf16.mxu1 %v11584_v16  ;;  %v1696_v12 = vpop.f32.mrb[6].mxu0 }
 0x2ab   : > { %2578 = vmatprep.mubr.bf16.mxu0 %v13690_v43  ;;  %2619 = vmatprep.mubr.bf16.mxu1 %v13690_v43  ;;  %v1697_v14 = vpop.f32.mrb[7].mxu0 }
 0x2ad   : > { %2549 = vmatpush1.bf16.msra.mxu0 %v11582_v15  ;;  %2590 = vmatpush1.bf16.msra.mxu1 %v11587_v17  ;;  %v1735_v15 = vpop.f32.mrb[37].mxu1 }
 0x2ae   : > { %2550 = vmatprep.subr.bf16.mxu0 %v11592_v18  ;;  %2591 = vmatprep.subr.bf16.mxu1 %v11596_v20  ;;  %v1737_v16 = vpop.f32.mrb[38].mxu1  ;;  %v1094_v18 = vld [vmem:[#allocation15] sm:$0xf] }
 0x2af   : > { %v1738_v17 = vpop.f32.mrb[39].mxu1 }
 0x2b1   : > { %2551 = vmatpush1.bf16.msra.mxu0 %v11594_v19  ;;  %2592 = vmatpush1.bf16.msra.mxu1 %v11599_v21  ;;  %v13692_v19 = vsub.s32 0, %v11767_v5 }
 0x2b2   : > { %2552 = vmatprep.subr.bf16.mxu0 %v11604_v22  ;;  %2593 = vmatprep.subr.bf16.mxu1 %v11608_v24 }
 0x2b3   : > { %v11933_v20 = vrot.slane %v1094_v18, %v13692_v19 }
 0x2b5   : > { %2553 = vmatpush1.bf16.msra.mxu0 %v11606_v23  ;;  %2594 = vmatpush1.bf16.msra.mxu1 %v11611_v25  ;;  %v13693_v23 = vsub.s32 1, %v11767_v5 }
 0x2b6   : > { %2554 = vmatprep.subr.bf16.mxu0 %v11616_v26  ;;  %2595 = vmatprep.subr.bf16.mxu1 %v11620_v28 }
 0x2b7   : > { %v11937_v24 = vrot.slane %v1094_v18, %v13693_v23 }
 0x2b9   : > { %2555 = vmatpush1.bf16.msra.mxu0 %v11618_v27  ;;  %2596 = vmatpush1.bf16.msra.mxu1 %v11623_v29 }
 0x2ba   : > { %2556 = vmatprep.subr.bf16.mxu0 %v11628_v30  ;;  %2597 = vmatprep.subr.bf16.mxu1 %v11632_v32 }
 0x2bd   : > { %2557 = vmatpush1.bf16.msra.mxu0 %v11630_v31  ;;  %2598 = vmatpush1.bf16.msra.mxu1 %v11635_v33 }
 0x2be   : > { %2558 = vmatprep.subr.bf16.mxu0 %v11640_v34  ;;  %2599 = vmatprep.subr.bf16.mxu1 %v11644_v36 }
 0x2c1   : > { %2559 = vmatpush1.bf16.msra.mxu0 %v11642_v35  ;;  %2600 = vmatpush1.bf16.msra.mxu1 %v11647_v37 }
 0x2c2   : > { %2560 = vmatprep.subr.bf16.mxu0 %v11652_v38  ;;  %2601 = vmatprep.subr.bf16.mxu1 %v11656_v40 }
 0x2c5   : > { %2561 = vmatpush1.bf16.msra.mxu0 %v11654_v39  ;;  %2602 = vmatpush1.bf16.msra.mxu1 %v11659_v41  ;;  %v13694_v39 = vsub.s32 3, %v11767_v5 }
 0x2c6   : > { %2788 = vmatprep.subr.bf16.mxu0 %v11666_v44  ;;  %2829 = vmatprep.subr.bf16.mxu1 %v11668_v45  ;;  %v13695_v44 = vsub.s32 2, %v11767_v5 }
 0x2c7   : > { %v11943_v40 = vrot.slane %v1094_v18, %v13694_v39 }
 0x2c8   : > { %v11948_v45 = vrot.slane %v1094_v18, %v13695_v44  ;;  %v13698_v44 = vld [vmem:[#allocation39_spill] sm:$0xff] }
 0x35b   : > { %v1934_v21 = vpop.f32.mrb[8].mxu0  ;;  %v1975_v22 = vpop.f32.mrb[40].mxu1 }
 0x35c   : > { %v1935_v25 = vadd.f32 %v1934_v21, %v1692_v10  ;;  %v1976_v26 = vadd.f32 %v1975_v22, %v1733_v13  ;;  %v1936_v27 = vpop.f32.mrb[9].mxu0  ;;  %v1977_v28 = vpop.f32.mrb[41].mxu1  ;;  %v8764_v13 = vld [vmem:[%s607_s16 + $0x8] sm:$0xff]  ;;  %s11127_s16 = smov [#allocation21]  }
 0x35d   : > { %v1937_v29 = vadd.f32 %v1936_v27, %v1694_v11  ;;  %v1978_v30 = vadd.f32 %v1977_v28, %v1735_v15  ;;  %v1938_v31 = vpop.f32.mrb[10].mxu0  ;;  %v1979_v32 = vpop.f32.mrb[42].mxu1 }
 0x35e   : > { %v1982_v33 = vadd.f32 %v1935_v25, %v11933_v20  ;;  %v1939_v34 = vpop.f32.mrb[11].mxu0  ;;  %v1980_v35 = vpop.f32.mrb[43].mxu1  ;;  %v1984_v51 = vadd.f32 %v1976_v26, %v11948_v45 }
 0x35f   : > { %v1983_v36 = vadd.f32 %v1937_v29, %v11937_v24  ;;  %v1985_v41 = vadd.f32 %v1978_v30, %v11943_v40 }
 0x360   : > { %v8864_v37 = vmul.f32 -1.442695, %v1982_v33 }
 0x361   : > { %v8865_v38 = vmul.f32 -1.442695, %v1983_v36  ;;  %v8866_v50 = vmul.f32 -1.442695, %v1985_v41  ;;  %v13697_v41 = vld [vmem:[#allocation38_spill] sm:$0xff] }
 0x362   : > { %10452 = vpow2.f32 %v8864_v37 }
 0x363   : > { %10454 = vpow2.f32 %v8865_v38 }
 0x364   : > { %10456 = vpow2.f32 %v8866_v50  ;;  %v13699_v50 = vld [vmem:[#allocation40_spill] sm:$0xff] }
 0x365   : > { %10458 = vtanh.f32 %v1984_v51  ;;  %v13700_v51 = vld [vmem:[#allocation41_spill] sm:$0xff] }
 0x36c   : > { %v10453_v2 = vpop.eup %10452 }
 0x36d   : > { %v10455_v6 = vpop.eup %10454  ;;  %v1989_v57 = vadd.f32 1.0, %v10453_v2 }
 0x36e   : > { %v1995_v10 = vadd.f32 1.0, %v10455_v6  ;;  %v10457_v11 = vpop.eup %10456 }
 0x36f   : > { %10460 = vrcp.f32 %v1989_v57  ;;  %v10459_v12 = vpop.eup %10458  ;;  %v2002_v16 = vadd.f32 1.0, %v10457_v11  ;;  %v13703_v11 = vld [vmem:[#allocation44_spill] sm:$0xff] }
 0x370   : > { %10462 = vrcp.f32 %v1995_v10 }
 0x371   : > { %10464 = vrcp.f32 %v2002_v16  ;;  %v13707_v16 = vld [vmem:[#allocation48_spill] sm:$0xff] }
 0x379   : > { %v10461_v14 = vpop.eup %10460 }
 0x37a   : > { %v10463_v15 = vpop.eup %10462  ;;  %v2006_v5 = vmul.f32 %v10461_v14, %v10459_v12  ;;  %v13704_v12 = vld [vmem:[#allocation45_spill] sm:$0xff] }
 0x37b   : > { %v2005_v17 = vmul.f32 %v10463_v15, %v8764_v13  ;;  %v2244_v18 = vpop.f32.mrb[12].mxu0  ;;  %v2285_v19 = vpop.f32.mrb[44].mxu1  ;;  %v13705_v15 = vld [vmem:[#allocation46_spill] sm:$0xff] }
 0x37c   : > { %v2292_v21 = vadd.f32 %v2244_v18, %v11775_v62  ;;  %v2294_v22 = vadd.f32 %v2285_v19, %v11809_v1  ;;  %v2246_v23 = vpop.f32.mrb[13].mxu0  ;;  %v2287_v25 = vpop.f32.mrb[45].mxu1  ;;  %v13709_v18 = vld [vmem:[#allocation50_spill] sm:$0xff]  ;;  %v13710_v19 = vld [vmem:[#allocation51_spill] sm:$0xff] }
 0x37d   : > { %v11955_v26 = vadd.f32 %v2006_v5, %v2005_v17  ;;  %v2293_v27 = vadd.f32 %v2246_v23, %v11777_v59  ;;  %v2295_v28 = vadd.f32 %v2287_v25, %v11811_v53  ;;  %v2248_v29 = vpop.f32.mrb[14].mxu0  ;;  %v2289_v30 = vpop.f32.mrb[46].mxu1  ;;  %v13706_v5 = vld [vmem:[#allocation47_spill] sm:$0xff]  ;;  %v13708_v17 = vld [vmem:[#allocation49_spill] sm:$0xff]  ;;  %v13714_v23 = vld [vmem:[#allocation54_spill] sm:$0xff] }
 0x37e   : > { %v8899_v31 = vmul.f32 -1.442695, %v2292_v21  ;;  %v2249_v32 = vpop.f32.mrb[15].mxu0  ;;  %v2290_v33 = vpop.f32.mrb[47].mxu1  ;;  %v13711_v21 = vld [vmem:[#allocation53_spill] sm:$0xff]  ;;  %v13715_v25 = vld [vmem:[#allocation56_spill] sm:$0xff] }
 0x37f   : > { %v8900_v34 = vmul.f32 -1.442695, %v2293_v27  ;;  %10466 = vtanh.f32 %v11955_v26  ;;  %v8901_v62 = vmul.f32 -1.442695, %v2295_v28  ;;  %v10465_v1 = vpop.eup %10464  ;;  %v13716_v27 = vld [vmem:[#allocation57_spill] sm:$0xff]  ;;  %v13717_v30 = vld [vmem:[#allocation58_spill] sm:$0xff] }
 0x380   : > { %10468 = vpow2.f32 %v8899_v31  ;;  %v13718_v31 = vld [vmem:[#allocation59_spill] sm:$0xff]  ;;  %v13719_v32 = vld [vmem:[#allocation60_spill] sm:$0xff]  ;;  %v13720_v33 = vld [vmem:[#allocation61_spill] sm:$0xff] }
 0x381   : > { %10470 = vpow2.f32 %v8900_v34 }
 0x382   : > { %10472 = vpow2.f32 %v8901_v62  ;;  %v11998_v62 = vld [vmem:[#allocation9 + $0xc] ss:$16 sps:$4 sm:$0xff]  }
 0x383   : > { %10474 = vtanh.f32 %v2294_v22  ;;  %v13713_v22 = vld [vmem:[#allocation52_spill] sm:$0xff] }
 0x389   : > { %v10467_v35 = vpop.eup %10466 }
 0x38a   : > { %v10469_v36 = vpop.eup %10468  ;;  %v11960_v37 = vmul.f32 %v10467_v35, %v10465_v1  ;;  %v13721_v1 = vld [vmem:[#allocation62_spill] sm:$0xff]  ;;  %v13722_v35 = vld [vmem:[#allocation63_spill] sm:$0xff] }
 0x38b   : > { %v10471_v59 = vpop.eup %10470  ;;  %v2299_v38 = vadd.f32 1.0, %v10469_v36  ;;  %v12002_v36 = vld [vmem:[#allocation9 + $0x8] ss:$16 sps:$4 sm:$0xff]  }
 0x38c   : > { %13696 = vst [vmem:[#allocation90_spill] sm:$0xff] %v11960_v37  ;;  %v2305_v53 = vadd.f32 1.0, %v10471_v59  ;;  %v2353_v39 = vpack.c.bf16 %v11960_v37, %v11960_v37  ;;  %v10473_v2 = vpop.eup %10472 }
 0x38d   : > { %10476 = vrcp.f32 %v2299_v38  ;;  %v2312_v10 = vadd.f32 1.0, %v10473_v2  ;;  %v13723_v38 = vld [vmem:[#allocation64_spill] sm:$0xff] }
 0x38e   : > { %10478 = vrcp.f32 %v2305_v53  ;;  %2579 = vmatmul.mubr.bf16.vlgmr.msra.gmra.mrb[16].mxu0 %v2353_v39  ;;  %2620 = vmatmul.mubr.bf16.vlgmr.msra.gmra.mrb[48].mxu1 %v2353_v39  ;;  %v12006_v53 = vld [vmem:[#allocation9 + $0x2c] ss:$16 sps:$4 sm:$0xff]   ;;  %v12010_v39 = vld [vmem:[#allocation9 + $0x28] ss:$16 sps:$4 sm:$0xff]  }
 0x38f   : > { %2789 = vmatpush1.bf16.msra.mxu0 %v11670_v46  ;;  %2830 = vmatpush1.bf16.msra.mxu1 %v11672_v47  ;;  %v10475_v46 = vpop.eup %10474  ;;  %v13701_v47 = vld [vmem:[#allocation42_spill] sm:$0xff]  ;;  %10480 = vrcp.f32 %v2312_v10 }
 0x390   : > { %2790 = vmatprep.subr.bf16.mxu0 %v11678_v48  ;;  %2831 = vmatprep.subr.bf16.mxu1 %v11680_v49  ;;  %v13702_v48 = vld [vmem:[#allocation43_spill] sm:$0xff]  ;;  %v12074_v2 = vld [vmem:[#allocation13 + $0x8] ss:$16 sps:$4 sm:$0xff]   ;;  %v12104_v10 = vld [vmem:[#allocation13 + $0x64] ss:$16 sps:$4 sm:$0xff]  }
 0x391   : > { %2820 = vmatprep.mubr.bf16.mxu0 %v13690_v43  ;;  %2861 = vmatprep.mubr.bf16.mxu1 %v13690_v43 }
 0x393   : > { %2791 = vmatpush1.bf16.msra.mxu0 %v13697_v41  ;;  %2832 = vmatpush1.bf16.msra.mxu1 %v13698_v44  ;;  %v12014_v41 = vld [vmem:[#allocation9 + $0x4c] ss:$16 sps:$4 sm:$0xff]   ;;  %v12020_v44 = vld [vmem:[#allocation9 + $0x48] ss:$16 sps:$4 sm:$0xff]  }
 0x394   : > { %2792 = vmatprep.subr.bf16.mxu0 %v13699_v50  ;;  %2833 = vmatprep.subr.bf16.mxu1 %v13700_v51  ;;  %v13724_v50 = vld [vmem:[#allocation89_spill] sm:$0xff]  ;;  %v12060_v51 = vld [vmem:[#allocation9 + $0xe8] ss:$16 sps:$4 sm:$0xff]  }
 0x397   : > { %v10477_v6 = vpop.eup %10476  ;;  %2793 = vmatpush1.bf16.msra.mxu0 %v13701_v47  ;;  %2834 = vmatpush1.bf16.msra.mxu1 %v13702_v48  ;;  %v12092_v47 = vld [vmem:[#allocation13 + $0x44] ss:$16 sps:$4 sm:$0xff]   ;;  %v12094_v48 = vld [vmem:[#allocation13 + $0x4c] ss:$16 sps:$4 sm:$0xff]  }
 0x398   : > { %v10479_v49 = vpop.eup %10478  ;;  %v2316_v57 = vmul.f32 %v10477_v6, %v10475_v46  ;;  %2794 = vmatprep.subr.bf16.mxu0 %v13703_v11  ;;  %2835 = vmatprep.subr.bf16.mxu1 %v13704_v12  ;;  %v12084_v46 = vld [vmem:[#allocation13 + $0x20] ss:$16 sps:$4 sm:$0xff]   ;;  %v12086_v6 = vld [vmem:[#allocation13 + $0x28] ss:$16 sps:$4 sm:$0xff]   ;;  %v12106_v11 = vld [vmem:[#allocation13 + $0x6c] ss:$16 sps:$4 sm:$0xff]  }
 0x399   : > { %v2315_v13 = vmul.f32 %v10479_v49, %v11839_v3  ;;  %v13712_v3 = vld [vmem:[#allocation55_spill] sm:$0xff]  ;;  %v10481_v28 = vpop.eup %10480 }
 0x39a   : > { %v12096_v49 = vld [vmem:[#allocation13 + $0x40] ss:$16 sps:$4 sm:$0xff]  }
 0x39b   : > { %v11979_v14 = vadd.f32 %v2316_v57, %v2315_v13  ;;  %2795 = vmatpush1.bf16.msra.mxu0 %v13705_v15  ;;  %2836 = vmatpush1.bf16.msra.mxu1 %v13706_v5  ;;  %v12098_v57 = vld [vmem:[#allocation13 + $0x48] ss:$16 sps:$4 sm:$0xff]   ;;  %v12108_v12 = vld [vmem:[#allocation13 + $0x60] ss:$16 sps:$4 sm:$0xff]   ;;  %v12116_v15 = vld [vmem:[#allocation13 + $0x84] ss:$16 sps:$4 sm:$0xff]  }
 0x39c   : > { %2796 = vmatprep.subr.bf16.mxu0 %v13707_v16  ;;  %2837 = vmatprep.subr.bf16.mxu1 %v13708_v17  ;;  %v12110_v13 = vld [vmem:[#allocation13 + $0x68] ss:$16 sps:$4 sm:$0xff]   ;;  %v12118_v5 = vld [vmem:[#allocation13 + $0x8c] ss:$16 sps:$4 sm:$0xff]   ;;  %v12120_v16 = vld [vmem:[#allocation13 + $0x80] ss:$16 sps:$4 sm:$0xff]  }
 0x39d   : > { %10482 = vtanh.f32 %v11979_v14  ;;  %v12122_v17 = vld [vmem:[#allocation13 + $0x88] ss:$16 sps:$4 sm:$0xff]  }
 0x39e   : > { %13725 = vst [vmem:[#allocation38_spill] sm:$0xff] %v12122_v17 }
 0x39f   : > { %2797 = vmatpush1.bf16.msra.mxu0 %v13709_v18  ;;  %2838 = vmatpush1.bf16.msra.mxu1 %v13710_v19  ;;  %v12128_v18 = vld [vmem:[#allocation13 + $0xa4] ss:$16 sps:$4 sm:$0xff]   ;;  %v12130_v19 = vld [vmem:[#allocation13 + $0xac] ss:$16 sps:$4 sm:$0xff]  }
 0x3a0   : > { %2798 = vmatprep.subr.bf16.mxu0 %v13711_v21  ;;  %2839 = vmatprep.subr.bf16.mxu1 %v13712_v3  ;;  %13726 = vst [vmem:[#allocation39_spill] sm:$0xff] %v12128_v18  ;;  %13727 = vst [vmem:[#allocation40_spill] sm:$0xff] %v12130_v19  ;;  %v12132_v21 = vld [vmem:[#allocation13 + $0xa0] ss:$16 sps:$4 sm:$0xff]   ;;  %v12134_v3 = vld [vmem:[#allocation13 + $0xa8] ss:$16 sps:$4 sm:$0xff]  }
 0x3a1   : > { %13728 = vst [vmem:[#allocation41_spill] sm:$0xff] %v12132_v21  ;;  %13729 = vst [vmem:[#allocation42_spill] sm:$0xff] %v12134_v3 }
 0x3a3   : > { %2799 = vmatpush1.bf16.msra.mxu0 %v13713_v22  ;;  %2840 = vmatpush1.bf16.msra.mxu1 %v13714_v23  ;;  %v12140_v22 = vld [vmem:[#allocation13 + $0xc4] ss:$16 sps:$4 sm:$0xff]   ;;  %v12142_v23 = vld [vmem:[#allocation13 + $0xcc] ss:$16 sps:$4 sm:$0xff]  }
 0x3a4   : > { %2800 = vmatprep.subr.bf16.mxu0 %v13715_v25  ;;  %2841 = vmatprep.subr.bf16.mxu1 %v13716_v27  ;;  %13730 = vst [vmem:[#allocation43_spill] sm:$0xff] %v12140_v22  ;;  %13731 = vst [vmem:[#allocation44_spill] sm:$0xff] %v12142_v23  ;;  %v12144_v25 = vld [vmem:[#allocation13 + $0xc0] ss:$16 sps:$4 sm:$0xff]   ;;  %v12146_v27 = vld [vmem:[#allocation13 + $0xc8] ss:$16 sps:$4 sm:$0xff]  }
 0x3a5   : > { %13732 = vst [vmem:[#allocation45_spill] sm:$0xff] %v12144_v25  ;;  %13733 = vst [vmem:[#allocation46_spill] sm:$0xff] %v12146_v27 }
 0x3a7   : > { %v10483_v29 = vpop.eup %10482  ;;  %2801 = vmatpush1.bf16.msra.mxu0 %v13717_v30  ;;  %2842 = vmatpush1.bf16.msra.mxu1 %v13718_v31  ;;  %v12156_v30 = vld [vmem:[#allocation13 + $0xe0] ss:$16 sps:$4 sm:$0xff]   ;;  %v12158_v31 = vld [vmem:[#allocation13 + $0xe8] ss:$16 sps:$4 sm:$0xff]  }
 0x3a8   : > { %2802 = vmatprep.subr.bf16.mxu0 %v13719_v32  ;;  %2843 = vmatprep.subr.bf16.mxu1 %v13720_v33  ;;  %v2319_v34 = vmul.f32 %v10483_v29, %v10481_v28  ;;  %v12152_v28 = vld [vmem:[#allocation13 + $0xe4] ss:$16 sps:$4 sm:$0xff]   ;;  %v12154_v29 = vld [vmem:[#allocation13 + $0xec] ss:$16 sps:$4 sm:$0xff]   ;;  %13736 = vst [vmem:[#allocation49_spill] sm:$0xff] %v12156_v30  ;;  %13737 = vst [vmem:[#allocation50_spill] sm:$0xff] %v12158_v31 }
 0x3a9   : > { %13734 = vst [vmem:[#allocation47_spill] sm:$0xff] %v12152_v28  ;;  %13735 = vst [vmem:[#allocation48_spill] sm:$0xff] %v12154_v29  ;;  %v12164_v32 = vld [vmem:[#allocation12 + $0x4] ss:$16 sps:$4 sm:$0xff]   ;;  %v12166_v33 = vld [vmem:[#allocation12 + $0xc] ss:$16 sps:$4 sm:$0xff]  }
 0x3aa   : > { %v2320_v59 = vpack.c.bf16 %v2319_v34, %v2319_v34  ;;  %13738 = vst [vmem:[#allocation51_spill] sm:$0xff] %v12164_v32  ;;  %13739 = vst [vmem:[#allocation53_spill] sm:$0xff] %v12166_v33 }
 0x3ab   : > { %2803 = vmatpush1.bf16.msra.mxu0 %v13721_v1  ;;  %2844 = vmatpush1.bf16.msra.mxu1 %v13722_v35 }
 0x3ac   : > { %3099 = vmatprep.subr.bf16.mxu0 %v13723_v38  ;;  %3140 = vmatprep.subr.bf16.mxu1 %v11998_v62 }
 0x3ae   : > { %2821 = vmatmul.mubr.bf16.vlgmr.msra.gmra.mrb[20].mxu0 %v2320_v59  ;;  %2862 = vmatmul.mubr.bf16.vlgmr.msra.gmra.mrb[52].mxu1 %v2320_v59 }
 0x3af   : > { %3100 = vmatpush1.bf16.msra.mxu0 %v11842_v0  ;;  %3141 = vmatpush1.bf16.msra.mxu1 %v12002_v36  ;;  %v12024_v0 = vld [vmem:[#allocation9 + $0x6c] ss:$16 sps:$4 sm:$0xff]  }
 0x3b0   : > { %3101 = vmatprep.subr.bf16.mxu0 %v11846_v55  ;;  %3142 = vmatprep.subr.bf16.mxu1 %v12006_v53  ;;  %v12028_v55 = vld [vmem:[#allocation9 + $0x68] ss:$16 sps:$4 sm:$0xff]  }
 0x3b1   : > { %3131 = vmatprep.mubr.bf16.mxu0 %v13690_v43  ;;  %3172 = vmatprep.mubr.bf16.mxu1 %v13690_v43 }
 0x3b3   : > { %3102 = vmatpush1.bf16.msra.mxu0 %v11851_v7  ;;  %3143 = vmatpush1.bf16.msra.mxu1 %v12010_v39  ;;  %v12032_v7 = vld [vmem:[#allocation9 + $0x8c] ss:$16 sps:$4 sm:$0xff]  }
 0x3b4   : > { %3103 = vmatprep.subr.bf16.mxu0 %v11854_v4  ;;  %3144 = vmatprep.subr.bf16.mxu1 %v12014_v41  ;;  %v12036_v4 = vld [vmem:[#allocation9 + $0x88] ss:$16 sps:$4 sm:$0xff]  }
 0x3b7   : > { %3104 = vmatpush1.bf16.msra.mxu0 %v11859_v8  ;;  %3145 = vmatpush1.bf16.msra.mxu1 %v12020_v44  ;;  %v12040_v8 = vld [vmem:[#allocation9 + $0xac] ss:$16 sps:$4 sm:$0xff]  }
 0x3b8   : > { %3105 = vmatprep.subr.bf16.mxu0 %v11862_v54  ;;  %3146 = vmatprep.subr.bf16.mxu1 %v12024_v0  ;;  %v12044_v54 = vld [vmem:[#allocation9 + $0xa8] ss:$16 sps:$4 sm:$0xff]  }
 0x3bb   : > { %3106 = vmatpush1.bf16.msra.mxu0 %v11865_v61  ;;  %3147 = vmatpush1.bf16.msra.mxu1 %v12028_v55  ;;  %v12048_v61 = vld [vmem:[#allocation9 + $0xcc] ss:$16 sps:$4 sm:$0xff]  }
 0x3bc   : > { %3107 = vmatprep.subr.bf16.mxu0 %v11868_v56  ;;  %3148 = vmatprep.subr.bf16.mxu1 %v12032_v7  ;;  %v12052_v56 = vld [vmem:[#allocation9 + $0xc8] ss:$16 sps:$4 sm:$0xff]  }
 0x3bf   : > { %3108 = vmatpush1.bf16.msra.mxu0 %v11871_v52  ;;  %3149 = vmatpush1.bf16.msra.mxu1 %v12036_v4  ;;  %v12056_v52 = vld [vmem:[#allocation9 + $0xec] ss:$16 sps:$4 sm:$0xff]  }
 0x3c0   : > { %3109 = vmatprep.subr.bf16.mxu0 %v13724_v50  ;;  %3150 = vmatprep.subr.bf16.mxu1 %v12040_v8 }
 0x3c3   : > { %3110 = vmatpush1.bf16.msra.mxu0 %v11877_v42  ;;  %3151 = vmatpush1.bf16.msra.mxu1 %v12044_v54  ;;  %v12068_v42 = vld [vmem:[#allocation13 + $0x4] ss:$16 sps:$4 sm:$0xff]  }
 0x3c4   : > { %3111 = vmatprep.subr.bf16.mxu0 %v11880_v58  ;;  %3152 = vmatprep.subr.bf16.mxu1 %v12048_v61  ;;  %v12070_v58 = vld [vmem:[#allocation13 + $0xc] ss:$16 sps:$4 sm:$0xff]  }
 0x3c7   : > { %3112 = vmatpush1.bf16.msra.mxu0 %v11883_v9  ;;  %3153 = vmatpush1.bf16.msra.mxu1 %v12052_v56  ;;  %v12072_v9 = vld [vmem:[#allocation13] ss:$16 sps:$4 sm:$0xff]  }
 0x3c8   : > { %3113 = vmatprep.subr.bf16.mxu0 %v11886_v63  ;;  %3154 = vmatprep.subr.bf16.mxu1 %v12056_v52  ;;  %v12082_v63 = vld [vmem:[#allocation13 + $0x2c] ss:$16 sps:$4 sm:$0xff]  }
 0x3cb   : > { %3114 = vmatpush1.bf16.msra.mxu0 %v11889_v60  ;;  %3155 = vmatpush1.bf16.msra.mxu1 %v12060_v51  ;;  %v12080_v60 = vld [vmem:[#allocation13 + $0x24] ss:$16 sps:$4 sm:$0xff]  }
 0x3cc   : > { %3435 = vmatprep.subr.bf16.mxu0 %v12068_v42  ;;  %3476 = vmatprep.subr.bf16.mxu1 %v12070_v58 }
 0x3ce   : > { %3132 = vmatmul.mubr.bf16.vlgmr.msra.gmra.mrb[24].mxu0 %v2320_v59  ;;  %3173 = vmatmul.mubr.bf16.vlgmr.msra.gmra.mrb[56].mxu1 %v2320_v59 }
 0x3cf   : > { %3467 = vmatprep.mubr.bf16.mxu0 %v13690_v43  ;;  %3508 = vmatprep.mubr.bf16.mxu1 %v13690_v43 }
 0x3d0   : > { %3436 = vmatpush1.bf16.msra.mxu0 %v12072_v9  ;;  %3477 = vmatpush1.bf16.msra.mxu1 %v12074_v2 }
 0x3d1   : > { %3437 = vmatprep.subr.bf16.mxu0 %v12080_v60  ;;  %3478 = vmatprep.subr.bf16.mxu1 %v12082_v63 }
 0x3d4   : > { %3438 = vmatpush1.bf16.msra.mxu0 %v12084_v46  ;;  %3479 = vmatpush1.bf16.msra.mxu1 %v12086_v6 }
 0x3d5   : > { %3439 = vmatprep.subr.bf16.mxu0 %v12092_v47  ;;  %3480 = vmatprep.subr.bf16.mxu1 %v12094_v48 }
 0x3d8   : > { %3440 = vmatpush1.bf16.msra.mxu0 %v12096_v49  ;;  %3481 = vmatpush1.bf16.msra.mxu1 %v12098_v57 }
 0x3d9   : > { %3441 = vmatprep.subr.bf16.mxu0 %v12104_v10  ;;  %3482 = vmatprep.subr.bf16.mxu1 %v12106_v11 }
 0x3dc   : > { %3442 = vmatpush1.bf16.msra.mxu0 %v12108_v12  ;;  %3483 = vmatpush1.bf16.msra.mxu1 %v12110_v13 }
 0x3dd   : > { %3443 = vmatprep.subr.bf16.mxu0 %v12116_v15  ;;  %3484 = vmatprep.subr.bf16.mxu1 %v12118_v5 }
 0x3e0   : > { %3444 = vmatpush1.bf16.msra.mxu0 %v12120_v16  ;;  %3485 = vmatpush1.bf16.msra.mxu1 %v12122_v17 }
 0x3e1   : > { %3445 = vmatprep.subr.bf16.mxu0 %v12128_v18  ;;  %3486 = vmatprep.subr.bf16.mxu1 %v12130_v19 }
 0x3e4   : > { %3446 = vmatpush1.bf16.msra.mxu0 %v12132_v21  ;;  %3487 = vmatpush1.bf16.msra.mxu1 %v12134_v3 }
 0x3e5   : > { %3447 = vmatprep.subr.bf16.mxu0 %v12140_v22  ;;  %3488 = vmatprep.subr.bf16.mxu1 %v12142_v23 }
 0x3e8   : > { %3448 = vmatpush1.bf16.msra.mxu0 %v12144_v25  ;;  %3489 = vmatpush1.bf16.msra.mxu1 %v12146_v27 }
 0x3e9   : > { %3449 = vmatprep.subr.bf16.mxu0 %v12152_v28  ;;  %3490 = vmatprep.subr.bf16.mxu1 %v12154_v29 }
 0x3ec   : > { %3450 = vmatpush1.bf16.msra.mxu0 %v12156_v30  ;;  %3491 = vmatpush1.bf16.msra.mxu1 %v12158_v31 }
 0x3ed   : > { %3677 = vmatprep.subr.bf16.mxu0 %v12164_v32  ;;  %3718 = vmatprep.subr.bf16.mxu1 %v12166_v33 }
 0x461   : > { %v2580_v34 = vpop.f32.mrb[16].mxu0  ;;  %v2621_v1 = vpop.f32.mrb[48].mxu1 }
 0x462   : > { %v2582_v35 = vpop.f32.mrb[17].mxu0  ;;  %v2623_v59 = vpop.f32.mrb[49].mxu1 }
 0x463   : > { %v2584_v38 = vpop.f32.mrb[18].mxu0  ;;  %v2625_v50 = vpop.f32.mrb[50].mxu1 }
 0x464   : > { %v2585_v37 = vpop.f32.mrb[19].mxu0  ;;  %v2626_v29 = vpop.f32.mrb[51].mxu1 }
 0x481   : > { %v2822_v28 = vpop.f32.mrb[20].mxu0  ;;  %v2863_v30 = vpop.f32.mrb[52].mxu1 }
 0x482   : > { %v2823_v27 = vadd.f32 %v2822_v28, %v2580_v34  ;;  %v2864_v31 = vadd.f32 %v2863_v30, %v2621_v1  ;;  %v2824_v25 = vpop.f32.mrb[21].mxu0  ;;  %v2865_v23 = vpop.f32.mrb[53].mxu1  ;;  %v13740_v1 = vld [vmem:[#allocation65_spill] sm:$0xff] }
 0x483   : > { %v2825_v22 = vadd.f32 %v2824_v25, %v2582_v35  ;;  %v2866_v3 = vadd.f32 %v2865_v23, %v2623_v59  ;;  %v2826_v21 = vpop.f32.mrb[22].mxu0  ;;  %v2867_v32 = vpop.f32.mrb[54].mxu1  ;;  %v13741_v35 = vld [vmem:[#allocation77_spill] sm:$0xff] }
 0x484   : > { %v2870_v33 = vadd.f32 %v2823_v27, %v11933_v20  ;;  %v2827_v19 = vpop.f32.mrb[23].mxu0  ;;  %v2868_v18 = vpop.f32.mrb[55].mxu1  ;;  %v2872_v29 = vadd.f32 %v2864_v31, %v11948_v45 }
 0x485   : > { %v2871_v17 = vadd.f32 %v2825_v22, %v11937_v24  ;;  %v2873_v37 = vadd.f32 %v2866_v3, %v11943_v40 }
 0x486   : > { %v8966_v38 = vmul.f32 -1.442695, %v2870_v33 }
 0x487   : > { %v8967_v50 = vmul.f32 -1.442695, %v2871_v17  ;;  %v8968_v28 = vmul.f32 -1.442695, %v2873_v37 }
 0x488   : > { %10484 = vpow2.f32 %v8966_v38 }
 0x489   : > { %10486 = vpow2.f32 %v8967_v50 }
 0x48a   : > { %10488 = vpow2.f32 %v8968_v28  ;;  %v13742_v28 = vld [vmem:[#allocation66_spill] sm:$0xff] }
 0x48b   : > { %10490 = vtanh.f32 %v2872_v29 }
 0x492   : > { %v10485_v30 = vpop.eup %10484 }
 0x493   : > { %v10487_v25 = vpop.eup %10486  ;;  %v2877_v23 = vadd.f32 1.0, %v10485_v30  ;;  %v13743_v30 = vld [vmem:[#allocation78_spill] sm:$0xff] }
 0x494   : > { %v2883_v21 = vadd.f32 1.0, %v10487_v25  ;;  %v10489_v18 = vpop.eup %10488 }
 0x495   : > { %10492 = vrcp.f32 %v2877_v23  ;;  %v10491_v19 = vpop.eup %10490  ;;  %v2890_v32 = vadd.f32 1.0, %v10489_v18 }
 0x496   : > { %10494 = vrcp.f32 %v2883_v21 }
 0x497   : > { %10496 = vrcp.f32 %v2890_v32  ;;  %v12186_v32 = vld [vmem:[#allocation12 + $0x8] ss:$16 sps:$4 sm:$0xff]  }
 0x49f   : > { %v10493_v22 = vpop.eup %10492 }
 0x4a0   : > { %v10495_v27 = vpop.eup %10494  ;;  %v2894_v17 = vmul.f32 %v10493_v22, %v10491_v19 }
 0x4a1   : > { %v2893_v33 = vmul.f32 %v10495_v27, %v11955_v26  ;;  %v3133_v3 = vpop.f32.mrb[24].mxu0  ;;  %v3174_v34 = vpop.f32.mrb[56].mxu1 }
 0x4a2   : > { %v3181_v31 = vadd.f32 %v3133_v3, %v13740_v1  ;;  %v3183_v59 = vadd.f32 %v3174_v34, %v13741_v35  ;;  %v3135_v38 = vpop.f32.mrb[25].mxu0  ;;  %v3176_v50 = vpop.f32.mrb[57].mxu1 }
 0x4a3   : > { %v12177_v37 = vadd.f32 %v2894_v17, %v2893_v33  ;;  %v3182_v29 = vadd.f32 %v3135_v38, %v13742_v28  ;;  %v3184_v25 = vadd.f32 %v3176_v50, %v13743_v30  ;;  %v3137_v23 = vpop.f32.mrb[26].mxu0  ;;  %v3178_v21 = vpop.f32.mrb[58].mxu1  ;;  %v12184_v38 = vld [vmem:[#allocation12] ss:$16 sps:$4 sm:$0xff]   ;;  %v12190_v28 = vld [vmem:[#allocation12 + $0x24] ss:$16 sps:$4 sm:$0xff]  }
 0x4a4   : > { %v9001_v18 = vmul.f32 -1.442695, %v3181_v31  ;;  %v3138_v19 = vpop.f32.mrb[27].mxu0  ;;  %v3179_v26 = vpop.f32.mrb[59].mxu1  ;;  %v12196_v30 = vld [vmem:[#allocation12 + $0x20] ss:$16 sps:$4 sm:$0xff]  }
 0x4a5   : > { %v9002_v22 = vmul.f32 -1.442695, %v3182_v29  ;;  %10498 = vtanh.f32 %v12177_v37  ;;  %v9003_v27 = vmul.f32 -1.442695, %v3184_v25  ;;  %v10497_v3 = vpop.eup %10496  ;;  %v12192_v29 = vld [vmem:[#allocation12 + $0x2c] ss:$16 sps:$4 sm:$0xff]  }
 0x4a6   : > { %10500 = vpow2.f32 %v9001_v18  ;;  %v12198_v25 = vld [vmem:[#allocation12 + $0x28] ss:$16 sps:$4 sm:$0xff]   ;;  %v12204_v23 = vld [vmem:[#allocation12 + $0x4c] ss:$16 sps:$4 sm:$0xff]   ;;  %v12210_v21 = vld [vmem:[#allocation12 + $0x40] ss:$16 sps:$4 sm:$0xff]  }
 0x4a7   : > { %10502 = vpow2.f32 %v9002_v22  ;;  %13745 = vst [vmem:[#allocation52_spill] sm:$0xff] %v12204_v23  ;;  %13746 = vst [vmem:[#allocation54_spill] sm:$0xff] %v12210_v21  ;;  %v12212_v18 = vld [vmem:[#allocation12 + $0x48] ss:$16 sps:$4 sm:$0xff]   ;;  %v12216_v19 = vld [vmem:[#allocation12 + $0x64] ss:$16 sps:$4 sm:$0xff]  }
 0x4a8   : > { %10504 = vpow2.f32 %v9003_v27  ;;  %13747 = vst [vmem:[#allocation56_spill] sm:$0xff] %v12212_v18  ;;  %v12218_v26 = vld [vmem:[#allocation12 + $0x6c] ss:$16 sps:$4 sm:$0xff]  }
 0x4a9   : > { %10506 = vtanh.f32 %v3183_v59  ;;  %v12202_v59 = vld [vmem:[#allocation12 + $0x44] ss:$16 sps:$4 sm:$0xff]  }
 0x4af   : > { %v10499_v34 = vpop.eup %10498 }
 0x4b0   : > { %v10501_v17 = vpop.eup %10500  ;;  %v12182_v33 = vmul.f32 %v10499_v34, %v10497_v3  ;;  %v12222_v34 = vld [vmem:[#allocation12 + $0x60] ss:$16 sps:$4 sm:$0xff]  }
 0x4b1   : > { %v10503_v1 = vpop.eup %10502  ;;  %v3188_v35 = vadd.f32 1.0, %v10501_v17  ;;  %v12224_v17 = vld [vmem:[#allocation12 + $0x68] ss:$16 sps:$4 sm:$0xff]  }
 0x4b2   : > { %13744 = vst [vmem:[#allocation55_spill] sm:$0xff] %v12182_v33  ;;  %v3194_v31 = vadd.f32 1.0, %v10503_v1  ;;  %v3242_v50 = vpack.c.bf16 %v12182_v33, %v12182_v33  ;;  %v10505_v22 = vpop.eup %10504  ;;  %13748 = vst [vmem:[#allocation57_spill] sm:$0xff] %v12224_v17  ;;  %v12230_v33 = vld [vmem:[#allocation12 + $0x8c] ss:$16 sps:$4 sm:$0xff]  }
 0x4b3   : > { %10508 = vrcp.f32 %v3188_v35  ;;  %v10507_v27 = vpop.eup %10506  ;;  %13750 = vst [vmem:[#allocation59_spill] sm:$0xff] %v12230_v33 }
 0x4b4   : > { %10510 = vrcp.f32 %v3194_v31  ;;  %3468 = vmatmul.mubr.bf16.vlgmr.msra.gmra.mrb[28].mxu0 %v3242_v50  ;;  %3509 = vmatmul.mubr.bf16.vlgmr.msra.gmra.mrb[60].mxu1 %v3242_v50  ;;  %v3201_v31 = vadd.f32 1.0, %v10505_v22  ;;  %v12228_v50 = vld [vmem:[#allocation12 + $0x84] ss:$16 sps:$4 sm:$0xff]  }
 0x4b5   : > { %3678 = vmatpush1.bf16.msra.mxu0 %v12184_v38  ;;  %3719 = vmatpush1.bf16.msra.mxu1 %v12186_v32  ;;  %13749 = vst [vmem:[#allocation58_spill] sm:$0xff] %v12228_v50  ;;  %v12243_v22 = vld [vmem:[#allocation12 + $0xa4] ss:$16 sps:$4 sm:$0xff]  }
 0x4b6   : > { %3679 = vmatprep.subr.bf16.mxu0 %v12190_v28  ;;  %3720 = vmatprep.subr.bf16.mxu1 %v12192_v29  ;;  %10512 = vrcp.f32 %v3201_v31  ;;  %13753 = vst [vmem:[#allocation62_spill] sm:$0xff] %v12243_v22  ;;  %v12262_v31 = vld [vmem:[#allocation12 + $0xc0] ss:$16 sps:$4 sm:$0xff]  }
 0x4b7   : > { %3709 = vmatprep.mubr.bf16.mxu0 %v13690_v43  ;;  %3750 = vmatprep.mubr.bf16.mxu1 %v13690_v43 }
 0x4b9   : > { %3680 = vmatpush1.bf16.msra.mxu0 %v12196_v30  ;;  %3721 = vmatpush1.bf16.msra.mxu1 %v12198_v25 }
 0x4ba   : > { %3681 = vmatprep.subr.bf16.mxu0 %v12202_v59  ;;  %3722 = vmatprep.subr.bf16.mxu1 %v12204_v23 }
 0x4bd   : > { %v10509_v3 = vpop.eup %10508  ;;  %3682 = vmatpush1.bf16.msra.mxu0 %v12210_v21  ;;  %3723 = vmatpush1.bf16.msra.mxu1 %v12212_v18  ;;  %v12237_v18 = vld [vmem:[#allocation12 + $0x80] ss:$16 sps:$4 sm:$0xff]  }
 0x4be   : > { %v10511_v1 = vpop.eup %10510  ;;  %v3205_v35 = vmul.f32 %v10509_v3, %v10507_v27  ;;  %3683 = vmatprep.subr.bf16.mxu0 %v12216_v19  ;;  %3724 = vmatprep.subr.bf16.mxu1 %v12218_v26  ;;  %13751 = vst [vmem:[#allocation60_spill] sm:$0xff] %v12237_v18  ;;  %v12239_v27 = vld [vmem:[#allocation12 + $0x88] ss:$16 sps:$4 sm:$0xff]   ;;  %v12245_v3 = vld [vmem:[#allocation12 + $0xac] ss:$16 sps:$4 sm:$0xff]  }
 0x4bf   : > { %v3204_v23 = vmul.f32 %v10511_v1, %v11979_v14  ;;  %13752 = vst [vmem:[#allocation61_spill] sm:$0xff] %v12239_v27  ;;  %13754 = vst [vmem:[#allocation63_spill] sm:$0xff] %v12245_v3  ;;  %v12250_v14 = vld [vmem:[#allocation12 + $0xa0] ss:$16 sps:$4 sm:$0xff]   ;;  %v12256_v1 = vld [vmem:[#allocation12 + $0xc4] ss:$16 sps:$4 sm:$0xff]  }
 0x4c0   : > { %13755 = vst [vmem:[#allocation64_spill] sm:$0xff] %v12250_v14  ;;  %13757 = vst [vmem:[#allocation65_spill] sm:$0xff] %v12256_v1 }
 0x4c1   : > { %v12233_v21 = vadd.f32 %v3205_v35, %v3204_v23  ;;  %3684 = vmatpush1.bf16.msra.mxu0 %v12222_v34  ;;  %3725 = vmatpush1.bf16.msra.mxu1 %v12224_v17  ;;  %v12252_v23 = vld [vmem:[#allocation12 + $0xa8] ss:$16 sps:$4 sm:$0xff]   ;;  %v12258_v35 = vld [vmem:[#allocation12 + $0xcc] ss:$16 sps:$4 sm:$0xff]  }
 0x4c2   : > { %3685 = vmatprep.subr.bf16.mxu0 %v12228_v50  ;;  %3726 = vmatprep.subr.bf16.mxu1 %v12230_v33  ;;  %13756 = vst [vmem:[#allocation89_spill] sm:$0xff] %v12252_v23  ;;  %13758 = vst [vmem:[#allocation77_spill] sm:$0xff] %v12258_v35  ;;  %v12284_v17 = vld [vmem:[#allocation9] ss:$16 sps:$4 sm:$0xff]  }
 0x4c3   : > { %10514 = vtanh.f32 %v12233_v21 }
 0x4c5   : > { %3686 = vmatpush1.bf16.msra.mxu0 %v12237_v18  ;;  %3727 = vmatpush1.bf16.msra.mxu1 %v12239_v27  ;;  %v12264_v18 = vld [vmem:[#allocation12 + $0xc8] ss:$16 sps:$4 sm:$0xff]   ;;  %v12268_v27 = vld [vmem:[#allocation12 + $0xe4] ss:$16 sps:$4 sm:$0xff]  }
 0x4c6   : > { %3687 = vmatprep.subr.bf16.mxu0 %v12243_v22  ;;  %3728 = vmatprep.subr.bf16.mxu1 %v12245_v3  ;;  %13759 = vst [vmem:[#allocation66_spill] sm:$0xff] %v12264_v18  ;;  %v12270_v22 = vld [vmem:[#allocation12 + $0xec] ss:$16 sps:$4 sm:$0xff]   ;;  %v10513_v3 = vpop.eup %10512 }
 0x4c9   : > { %3688 = vmatpush1.bf16.msra.mxu0 %v12250_v14  ;;  %3729 = vmatpush1.bf16.msra.mxu1 %v12252_v23  ;;  %v12274_v14 = vld [vmem:[#allocation12 + $0xe0] ss:$16 sps:$4 sm:$0xff]   ;;  %v12276_v23 = vld [vmem:[#allocation12 + $0xe8] ss:$16 sps:$4 sm:$0xff]  }
 0x4ca   : > { %3689 = vmatprep.subr.bf16.mxu0 %v12256_v1  ;;  %3730 = vmatprep.subr.bf16.mxu1 %v12258_v35  ;;  %v12280_v35 = vld [vmem:[#allocation9 + $0x4] ss:$16 sps:$4 sm:$0xff]  }
 0x4cd   : > { %v10515_v33 = vpop.eup %10514  ;;  %3690 = vmatpush1.bf16.msra.mxu0 %v12262_v31  ;;  %3731 = vmatpush1.bf16.msra.mxu1 %v12264_v18  ;;  %v12288_v18 = vld [vmem:[#allocation9 + $0x24] ss:$16 sps:$4 sm:$0xff]  }
 0x4ce   : > { %3691 = vmatprep.subr.bf16.mxu0 %v12268_v27  ;;  %3732 = vmatprep.subr.bf16.mxu1 %v12270_v22  ;;  %v3208_v1 = vmul.f32 %v10515_v33, %v10513_v3  ;;  %v12292_v33 = vld [vmem:[#allocation9 + $0x20] ss:$16 sps:$4 sm:$0xff]   ;;  %v12296_v3 = vld [vmem:[#allocation9 + $0x44] ss:$16 sps:$4 sm:$0xff]  }
 0x4d0   : > { %v3209_v50 = vpack.c.bf16 %v3208_v1, %v3208_v1  ;;  %v12314_v1 = vld [vmem:[#allocation9 + $0x84] ss:$16 sps:$4 sm:$0xff]  }
 0x4d1   : > { %3692 = vmatpush1.bf16.msra.mxu0 %v12274_v14  ;;  %3733 = vmatpush1.bf16.msra.mxu1 %v12276_v23 }
 0x4d2   : > { %3988 = vmatprep.subr.bf16.mxu0 %v12280_v35  ;;  %4029 = vmatprep.subr.bf16.mxu1 %v11998_v62  ;;  %v12302_v62 = vld [vmem:[#allocation9 + $0x40] ss:$16 sps:$4 sm:$0xff]  }
 0x4d4   : > { %3710 = vmatmul.mubr.bf16.vlgmr.msra.gmra.mrb[32].mxu0 %v3209_v50  ;;  %3751 = vmatmul.mubr.bf16.vlgmr.msra.gmra.mrb[64].mxu1 %v3209_v50 }
 0x4d5   : > { %3989 = vmatpush1.bf16.msra.mxu0 %v12284_v17  ;;  %4030 = vmatpush1.bf16.msra.mxu1 %v12002_v36  ;;  %v12306_v36 = vld [vmem:[#allocation9 + $0x64] ss:$16 sps:$4 sm:$0xff]  }
 0x4d6   : > { %3990 = vmatprep.subr.bf16.mxu0 %v12288_v18  ;;  %4031 = vmatprep.subr.bf16.mxu1 %v12006_v53  ;;  %v12310_v53 = vld [vmem:[#allocation9 + $0x60] ss:$16 sps:$4 sm:$0xff]  }
 0x4d7   : > { %4020 = vmatprep.mubr.bf16.mxu0 %v13690_v43  ;;  %4061 = vmatprep.mubr.bf16.mxu1 %v13690_v43 }
 0x4d9   : > { %3991 = vmatpush1.bf16.msra.mxu0 %v12292_v33  ;;  %4032 = vmatpush1.bf16.msra.mxu1 %v12010_v39  ;;  %v12318_v39 = vld [vmem:[#allocation9 + $0x80] ss:$16 sps:$4 sm:$0xff]  }
 0x4da   : > { %3992 = vmatprep.subr.bf16.mxu0 %v12296_v3  ;;  %4033 = vmatprep.subr.bf16.mxu1 %v12014_v41  ;;  %v12322_v41 = vld [vmem:[#allocation9 + $0xa4] ss:$16 sps:$4 sm:$0xff]  }
 0x4dd   : > { %3993 = vmatpush1.bf16.msra.mxu0 %v12302_v62  ;;  %4034 = vmatpush1.bf16.msra.mxu1 %v12020_v44  ;;  %v12326_v44 = vld [vmem:[#allocation9 + $0xa0] ss:$16 sps:$4 sm:$0xff]  }
 0x4de   : > { %3994 = vmatprep.subr.bf16.mxu0 %v12306_v36  ;;  %4035 = vmatprep.subr.bf16.mxu1 %v12024_v0  ;;  %v12330_v0 = vld [vmem:[#allocation9 + $0xc4] ss:$16 sps:$4 sm:$0xff]  }
 0x4e1   : > { %3995 = vmatpush1.bf16.msra.mxu0 %v12310_v53  ;;  %4036 = vmatpush1.bf16.msra.mxu1 %v12028_v55  ;;  %v12334_v55 = vld [vmem:[#allocation9 + $0xc0] ss:$16 sps:$4 sm:$0xff]  }
 0x4e2   : > { %3996 = vmatprep.subr.bf16.mxu0 %v12314_v1  ;;  %4037 = vmatprep.subr.bf16.mxu1 %v12032_v7  ;;  %v12338_v7 = vld [vmem:[#allocation9 + $0xe4] ss:$16 sps:$4 sm:$0xff]  }
 0x4e5   : > { %3997 = vmatpush1.bf16.msra.mxu0 %v12318_v39  ;;  %4038 = vmatpush1.bf16.msra.mxu1 %v12036_v4  ;;  %v12342_v4 = vld [vmem:[#allocation9 + $0xe0] ss:$16 sps:$4 sm:$0xff]  }
 0x4e6   : > { %3998 = vmatprep.subr.bf16.mxu0 %v12322_v41  ;;  %4039 = vmatprep.subr.bf16.mxu1 %v12040_v8  ;;  %v13760_v8 = vld [vmem:[#allocation38_spill] sm:$0xff] }
 0x4e9   : > { %3999 = vmatpush1.bf16.msra.mxu0 %v12326_v44  ;;  %4040 = vmatpush1.bf16.msra.mxu1 %v12044_v54  ;;  %v13761_v54 = vld [vmem:[#allocation39_spill] sm:$0xff] }
 0x4ea   : > { %4000 = vmatprep.subr.bf16.mxu0 %v12330_v0  ;;  %4041 = vmatprep.subr.bf16.mxu1 %v12048_v61  ;;  %v13762_v61 = vld [vmem:[#allocation40_spill] sm:$0xff] }
 0x4ed   : > { %4001 = vmatpush1.bf16.msra.mxu0 %v12334_v55  ;;  %4042 = vmatpush1.bf16.msra.mxu1 %v12052_v56  ;;  %v13763_v56 = vld [vmem:[#allocation41_spill] sm:$0xff] }
 0x4ee   : > { %4002 = vmatprep.subr.bf16.mxu0 %v12338_v7  ;;  %4043 = vmatprep.subr.bf16.mxu1 %v12056_v52  ;;  %v13764_v52 = vld [vmem:[#allocation42_spill] sm:$0xff] }
 0x4f1   : > { %4003 = vmatpush1.bf16.msra.mxu0 %v12342_v4  ;;  %4044 = vmatpush1.bf16.msra.mxu1 %v12060_v51  ;;  %v13765_v51 = vld [vmem:[#allocation43_spill] sm:$0xff] }
 0x4f2   : > { %4324 = vmatprep.subr.bf16.mxu0 %v12068_v42  ;;  %4365 = vmatprep.subr.bf16.mxu1 %v12070_v58  ;;  %v13766_v42 = vld [vmem:[#allocation44_spill] sm:$0xff]  ;;  %v13767_v58 = vld [vmem:[#allocation45_spill] sm:$0xff] }
 0x4f4   : > { %4021 = vmatmul.mubr.bf16.vlgmr.msra.gmra.mrb[36].mxu0 %v3209_v50  ;;  %4062 = vmatmul.mubr.bf16.vlgmr.msra.gmra.mrb[68].mxu1 %v3209_v50 }
 0x4f5   : > { %4325 = vmatpush1.bf16.msra.mxu0 %v12072_v9  ;;  %4366 = vmatpush1.bf16.msra.mxu1 %v12074_v2  ;;  %v13768_v9 = vld [vmem:[#allocation46_spill] sm:$0xff]  ;;  %v13769_v2 = vld [vmem:[#allocation47_spill] sm:$0xff] }
 0x4f6   : > { %4326 = vmatprep.subr.bf16.mxu0 %v12080_v60  ;;  %4367 = vmatprep.subr.bf16.mxu1 %v12082_v63  ;;  %v13770_v60 = vld [vmem:[#allocation48_spill] sm:$0xff]  ;;  %v13771_v63 = vld [vmem:[#allocation49_spill] sm:$0xff] }
 0x4f7   : > { %4356 = vmatprep.mubr.bf16.mxu0 %v13690_v43  ;;  %4397 = vmatprep.mubr.bf16.mxu1 %v13690_v43 }
 0x4f9   : > { %4327 = vmatpush1.bf16.msra.mxu0 %v12084_v46  ;;  %4368 = vmatpush1.bf16.msra.mxu1 %v12086_v6  ;;  %v13772_v46 = vld [vmem:[#allocation50_spill] sm:$0xff]  ;;  %v13773_v6 = vld [vmem:[#allocation51_spill] sm:$0xff] }
 0x4fa   : > { %4328 = vmatprep.subr.bf16.mxu0 %v12092_v47  ;;  %4369 = vmatprep.subr.bf16.mxu1 %v12094_v48  ;;  %v13774_v47 = vld [vmem:[#allocation53_spill] sm:$0xff] }
 0x4fd   : > { %4329 = vmatpush1.bf16.msra.mxu0 %v12096_v49  ;;  %4370 = vmatpush1.bf16.msra.mxu1 %v12098_v57 }
 0x4fe   : > { %4330 = vmatprep.subr.bf16.mxu0 %v12104_v10  ;;  %4371 = vmatprep.subr.bf16.mxu1 %v12106_v11 }
 0x501   : > { %4331 = vmatpush1.bf16.msra.mxu0 %v12108_v12  ;;  %4372 = vmatpush1.bf16.msra.mxu1 %v12110_v13 }
 0x502   : > { %4332 = vmatprep.subr.bf16.mxu0 %v12116_v15  ;;  %4373 = vmatprep.subr.bf16.mxu1 %v12118_v5 }
 0x505   : > { %4333 = vmatpush1.bf16.msra.mxu0 %v12120_v16  ;;  %4374 = vmatpush1.bf16.msra.mxu1 %v13760_v8 }
 0x506   : > { %4334 = vmatprep.subr.bf16.mxu0 %v13761_v54  ;;  %4375 = vmatprep.subr.bf16.mxu1 %v13762_v61 }
 0x509   : > { %4335 = vmatpush1.bf16.msra.mxu0 %v13763_v56  ;;  %4376 = vmatpush1.bf16.msra.mxu1 %v13764_v52 }
 0x50a   : > { %4336 = vmatprep.subr.bf16.mxu0 %v13765_v51  ;;  %4377 = vmatprep.subr.bf16.mxu1 %v13766_v42 }
 0x50d   : > { %4337 = vmatpush1.bf16.msra.mxu0 %v13767_v58  ;;  %4378 = vmatpush1.bf16.msra.mxu1 %v13768_v9 }
 0x50e   : > { %4338 = vmatprep.subr.bf16.mxu0 %v13769_v2  ;;  %4379 = vmatprep.subr.bf16.mxu1 %v13770_v60 }
 0x511   : > { %4339 = vmatpush1.bf16.msra.mxu0 %v13771_v63  ;;  %4380 = vmatpush1.bf16.msra.mxu1 %v13772_v46 }
 0x512   : > { %4566 = vmatprep.subr.bf16.mxu0 %v13773_v6  ;;  %4607 = vmatprep.subr.bf16.mxu1 %v13774_v47 }
 0x587   : > { %v3469_v48 = vpop.f32.mrb[28].mxu0  ;;  %v3510_v49 = vpop.f32.mrb[60].mxu1 }
 0x588   : > { %v3471_v57 = vpop.f32.mrb[29].mxu0  ;;  %v3512_v10 = vpop.f32.mrb[61].mxu1 }
 0x589   : > { %v3473_v11 = vpop.f32.mrb[30].mxu0  ;;  %v3514_v12 = vpop.f32.mrb[62].mxu1 }
 0x58a   : > { %v3474_v13 = vpop.f32.mrb[31].mxu0  ;;  %v3515_v15 = vpop.f32.mrb[63].mxu1 }
 0x5a7   : > { %v3711_v5 = vpop.f32.mrb[32].mxu0  ;;  %v3752_v16 = vpop.f32.mrb[64].mxu1 }
 0x5a8   : > { %v3712_v50 = vadd.f32 %v3711_v5, %v3469_v48  ;;  %v3753_v8 = vadd.f32 %v3752_v16, %v3510_v49  ;;  %v3713_v54 = vpop.f32.mrb[33].mxu0  ;;  %v3754_v61 = vpop.f32.mrb[65].mxu1 }
 0x5a9   : > { %v3714_v56 = vadd.f32 %v3713_v54, %v3471_v57  ;;  %v3755_v52 = vadd.f32 %v3754_v61, %v3512_v10  ;;  %v3715_v51 = vpop.f32.mrb[34].mxu0  ;;  %v3756_v42 = vpop.f32.mrb[66].mxu1 }
 0x5aa   : > { %v3759_v58 = vadd.f32 %v3712_v50, %v11933_v20  ;;  %v3716_v9 = vpop.f32.mrb[35].mxu0  ;;  %v3757_v2 = vpop.f32.mrb[67].mxu1  ;;  %v3761_v48 = vadd.f32 %v3753_v8, %v11948_v45  ;;  %v13776_v51 = vld [vmem:[#allocation79_spill] sm:$0xff] }
 0x5ab   : > { %v3760_v60 = vadd.f32 %v3714_v56, %v11937_v24  ;;  %v3762_v6 = vadd.f32 %v3755_v52, %v11943_v40  ;;  %v13775_v52 = vld [vmem:[#allocation67_spill] sm:$0xff] }
 0x5ac   : > { %v9068_v63 = vmul.f32 -1.442695, %v3759_v58 }
 0x5ad   : > { %v9069_v46 = vmul.f32 -1.442695, %v3760_v60  ;;  %v9070_v47 = vmul.f32 -1.442695, %v3762_v6  ;;  %v13777_v60 = vld [vmem:[#allocation68_spill] sm:$0xff] }
 0x5ae   : > { %10516 = vpow2.f32 %v9068_v63 }
 0x5af   : > { %10518 = vpow2.f32 %v9069_v46  ;;  %v13778_v46 = vld [vmem:[#allocation80_spill] sm:$0xff] }
 0x5b0   : > { %10520 = vpow2.f32 %v9070_v47 }
 0x5b1   : > { %10522 = vtanh.f32 %v3761_v48 }
 0x5b8   : > { %v10517_v49 = vpop.eup %10516 }
 0x5b9   : > { %v10519_v57 = vpop.eup %10518  ;;  %v3766_v10 = vadd.f32 1.0, %v10517_v49 }
 0x5ba   : > { %v3772_v11 = vadd.f32 1.0, %v10519_v57  ;;  %v10521_v12 = vpop.eup %10520 }
 0x5bb   : > { %10524 = vrcp.f32 %v3766_v10  ;;  %v10523_v13 = vpop.eup %10522  ;;  %v3779_v50 = vadd.f32 1.0, %v10521_v12 }
 0x5bc   : > { %10526 = vrcp.f32 %v3772_v11 }
 0x5bd   : > { %10528 = vrcp.f32 %v3779_v50 }
 0x5c5   : > { %v10525_v15 = vpop.eup %10524 }
 0x5c6   : > { %v10527_v5 = vpop.eup %10526  ;;  %v3783_v16 = vmul.f32 %v10525_v15, %v10523_v13 }
 0x5c7   : > { %v3782_v54 = vmul.f32 %v10527_v5, %v12177_v37  ;;  %v4022_v61 = vpop.f32.mrb[36].mxu0  ;;  %v4063_v56 = vpop.f32.mrb[68].mxu1 }
 0x5c8   : > { %v4070_v8 = vadd.f32 %v4022_v61, %v13775_v52  ;;  %v4072_v42 = vadd.f32 %v4063_v56, %v13776_v51  ;;  %v4024_v58 = vpop.f32.mrb[37].mxu0  ;;  %v4065_v9 = vpop.f32.mrb[69].mxu1  ;;  %v13780_v56 = vld [vmem:[#allocation52_spill] sm:$0xff] }
 0x5c9   : > { %v12391_v2 = vadd.f32 %v3783_v16, %v3782_v54  ;;  %v4071_v63 = vadd.f32 %v4024_v58, %v13777_v60  ;;  %v4073_v6 = vadd.f32 %v4065_v9, %v13778_v46  ;;  %v4026_v47 = vpop.f32.mrb[38].mxu0  ;;  %v4067_v48 = vpop.f32.mrb[70].mxu1  ;;  %v13784_v58 = vld [vmem:[#allocation58_spill] sm:$0xff]  ;;  %v13785_v9 = vld [vmem:[#allocation59_spill] sm:$0xff]  ;;  %v13786_v60 = vld [vmem:[#allocation60_spill] sm:$0xff] }
 0x5ca   : > { %v9103_v49 = vmul.f32 -1.442695, %v4070_v8  ;;  %v4027_v57 = vpop.f32.mrb[39].mxu0  ;;  %v4068_v37 = vpop.f32.mrb[71].mxu1  ;;  %v13792_v46 = vld [vmem:[#allocation65_spill] sm:$0xff] }
 0x5cb   : > { %v9104_v10 = vmul.f32 -1.442695, %v4071_v63  ;;  %10530 = vtanh.f32 %v12391_v2  ;;  %v9105_v11 = vmul.f32 -1.442695, %v4073_v6  ;;  %v10529_v12 = vpop.eup %10528  ;;  %v13790_v63 = vld [vmem:[#allocation64_spill] sm:$0xff]  ;;  %v13793_v6 = vld [vmem:[#allocation77_spill] sm:$0xff] }
 0x5cc   : > { %10532 = vpow2.f32 %v9103_v49  ;;  %v13794_v49 = vld [vmem:[#allocation66_spill] sm:$0xff] }
 0x5cd   : > { %10534 = vpow2.f32 %v9104_v10  ;;  %v12434_v37 = vld [vmem:[#allocation9 + $0xc] ss:$16 sps:$4 sm:$0xff]  }
 0x5ce   : > { %10536 = vpow2.f32 %v9105_v11  ;;  %v12438_v11 = vld [vmem:[#allocation9 + $0x8] ss:$16 sps:$4 sm:$0xff]  }
 0x5cf   : > { %10538 = vtanh.f32 %v4072_v42 }
 0x5d5   : > { %v10531_v13 = vpop.eup %10530 }
 0x5d6   : > { %v10533_v15 = vpop.eup %10532  ;;  %v12396_v5 = vmul.f32 %v10531_v13, %v10529_v12  ;;  %v12522_v12 = vld [vmem:[#allocation13 + $0x28] ss:$16 sps:$4 sm:$0xff]   ;;  %v12528_v13 = vld [vmem:[#allocation13 + $0x44] ss:$16 sps:$4 sm:$0xff]  }
 0x5d7   : > { %v10535_v16 = vpop.eup %10534  ;;  %v4077_v54 = vadd.f32 1.0, %v10533_v15  ;;  %v12530_v15 = vld [vmem:[#allocation13 + $0x4c] ss:$16 sps:$4 sm:$0xff]  }
 0x5d8   : > { %13779 = vst [vmem:[#allocation78_spill] sm:$0xff] %v12396_v5  ;;  %v4083_v61 = vadd.f32 1.0, %v10535_v16  ;;  %v4131_v50 = vpack.c.bf16 %v12396_v5, %v12396_v5  ;;  %v10537_v52 = vpop.eup %10536  ;;  %v12532_v16 = vld [vmem:[#allocation13 + $0x40] ss:$16 sps:$4 sm:$0xff]  }
 0x5d9   : > { %10540 = vrcp.f32 %v4077_v54  ;;  %v4090_v42 = vadd.f32 1.0, %v10537_v52  ;;  %v12534_v54 = vld [vmem:[#allocation13 + $0x48] ss:$16 sps:$4 sm:$0xff]  }
 0x5da   : > { %10542 = vrcp.f32 %v4083_v61  ;;  %4357 = vmatmul.mubr.bf16.vlgmr.msra.gmra.mrb[40].mxu0 %v4131_v50  ;;  %4398 = vmatmul.mubr.bf16.vlgmr.msra.gmra.mrb[72].mxu1 %v4131_v50  ;;  %v12540_v61 = vld [vmem:[#allocation13 + $0x64] ss:$16 sps:$4 sm:$0xff]   ;;  %v12542_v50 = vld [vmem:[#allocation13 + $0x6c] ss:$16 sps:$4 sm:$0xff]   ;;  %v12546_v52 = vld [vmem:[#allocation13 + $0x68] ss:$16 sps:$4 sm:$0xff]  }
 0x5db   : > { %4567 = vmatpush1.bf16.msra.mxu0 %v12184_v38  ;;  %4608 = vmatpush1.bf16.msra.mxu1 %v12186_v32  ;;  %v10539_v38 = vpop.eup %10538  ;;  %v13781_v32 = vld [vmem:[#allocation54_spill] sm:$0xff]  ;;  %10544 = vrcp.f32 %v4090_v42  ;;  %v12568_v42 = vld [vmem:[#allocation13 + $0xa0] ss:$16 sps:$4 sm:$0xff]  }
 0x5dc   : > { %4568 = vmatprep.subr.bf16.mxu0 %v12190_v28  ;;  %4609 = vmatprep.subr.bf16.mxu1 %v12192_v29  ;;  %v13782_v28 = vld [vmem:[#allocation56_spill] sm:$0xff]  ;;  %13798 = vst [vmem:[#allocation41_spill] sm:$0xff] %v12568_v42 }
 0x5dd   : > { %4598 = vmatprep.mubr.bf16.mxu0 %v13690_v43  ;;  %4639 = vmatprep.mubr.bf16.mxu1 %v13690_v43 }
 0x5df   : > { %4569 = vmatpush1.bf16.msra.mxu0 %v12196_v30  ;;  %4610 = vmatpush1.bf16.msra.mxu1 %v12198_v25 }
 0x5e0   : > { %4570 = vmatprep.subr.bf16.mxu0 %v12202_v59  ;;  %4611 = vmatprep.subr.bf16.mxu1 %v13780_v56  ;;  %v13783_v59 = vld [vmem:[#allocation57_spill] sm:$0xff] }
 0x5e1   : > { %v12544_v56 = vld [vmem:[#allocation13 + $0x60] ss:$16 sps:$4 sm:$0xff]  }
 0x5e3   : > { %v10541_v8 = vpop.eup %10540  ;;  %4571 = vmatpush1.bf16.msra.mxu0 %v13781_v32  ;;  %4612 = vmatpush1.bf16.msra.mxu1 %v13782_v28  ;;  %v12556_v32 = vld [vmem:[#allocation13 + $0x80] ss:$16 sps:$4 sm:$0xff]   ;;  %v12558_v28 = vld [vmem:[#allocation13 + $0x88] ss:$16 sps:$4 sm:$0xff]  }
 0x5e4   : > { %v10543_v29 = vpop.eup %10542  ;;  %v4094_v51 = vmul.f32 %v10541_v8, %v10539_v38  ;;  %4572 = vmatprep.subr.bf16.mxu0 %v12216_v19  ;;  %4613 = vmatprep.subr.bf16.mxu1 %v12218_v26  ;;  %v13787_v19 = vld [vmem:[#allocation61_spill] sm:$0xff]  ;;  %v13788_v26 = vld [vmem:[#allocation62_spill] sm:$0xff]  ;;  %13795 = vst [vmem:[#allocation38_spill] sm:$0xff] %v12558_v28 }
 0x5e5   : > { %v4093_v30 = vmul.f32 %v10543_v29, %v12233_v21  ;;  %v13789_v21 = vld [vmem:[#allocation63_spill] sm:$0xff]  ;;  %v10545_v47 = vpop.eup %10544  ;;  %v12552_v38 = vld [vmem:[#allocation13 + $0x84] ss:$16 sps:$4 sm:$0xff]  }
 0x5e6   : > { %v12554_v8 = vld [vmem:[#allocation13 + $0x8c] ss:$16 sps:$4 sm:$0xff]   ;;  %v12564_v29 = vld [vmem:[#allocation13 + $0xa4] ss:$16 sps:$4 sm:$0xff]  }
 0x5e7   : > { %v12415_v25 = vadd.f32 %v4094_v51, %v4093_v30  ;;  %4573 = vmatpush1.bf16.msra.mxu0 %v12222_v34  ;;  %4614 = vmatpush1.bf16.msra.mxu1 %v13783_v59  ;;  %v13791_v34 = vld [vmem:[#allocation89_spill] sm:$0xff]  ;;  %13796 = vst [vmem:[#allocation39_spill] sm:$0xff] %v12564_v29  ;;  %v12570_v30 = vld [vmem:[#allocation13 + $0xa8] ss:$16 sps:$4 sm:$0xff]   ;;  %v12576_v59 = vld [vmem:[#allocation13 + $0xc4] ss:$16 sps:$4 sm:$0xff]  }
 0x5e8   : > { %4574 = vmatprep.subr.bf16.mxu0 %v13784_v58  ;;  %4615 = vmatprep.subr.bf16.mxu1 %v13785_v9  ;;  %v12566_v51 = vld [vmem:[#allocation13 + $0xac] ss:$16 sps:$4 sm:$0xff]   ;;  %13799 = vst [vmem:[#allocation42_spill] sm:$0xff] %v12570_v30  ;;  %13800 = vst [vmem:[#allocation43_spill] sm:$0xff] %v12576_v59  ;;  %v12580_v9 = vld [vmem:[#allocation13 + $0xc0] ss:$16 sps:$4 sm:$0xff]  }
 0x5e9   : > { %10546 = vtanh.f32 %v12415_v25  ;;  %13797 = vst [vmem:[#allocation40_spill] sm:$0xff] %v12566_v51  ;;  %v12578_v58 = vld [vmem:[#allocation13 + $0xcc] ss:$16 sps:$4 sm:$0xff]   ;;  %13802 = vst [vmem:[#allocation45_spill] sm:$0xff] %v12580_v9 }
 0x5ea   : > { %13801 = vst [vmem:[#allocation44_spill] sm:$0xff] %v12578_v58 }
 0x5eb   : > { %4575 = vmatpush1.bf16.msra.mxu0 %v13786_v60  ;;  %4616 = vmatpush1.bf16.msra.mxu1 %v13787_v19  ;;  %v12582_v60 = vld [vmem:[#allocation13 + $0xc8] ss:$16 sps:$4 sm:$0xff]   ;;  %v12588_v19 = vld [vmem:[#allocation13 + $0xe4] ss:$16 sps:$4 sm:$0xff]  }
 0x5ec   : > { %4576 = vmatprep.subr.bf16.mxu0 %v13788_v26  ;;  %4617 = vmatprep.subr.bf16.mxu1 %v13789_v21  ;;  %13803 = vst [vmem:[#allocation46_spill] sm:$0xff] %v12582_v60  ;;  %13804 = vst [vmem:[#allocation47_spill] sm:$0xff] %v12588_v19  ;;  %v12590_v26 = vld [vmem:[#allocation13 + $0xec] ss:$16 sps:$4 sm:$0xff]   ;;  %v12592_v21 = vld [vmem:[#allocation13 + $0xe0] ss:$16 sps:$4 sm:$0xff]  }
 0x5ed   : > { %13805 = vst [vmem:[#allocation48_spill] sm:$0xff] %v12590_v26  ;;  %13806 = vst [vmem:[#allocation49_spill] sm:$0xff] %v12592_v21 }
 0x5ef   : > { %4577 = vmatpush1.bf16.msra.mxu0 %v13790_v63  ;;  %4618 = vmatpush1.bf16.msra.mxu1 %v13791_v34  ;;  %v12594_v63 = vld [vmem:[#allocation13 + $0xe8] ss:$16 sps:$4 sm:$0xff]   ;;  %v12600_v34 = vld [vmem:[#allocation12 + $0x4] ss:$16 sps:$4 sm:$0xff]  }
 0x5f0   : > { %4578 = vmatprep.subr.bf16.mxu0 %v13792_v46  ;;  %4619 = vmatprep.subr.bf16.mxu1 %v13793_v6  ;;  %13807 = vst [vmem:[#allocation50_spill] sm:$0xff] %v12594_v63  ;;  %13808 = vst [vmem:[#allocation51_spill] sm:$0xff] %v12600_v34  ;;  %v12602_v46 = vld [vmem:[#allocation12 + $0xc] ss:$16 sps:$4 sm:$0xff]  }
 0x5f1   : > { %13809 = vst [vmem:[#allocation53_spill] sm:$0xff] %v12602_v46 }
 0x5f3   : > { %v10547_v48 = vpop.eup %10546  ;;  %4579 = vmatpush1.bf16.msra.mxu0 %v12262_v31  ;;  %4620 = vmatpush1.bf16.msra.mxu1 %v13794_v49  ;;  %v12442_v31 = vld [vmem:[#allocation9 + $0x2c] ss:$16 sps:$4 sm:$0xff]  }
 0x5f4   : > { %4580 = vmatprep.subr.bf16.mxu0 %v12268_v27  ;;  %4621 = vmatprep.subr.bf16.mxu1 %v12270_v22  ;;  %v4097_v57 = vmul.f32 %v10547_v48, %v10545_v47  ;;  %v12446_v27 = vld [vmem:[#allocation9 + $0x28] ss:$16 sps:$4 sm:$0xff]   ;;  %v12450_v22 = vld [vmem:[#allocation9 + $0x4c] ss:$16 sps:$4 sm:$0xff]  }
 0x5f6   : > { %v4098_v10 = vpack.c.bf16 %v4097_v57, %v4097_v57 }
 0x5f7   : > { %4581 = vmatpush1.bf16.msra.mxu0 %v12274_v14  ;;  %4622 = vmatpush1.bf16.msra.mxu1 %v12276_v23  ;;  %v12456_v14 = vld [vmem:[#allocation9 + $0x48] ss:$16 sps:$4 sm:$0xff]   ;;  %v12468_v23 = vld [vmem:[#allocation9 + $0x8c] ss:$16 sps:$4 sm:$0xff]  }
 0x5f8   : > { %4877 = vmatprep.subr.bf16.mxu0 %v12280_v35  ;;  %4918 = vmatprep.subr.bf16.mxu1 %v12434_v37  ;;  %v12472_v35 = vld [vmem:[#allocation9 + $0x88] ss:$16 sps:$4 sm:$0xff]  }
 0x5fa   : > { %4599 = vmatmul.mubr.bf16.vlgmr.msra.gmra.mrb[44].mxu0 %v4098_v10  ;;  %4640 = vmatmul.mubr.bf16.vlgmr.msra.gmra.mrb[76].mxu1 %v4098_v10 }
 0x5fb   : > { %4878 = vmatpush1.bf16.msra.mxu0 %v12284_v17  ;;  %4919 = vmatpush1.bf16.msra.mxu1 %v12438_v11  ;;  %v12460_v17 = vld [vmem:[#allocation9 + $0x6c] ss:$16 sps:$4 sm:$0xff]  }
 0x5fc   : > { %4879 = vmatprep.subr.bf16.mxu0 %v12288_v18  ;;  %4920 = vmatprep.subr.bf16.mxu1 %v12442_v31  ;;  %v12464_v18 = vld [vmem:[#allocation9 + $0x68] ss:$16 sps:$4 sm:$0xff]  }
 0x5fd   : > { %4909 = vmatprep.mubr.bf16.mxu0 %v13690_v43  ;;  %4950 = vmatprep.mubr.bf16.mxu1 %v13690_v43 }
 0x5ff   : > { %4880 = vmatpush1.bf16.msra.mxu0 %v12292_v33  ;;  %4921 = vmatpush1.bf16.msra.mxu1 %v12446_v27  ;;  %v12476_v33 = vld [vmem:[#allocation9 + $0xac] ss:$16 sps:$4 sm:$0xff]  }
 0x600   : > { %4881 = vmatprep.subr.bf16.mxu0 %v12296_v3  ;;  %4922 = vmatprep.subr.bf16.mxu1 %v12450_v22  ;;  %v12480_v3 = vld [vmem:[#allocation9 + $0xa8] ss:$16 sps:$4 sm:$0xff]  }
 0x603   : > { %4882 = vmatpush1.bf16.msra.mxu0 %v12302_v62  ;;  %4923 = vmatpush1.bf16.msra.mxu1 %v12456_v14  ;;  %v12484_v62 = vld [vmem:[#allocation9 + $0xcc] ss:$16 sps:$4 sm:$0xff]  }
 0x604   : > { %4883 = vmatprep.subr.bf16.mxu0 %v12306_v36  ;;  %4924 = vmatprep.subr.bf16.mxu1 %v12460_v17  ;;  %v12488_v36 = vld [vmem:[#allocation9 + $0xc8] ss:$16 sps:$4 sm:$0xff]  }
 0x607   : > { %4884 = vmatpush1.bf16.msra.mxu0 %v12310_v53  ;;  %4925 = vmatpush1.bf16.msra.mxu1 %v12464_v18  ;;  %v12492_v53 = vld [vmem:[#allocation9 + $0xec] ss:$16 sps:$4 sm:$0xff]  }
 0x608   : > { %4885 = vmatprep.subr.bf16.mxu0 %v12314_v1  ;;  %4926 = vmatprep.subr.bf16.mxu1 %v12468_v23  ;;  %v12496_v1 = vld [vmem:[#allocation9 + $0xe8] ss:$16 sps:$4 sm:$0xff]  }
 0x60b   : > { %4886 = vmatpush1.bf16.msra.mxu0 %v12318_v39  ;;  %4927 = vmatpush1.bf16.msra.mxu1 %v12472_v35  ;;  %v12504_v39 = vld [vmem:[#allocation13 + $0x4] ss:$16 sps:$4 sm:$0xff]  }
 0x60c   : > { %4887 = vmatprep.subr.bf16.mxu0 %v12322_v41  ;;  %4928 = vmatprep.subr.bf16.mxu1 %v12476_v33  ;;  %v12506_v41 = vld [vmem:[#allocation13 + $0xc] ss:$16 sps:$4 sm:$0xff]  }
 0x60f   : > { %4888 = vmatpush1.bf16.msra.mxu0 %v12326_v44  ;;  %4929 = vmatpush1.bf16.msra.mxu1 %v12480_v3  ;;  %v12508_v44 = vld [vmem:[#allocation13] ss:$16 sps:$4 sm:$0xff]  }
 0x610   : > { %4889 = vmatprep.subr.bf16.mxu0 %v12330_v0  ;;  %4930 = vmatprep.subr.bf16.mxu1 %v12484_v62  ;;  %v12510_v0 = vld [vmem:[#allocation13 + $0x8] ss:$16 sps:$4 sm:$0xff]  }
 0x613   : > { %4890 = vmatpush1.bf16.msra.mxu0 %v12334_v55  ;;  %4931 = vmatpush1.bf16.msra.mxu1 %v12488_v36  ;;  %v12516_v55 = vld [vmem:[#allocation13 + $0x24] ss:$16 sps:$4 sm:$0xff]  }
 0x614   : > { %4891 = vmatprep.subr.bf16.mxu0 %v12338_v7  ;;  %4932 = vmatprep.subr.bf16.mxu1 %v12492_v53  ;;  %v12518_v7 = vld [vmem:[#allocation13 + $0x2c] ss:$16 sps:$4 sm:$0xff]  }
 0x617   : > { %4892 = vmatpush1.bf16.msra.mxu0 %v12342_v4  ;;  %4933 = vmatpush1.bf16.msra.mxu1 %v12496_v1  ;;  %v12520_v4 = vld [vmem:[#allocation13 + $0x20] ss:$16 sps:$4 sm:$0xff]  }
 0x618   : > { %5213 = vmatprep.subr.bf16.mxu0 %v12504_v39  ;;  %5254 = vmatprep.subr.bf16.mxu1 %v12506_v41 }
 0x61a   : > { %4910 = vmatmul.mubr.bf16.vlgmr.msra.gmra.mrb[48].mxu0 %v4098_v10  ;;  %4951 = vmatmul.mubr.bf16.vlgmr.msra.gmra.mrb[80].mxu1 %v4098_v10 }
 0x61b   : > { %5245 = vmatprep.mubr.bf16.mxu0 %v13690_v43  ;;  %5286 = vmatprep.mubr.bf16.mxu1 %v13690_v43 }
 0x61c   : > { %5214 = vmatpush1.bf16.msra.mxu0 %v12508_v44  ;;  %5255 = vmatpush1.bf16.msra.mxu1 %v12510_v0 }
 0x61d   : > { %5215 = vmatprep.subr.bf16.mxu0 %v12516_v55  ;;  %5256 = vmatprep.subr.bf16.mxu1 %v12518_v7 }
 0x620   : > { %5216 = vmatpush1.bf16.msra.mxu0 %v12520_v4  ;;  %5257 = vmatpush1.bf16.msra.mxu1 %v12522_v12 }
 0x621   : > { %5217 = vmatprep.subr.bf16.mxu0 %v12528_v13  ;;  %5258 = vmatprep.subr.bf16.mxu1 %v12530_v15 }
 0x624   : > { %5218 = vmatpush1.bf16.msra.mxu0 %v12532_v16  ;;  %5259 = vmatpush1.bf16.msra.mxu1 %v12534_v54 }
 0x625   : > { %5219 = vmatprep.subr.bf16.mxu0 %v12540_v61  ;;  %5260 = vmatprep.subr.bf16.mxu1 %v12542_v50 }
 0x628   : > { %5220 = vmatpush1.bf16.msra.mxu0 %v12544_v56  ;;  %5261 = vmatpush1.bf16.msra.mxu1 %v12546_v52 }
 0x629   : > { %5221 = vmatprep.subr.bf16.mxu0 %v12552_v38  ;;  %5262 = vmatprep.subr.bf16.mxu1 %v12554_v8 }
 0x62c   : > { %5222 = vmatpush1.bf16.msra.mxu0 %v12556_v32  ;;  %5263 = vmatpush1.bf16.msra.mxu1 %v12558_v28 }
 0x62d   : > { %5223 = vmatprep.subr.bf16.mxu0 %v12564_v29  ;;  %5264 = vmatprep.subr.bf16.mxu1 %v12566_v51 }
 0x630   : > { %5224 = vmatpush1.bf16.msra.mxu0 %v12568_v42  ;;  %5265 = vmatpush1.bf16.msra.mxu1 %v12570_v30 }
 0x631   : > { %5225 = vmatprep.subr.bf16.mxu0 %v12576_v59  ;;  %5266 = vmatprep.subr.bf16.mxu1 %v12578_v58 }
 0x634   : > { %5226 = vmatpush1.bf16.msra.mxu0 %v12580_v9  ;;  %5267 = vmatpush1.bf16.msra.mxu1 %v12582_v60 }
 0x635   : > { %5227 = vmatprep.subr.bf16.mxu0 %v12588_v19  ;;  %5268 = vmatprep.subr.bf16.mxu1 %v12590_v26 }
 0x638   : > { %5228 = vmatpush1.bf16.msra.mxu0 %v12592_v21  ;;  %5269 = vmatpush1.bf16.msra.mxu1 %v12594_v63 }
 0x639   : > { %5455 = vmatprep.subr.bf16.mxu0 %v12600_v34  ;;  %5496 = vmatprep.subr.bf16.mxu1 %v12602_v46 }
 0x6ad   : > { %v4358_v6 = vpop.f32.mrb[40].mxu0  ;;  %v4399_v47 = vpop.f32.mrb[72].mxu1 }
 0x6ae   : > { %v4360_v48 = vpop.f32.mrb[41].mxu0  ;;  %v4401_v49 = vpop.f32.mrb[73].mxu1 }
 0x6af   : > { %v4362_v57 = vpop.f32.mrb[42].mxu0  ;;  %v4403_v10 = vpop.f32.mrb[74].mxu1 }
 0x6b0   : > { %v4363_v5 = vpop.f32.mrb[43].mxu0  ;;  %v4404_v26 = vpop.f32.mrb[75].mxu1 }
 0x6cd   : > { %v4600_v19 = vpop.f32.mrb[44].mxu0  ;;  %v4641_v21 = vpop.f32.mrb[76].mxu1 }
 0x6ce   : > { %v4601_v60 = vadd.f32 %v4600_v19, %v4358_v6  ;;  %v4642_v63 = vadd.f32 %v4641_v21, %v4399_v47  ;;  %v4602_v9 = vpop.f32.mrb[45].mxu0  ;;  %v4643_v58 = vpop.f32.mrb[77].mxu1  ;;  %v13810_v47 = vld [vmem:[#allocation69_spill] sm:$0xff] }
 0x6cf   : > { %v4603_v59 = vadd.f32 %v4602_v9, %v4360_v48  ;;  %v4644_v30 = vadd.f32 %v4643_v58, %v4401_v49  ;;  %v4604_v42 = vpop.f32.mrb[46].mxu0  ;;  %v4645_v34 = vpop.f32.mrb[78].mxu1  ;;  %v13811_v48 = vld [vmem:[#allocation81_spill] sm:$0xff] }
 0x6d0   : > { %v4648_v46 = vadd.f32 %v4601_v60, %v11933_v20  ;;  %v4605_v51 = vpop.f32.mrb[47].mxu0  ;;  %v4646_v29 = vpop.f32.mrb[79].mxu1  ;;  %v4650_v26 = vadd.f32 %v4642_v63, %v11948_v45 }
 0x6d1   : > { %v4649_v28 = vadd.f32 %v4603_v59, %v11937_v24  ;;  %v4651_v5 = vadd.f32 %v4644_v30, %v11943_v40 }
 0x6d2   : > { %v9170_v57 = vmul.f32 -1.442695, %v4648_v46 }
 0x6d3   : > { %v9171_v10 = vmul.f32 -1.442695, %v4649_v28  ;;  %v9172_v19 = vmul.f32 -1.442695, %v4651_v5 }
 0x6d4   : > { %10548 = vpow2.f32 %v9170_v57 }
 0x6d5   : > { %10550 = vpow2.f32 %v9171_v10 }
 0x6d6   : > { %10552 = vpow2.f32 %v9172_v19  ;;  %v13812_v19 = vld [vmem:[#allocation70_spill] sm:$0xff] }
 0x6d7   : > { %10554 = vtanh.f32 %v4650_v26 }
 0x6de   : > { %v10549_v21 = vpop.eup %10548 }
 0x6df   : > { %v10551_v9 = vpop.eup %10550  ;;  %v4655_v58 = vadd.f32 1.0, %v10549_v21  ;;  %v13813_v21 = vld [vmem:[#allocation82_spill] sm:$0xff] }
 0x6e0   : > { %v4661_v42 = vadd.f32 1.0, %v10551_v9  ;;  %v10553_v29 = vpop.eup %10552 }
 0x6e1   : > { %10556 = vrcp.f32 %v4655_v58  ;;  %v10555_v51 = vpop.eup %10554  ;;  %v4668_v34 = vadd.f32 1.0, %v10553_v29 }
 0x6e2   : > { %10558 = vrcp.f32 %v4661_v42 }
 0x6e3   : > { %10560 = vrcp.f32 %v4668_v34  ;;  %v12622_v34 = vld [vmem:[#allocation12 + $0x8] ss:$16 sps:$4 sm:$0xff]  }
 0x6eb   : > { %v10557_v59 = vpop.eup %10556 }
 0x6ec   : > { %v10559_v60 = vpop.eup %10558  ;;  %v4672_v28 = vmul.f32 %v10557_v59, %v10555_v51 }
 0x6ed   : > { %v4671_v46 = vmul.f32 %v10559_v60, %v12391_v2  ;;  %v4911_v30 = vpop.f32.mrb[48].mxu0  ;;  %v4952_v6 = vpop.f32.mrb[80].mxu1 }
 0x6ee   : > { %v4959_v63 = vadd.f32 %v4911_v30, %v13810_v47  ;;  %v4961_v49 = vadd.f32 %v4952_v6, %v13811_v48  ;;  %v4913_v57 = vpop.f32.mrb[49].mxu0  ;;  %v4954_v10 = vpop.f32.mrb[81].mxu1 }
 0x6ef   : > { %v12613_v5 = vadd.f32 %v4672_v28, %v4671_v46  ;;  %v4960_v26 = vadd.f32 %v4913_v57, %v13812_v19  ;;  %v4962_v9 = vadd.f32 %v4954_v10, %v13813_v21  ;;  %v4915_v58 = vpop.f32.mrb[50].mxu0  ;;  %v4956_v42 = vpop.f32.mrb[82].mxu1  ;;  %v12620_v57 = vld [vmem:[#allocation12] ss:$16 sps:$4 sm:$0xff]   ;;  %v12626_v19 = vld [vmem:[#allocation12 + $0x24] ss:$16 sps:$4 sm:$0xff]  }
 0x6f0   : > { %v9205_v29 = vmul.f32 -1.442695, %v4959_v63  ;;  %v4916_v51 = vpop.f32.mrb[51].mxu0  ;;  %v4957_v2 = vpop.f32.mrb[83].mxu1  ;;  %v12632_v21 = vld [vmem:[#allocation12 + $0x20] ss:$16 sps:$4 sm:$0xff]  }
 0x6f1   : > { %v9206_v59 = vmul.f32 -1.442695, %v4960_v26  ;;  %10562 = vtanh.f32 %v12613_v5  ;;  %v9207_v60 = vmul.f32 -1.442695, %v4962_v9  ;;  %v10561_v30 = vpop.eup %10560  ;;  %v12628_v26 = vld [vmem:[#allocation12 + $0x2c] ss:$16 sps:$4 sm:$0xff]  }
 0x6f2   : > { %10564 = vpow2.f32 %v9205_v29  ;;  %v12634_v9 = vld [vmem:[#allocation12 + $0x28] ss:$16 sps:$4 sm:$0xff]   ;;  %v12640_v58 = vld [vmem:[#allocation12 + $0x4c] ss:$16 sps:$4 sm:$0xff]   ;;  %v12646_v42 = vld [vmem:[#allocation12 + $0x40] ss:$16 sps:$4 sm:$0xff]  }
 0x6f3   : > { %10566 = vpow2.f32 %v9206_v59  ;;  %13815 = vst [vmem:[#allocation79_spill] sm:$0xff] %v12640_v58  ;;  %13816 = vst [vmem:[#allocation68_spill] sm:$0xff] %v12646_v42  ;;  %v12648_v29 = vld [vmem:[#allocation12 + $0x48] ss:$16 sps:$4 sm:$0xff]   ;;  %v12652_v51 = vld [vmem:[#allocation12 + $0x64] ss:$16 sps:$4 sm:$0xff]  }
 0x6f4   : > { %10568 = vpow2.f32 %v9207_v60  ;;  %13817 = vst [vmem:[#allocation80_spill] sm:$0xff] %v12648_v29  ;;  %v12654_v2 = vld [vmem:[#allocation12 + $0x6c] ss:$16 sps:$4 sm:$0xff]  }
 0x6f5   : > { %10570 = vtanh.f32 %v4961_v49  ;;  %v12638_v49 = vld [vmem:[#allocation12 + $0x44] ss:$16 sps:$4 sm:$0xff]  }
 0x6fb   : > { %v10563_v6 = vpop.eup %10562 }
 0x6fc   : > { %v10565_v28 = vpop.eup %10564  ;;  %v12618_v46 = vmul.f32 %v10563_v6, %v10561_v30  ;;  %v12658_v6 = vld [vmem:[#allocation12 + $0x60] ss:$16 sps:$4 sm:$0xff]  }
 0x6fd   : > { %v10567_v47 = vpop.eup %10566  ;;  %v4966_v48 = vadd.f32 1.0, %v10565_v28  ;;  %v12660_v28 = vld [vmem:[#allocation12 + $0x68] ss:$16 sps:$4 sm:$0xff]  }
 0x6fe   : > { %13814 = vst [vmem:[#allocation67_spill] sm:$0xff] %v12618_v46  ;;  %v4972_v63 = vadd.f32 1.0, %v10567_v47  ;;  %v5020_v10 = vpack.c.bf16 %v12618_v46, %v12618_v46  ;;  %v10569_v59 = vpop.eup %10568  ;;  %13818 = vst [vmem:[#allocation52_spill] sm:$0xff] %v12660_v28  ;;  %v12666_v46 = vld [vmem:[#allocation12 + $0x8c] ss:$16 sps:$4 sm:$0xff]  }
 0x6ff   : > { %10572 = vrcp.f32 %v4966_v48  ;;  %v10571_v60 = vpop.eup %10570  ;;  %13820 = vst [vmem:[#allocation56_spill] sm:$0xff] %v12666_v46 }
 0x700   : > { %10574 = vrcp.f32 %v4972_v63  ;;  %5246 = vmatmul.mubr.bf16.vlgmr.msra.gmra.mrb[52].mxu0 %v5020_v10  ;;  %5287 = vmatmul.mubr.bf16.vlgmr.msra.gmra.mrb[84].mxu1 %v5020_v10  ;;  %v4979_v63 = vadd.f32 1.0, %v10569_v59  ;;  %v12664_v10 = vld [vmem:[#allocation12 + $0x84] ss:$16 sps:$4 sm:$0xff]  }
 0x701   : > { %5456 = vmatpush1.bf16.msra.mxu0 %v12620_v57  ;;  %5497 = vmatpush1.bf16.msra.mxu1 %v12622_v34  ;;  %13819 = vst [vmem:[#allocation54_spill] sm:$0xff] %v12664_v10  ;;  %v12679_v59 = vld [vmem:[#allocation12 + $0xa4] ss:$16 sps:$4 sm:$0xff]  }
 0x702   : > { %5457 = vmatprep.subr.bf16.mxu0 %v12626_v19  ;;  %5498 = vmatprep.subr.bf16.mxu1 %v12628_v26  ;;  %10576 = vrcp.f32 %v4979_v63  ;;  %13823 = vst [vmem:[#allocation59_spill] sm:$0xff] %v12679_v59  ;;  %v12698_v63 = vld [vmem:[#allocation12 + $0xc0] ss:$16 sps:$4 sm:$0xff]  }
 0x703   : > { %5487 = vmatprep.mubr.bf16.mxu0 %v13690_v43  ;;  %5528 = vmatprep.mubr.bf16.mxu1 %v13690_v43 }
 0x705   : > { %5458 = vmatpush1.bf16.msra.mxu0 %v12632_v21  ;;  %5499 = vmatpush1.bf16.msra.mxu1 %v12634_v9 }
 0x706   : > { %5459 = vmatprep.subr.bf16.mxu0 %v12638_v49  ;;  %5500 = vmatprep.subr.bf16.mxu1 %v12640_v58 }
 0x709   : > { %v10573_v30 = vpop.eup %10572  ;;  %5460 = vmatpush1.bf16.msra.mxu0 %v12646_v42  ;;  %5501 = vmatpush1.bf16.msra.mxu1 %v12648_v29  ;;  %v12673_v29 = vld [vmem:[#allocation12 + $0x80] ss:$16 sps:$4 sm:$0xff]  }
 0x70a   : > { %v10575_v47 = vpop.eup %10574  ;;  %v4983_v48 = vmul.f32 %v10573_v30, %v10571_v60  ;;  %5461 = vmatprep.subr.bf16.mxu0 %v12652_v51  ;;  %5502 = vmatprep.subr.bf16.mxu1 %v12654_v2  ;;  %13821 = vst [vmem:[#allocation57_spill] sm:$0xff] %v12673_v29  ;;  %v12675_v60 = vld [vmem:[#allocation12 + $0x88] ss:$16 sps:$4 sm:$0xff]   ;;  %v12681_v30 = vld [vmem:[#allocation12 + $0xac] ss:$16 sps:$4 sm:$0xff]  }
 0x70b   : > { %v4982_v58 = vmul.f32 %v10575_v47, %v12415_v25  ;;  %13822 = vst [vmem:[#allocation58_spill] sm:$0xff] %v12675_v60  ;;  %13824 = vst [vmem:[#allocation60_spill] sm:$0xff] %v12681_v30  ;;  %v12686_v25 = vld [vmem:[#allocation12 + $0xa0] ss:$16 sps:$4 sm:$0xff]   ;;  %v12692_v47 = vld [vmem:[#allocation12 + $0xc4] ss:$16 sps:$4 sm:$0xff]  }
 0x70c   : > { %13825 = vst [vmem:[#allocation61_spill] sm:$0xff] %v12686_v25  ;;  %13827 = vst [vmem:[#allocation63_spill] sm:$0xff] %v12692_v47 }
 0x70d   : > { %v12669_v42 = vadd.f32 %v4983_v48, %v4982_v58  ;;  %5462 = vmatpush1.bf16.msra.mxu0 %v12658_v6  ;;  %5503 = vmatpush1.bf16.msra.mxu1 %v12660_v28  ;;  %v12688_v58 = vld [vmem:[#allocation12 + $0xa8] ss:$16 sps:$4 sm:$0xff]   ;;  %v12694_v48 = vld [vmem:[#allocation12 + $0xcc] ss:$16 sps:$4 sm:$0xff]  }
 0x70e   : > { %5463 = vmatprep.subr.bf16.mxu0 %v12664_v10  ;;  %5504 = vmatprep.subr.bf16.mxu1 %v12666_v46  ;;  %13826 = vst [vmem:[#allocation62_spill] sm:$0xff] %v12688_v58  ;;  %13828 = vst [vmem:[#allocation64_spill] sm:$0xff] %v12694_v48  ;;  %v12720_v28 = vld [vmem:[#allocation9] ss:$16 sps:$4 sm:$0xff]  }
 0x70f   : > { %10578 = vtanh.f32 %v12669_v42 }
 0x711   : > { %5464 = vmatpush1.bf16.msra.mxu0 %v12673_v29  ;;  %5505 = vmatpush1.bf16.msra.mxu1 %v12675_v60  ;;  %v12700_v29 = vld [vmem:[#allocation12 + $0xc8] ss:$16 sps:$4 sm:$0xff]   ;;  %v12704_v60 = vld [vmem:[#allocation12 + $0xe4] ss:$16 sps:$4 sm:$0xff]  }
 0x712   : > { %5465 = vmatprep.subr.bf16.mxu0 %v12679_v59  ;;  %5506 = vmatprep.subr.bf16.mxu1 %v12681_v30  ;;  %13829 = vst [vmem:[#allocation89_spill] sm:$0xff] %v12700_v29  ;;  %v12706_v59 = vld [vmem:[#allocation12 + $0xec] ss:$16 sps:$4 sm:$0xff]   ;;  %v10577_v30 = vpop.eup %10576 }
 0x715   : > { %5466 = vmatpush1.bf16.msra.mxu0 %v12686_v25  ;;  %5507 = vmatpush1.bf16.msra.mxu1 %v12688_v58  ;;  %v12710_v25 = vld [vmem:[#allocation12 + $0xe0] ss:$16 sps:$4 sm:$0xff]   ;;  %v12712_v58 = vld [vmem:[#allocation12 + $0xe8] ss:$16 sps:$4 sm:$0xff]  }
 0x716   : > { %5467 = vmatprep.subr.bf16.mxu0 %v12692_v47  ;;  %5508 = vmatprep.subr.bf16.mxu1 %v12694_v48  ;;  %v12716_v48 = vld [vmem:[#allocation9 + $0x4] ss:$16 sps:$4 sm:$0xff]  }
 0x719   : > { %v10579_v46 = vpop.eup %10578  ;;  %5468 = vmatpush1.bf16.msra.mxu0 %v12698_v63  ;;  %5509 = vmatpush1.bf16.msra.mxu1 %v12700_v29  ;;  %v12724_v29 = vld [vmem:[#allocation9 + $0x24] ss:$16 sps:$4 sm:$0xff]  }
 0x71a   : > { %5469 = vmatprep.subr.bf16.mxu0 %v12704_v60  ;;  %5510 = vmatprep.subr.bf16.mxu1 %v12706_v59  ;;  %v4986_v47 = vmul.f32 %v10579_v46, %v10577_v30  ;;  %v12728_v46 = vld [vmem:[#allocation9 + $0x20] ss:$16 sps:$4 sm:$0xff]   ;;  %v12732_v30 = vld [vmem:[#allocation9 + $0x44] ss:$16 sps:$4 sm:$0xff]  }
 0x71c   : > { %v4987_v10 = vpack.c.bf16 %v4986_v47, %v4986_v47  ;;  %v12750_v47 = vld [vmem:[#allocation9 + $0x84] ss:$16 sps:$4 sm:$0xff]  }
 0x71d   : > { %5470 = vmatpush1.bf16.msra.mxu0 %v12710_v25  ;;  %5511 = vmatpush1.bf16.msra.mxu1 %v12712_v58 }
 0x71e   : > { %5766 = vmatprep.subr.bf16.mxu0 %v12716_v48  ;;  %5807 = vmatprep.subr.bf16.mxu1 %v12434_v37  ;;  %v12738_v37 = vld [vmem:[#allocation9 + $0x40] ss:$16 sps:$4 sm:$0xff]  }
 0x720   : > { %5488 = vmatmul.mubr.bf16.vlgmr.msra.gmra.mrb[56].mxu0 %v4987_v10  ;;  %5529 = vmatmul.mubr.bf16.vlgmr.msra.gmra.mrb[88].mxu1 %v4987_v10 }
 0x721   : > { %5767 = vmatpush1.bf16.msra.mxu0 %v12720_v28  ;;  %5808 = vmatpush1.bf16.msra.mxu1 %v12438_v11  ;;  %v12742_v11 = vld [vmem:[#allocation9 + $0x64] ss:$16 sps:$4 sm:$0xff]  }
 0x722   : > { %5768 = vmatprep.subr.bf16.mxu0 %v12724_v29  ;;  %5809 = vmatprep.subr.bf16.mxu1 %v12442_v31  ;;  %v12746_v31 = vld [vmem:[#allocation9 + $0x60] ss:$16 sps:$4 sm:$0xff]  }
 0x723   : > { %5798 = vmatprep.mubr.bf16.mxu0 %v13690_v43  ;;  %5839 = vmatprep.mubr.bf16.mxu1 %v13690_v43 }
 0x725   : > { %5769 = vmatpush1.bf16.msra.mxu0 %v12728_v46  ;;  %5810 = vmatpush1.bf16.msra.mxu1 %v12446_v27  ;;  %v12754_v27 = vld [vmem:[#allocation9 + $0x80] ss:$16 sps:$4 sm:$0xff]  }
 0x726   : > { %5770 = vmatprep.subr.bf16.mxu0 %v12732_v30  ;;  %5811 = vmatprep.subr.bf16.mxu1 %v12450_v22  ;;  %v12758_v22 = vld [vmem:[#allocation9 + $0xa4] ss:$16 sps:$4 sm:$0xff]  }
 0x729   : > { %5771 = vmatpush1.bf16.msra.mxu0 %v12738_v37  ;;  %5812 = vmatpush1.bf16.msra.mxu1 %v12456_v14  ;;  %v12762_v14 = vld [vmem:[#allocation9 + $0xa0] ss:$16 sps:$4 sm:$0xff]  }
 0x72a   : > { %5772 = vmatprep.subr.bf16.mxu0 %v12742_v11  ;;  %5813 = vmatprep.subr.bf16.mxu1 %v12460_v17  ;;  %v12766_v17 = vld [vmem:[#allocation9 + $0xc4] ss:$16 sps:$4 sm:$0xff]  }
 0x72d   : > { %5773 = vmatpush1.bf16.msra.mxu0 %v12746_v31  ;;  %5814 = vmatpush1.bf16.msra.mxu1 %v12464_v18  ;;  %v12770_v18 = vld [vmem:[#allocation9 + $0xc0] ss:$16 sps:$4 sm:$0xff]  }
 0x72e   : > { %5774 = vmatprep.subr.bf16.mxu0 %v12750_v47  ;;  %5815 = vmatprep.subr.bf16.mxu1 %v12468_v23  ;;  %v12774_v23 = vld [vmem:[#allocation9 + $0xe4] ss:$16 sps:$4 sm:$0xff]  }
 0x731   : > { %5775 = vmatpush1.bf16.msra.mxu0 %v12754_v27  ;;  %5816 = vmatpush1.bf16.msra.mxu1 %v12472_v35  ;;  %v12778_v35 = vld [vmem:[#allocation9 + $0xe0] ss:$16 sps:$4 sm:$0xff]  }
 0x732   : > { %5776 = vmatprep.subr.bf16.mxu0 %v12758_v22  ;;  %5817 = vmatprep.subr.bf16.mxu1 %v12476_v33  ;;  %v13830_v33 = vld [vmem:[#allocation38_spill] sm:$0xff] }
 0x735   : > { %5777 = vmatpush1.bf16.msra.mxu0 %v12762_v14  ;;  %5818 = vmatpush1.bf16.msra.mxu1 %v12480_v3  ;;  %v13831_v3 = vld [vmem:[#allocation39_spill] sm:$0xff] }
 0x736   : > { %5778 = vmatprep.subr.bf16.mxu0 %v12766_v17  ;;  %5819 = vmatprep.subr.bf16.mxu1 %v12484_v62  ;;  %v13832_v62 = vld [vmem:[#allocation40_spill] sm:$0xff] }
 0x739   : > { %5779 = vmatpush1.bf16.msra.mxu0 %v12770_v18  ;;  %5820 = vmatpush1.bf16.msra.mxu1 %v12488_v36  ;;  %v13833_v36 = vld [vmem:[#allocation41_spill] sm:$0xff] }
 0x73a   : > { %5780 = vmatprep.subr.bf16.mxu0 %v12774_v23  ;;  %5821 = vmatprep.subr.bf16.mxu1 %v12492_v53  ;;  %v13834_v53 = vld [vmem:[#allocation42_spill] sm:$0xff] }
 0x73d   : > { %5781 = vmatpush1.bf16.msra.mxu0 %v12778_v35  ;;  %5822 = vmatpush1.bf16.msra.mxu1 %v12496_v1  ;;  %v13835_v1 = vld [vmem:[#allocation43_spill] sm:$0xff] }
 0x73e   : > { %6102 = vmatprep.subr.bf16.mxu0 %v12504_v39  ;;  %6143 = vmatprep.subr.bf16.mxu1 %v12506_v41  ;;  %v13836_v39 = vld [vmem:[#allocation44_spill] sm:$0xff]  ;;  %v13837_v41 = vld [vmem:[#allocation45_spill] sm:$0xff] }
 0x740   : > { %5799 = vmatmul.mubr.bf16.vlgmr.msra.gmra.mrb[60].mxu0 %v4987_v10  ;;  %5840 = vmatmul.mubr.bf16.vlgmr.msra.gmra.mrb[92].mxu1 %v4987_v10 }
 0x741   : > { %6103 = vmatpush1.bf16.msra.mxu0 %v12508_v44  ;;  %6144 = vmatpush1.bf16.msra.mxu1 %v12510_v0  ;;  %v13838_v44 = vld [vmem:[#allocation46_spill] sm:$0xff]  ;;  %v13839_v0 = vld [vmem:[#allocation47_spill] sm:$0xff] }
 0x742   : > { %6104 = vmatprep.subr.bf16.mxu0 %v12516_v55  ;;  %6145 = vmatprep.subr.bf16.mxu1 %v12518_v7  ;;  %v13840_v55 = vld [vmem:[#allocation48_spill] sm:$0xff]  ;;  %v13841_v7 = vld [vmem:[#allocation49_spill] sm:$0xff] }
 0x743   : > { %6134 = vmatprep.mubr.bf16.mxu0 %v13690_v43  ;;  %6175 = vmatprep.mubr.bf16.mxu1 %v13690_v43 }
 0x745   : > { %6105 = vmatpush1.bf16.msra.mxu0 %v12520_v4  ;;  %6146 = vmatpush1.bf16.msra.mxu1 %v12522_v12  ;;  %v13842_v4 = vld [vmem:[#allocation50_spill] sm:$0xff]  ;;  %v13843_v12 = vld [vmem:[#allocation51_spill] sm:$0xff] }
 0x746   : > { %6106 = vmatprep.subr.bf16.mxu0 %v12528_v13  ;;  %6147 = vmatprep.subr.bf16.mxu1 %v12530_v15  ;;  %v13844_v13 = vld [vmem:[#allocation53_spill] sm:$0xff] }
 0x749   : > { %6107 = vmatpush1.bf16.msra.mxu0 %v12532_v16  ;;  %6148 = vmatpush1.bf16.msra.mxu1 %v12534_v54 }
 0x74a   : > { %6108 = vmatprep.subr.bf16.mxu0 %v12540_v61  ;;  %6149 = vmatprep.subr.bf16.mxu1 %v12542_v50 }
 0x74d   : > { %6109 = vmatpush1.bf16.msra.mxu0 %v12544_v56  ;;  %6150 = vmatpush1.bf16.msra.mxu1 %v12546_v52 }
 0x74e   : > { %6110 = vmatprep.subr.bf16.mxu0 %v12552_v38  ;;  %6151 = vmatprep.subr.bf16.mxu1 %v12554_v8 }
 0x751   : > { %6111 = vmatpush1.bf16.msra.mxu0 %v12556_v32  ;;  %6152 = vmatpush1.bf16.msra.mxu1 %v13830_v33 }
 0x752   : > { %6112 = vmatprep.subr.bf16.mxu0 %v13831_v3  ;;  %6153 = vmatprep.subr.bf16.mxu1 %v13832_v62 }
 0x755   : > { %6113 = vmatpush1.bf16.msra.mxu0 %v13833_v36  ;;  %6154 = vmatpush1.bf16.msra.mxu1 %v13834_v53 }
 0x756   : > { %6114 = vmatprep.subr.bf16.mxu0 %v13835_v1  ;;  %6155 = vmatprep.subr.bf16.mxu1 %v13836_v39 }
 0x759   : > { %6115 = vmatpush1.bf16.msra.mxu0 %v13837_v41  ;;  %6156 = vmatpush1.bf16.msra.mxu1 %v13838_v44 }
 0x75a   : > { %6116 = vmatprep.subr.bf16.mxu0 %v13839_v0  ;;  %6157 = vmatprep.subr.bf16.mxu1 %v13840_v55 }
 0x75d   : > { %6117 = vmatpush1.bf16.msra.mxu0 %v13841_v7  ;;  %6158 = vmatpush1.bf16.msra.mxu1 %v13842_v4 }
 0x75e   : > { %6344 = vmatprep.subr.bf16.mxu0 %v13843_v12  ;;  %6385 = vmatprep.subr.bf16.mxu1 %v13844_v13 }
 0x7d3   : > { %v5247_v15 = vpop.f32.mrb[52].mxu0  ;;  %v5288_v16 = vpop.f32.mrb[84].mxu1 }
 0x7d4   : > { %v5249_v54 = vpop.f32.mrb[53].mxu0  ;;  %v5290_v61 = vpop.f32.mrb[85].mxu1 }
 0x7d5   : > { %v5251_v50 = vpop.f32.mrb[54].mxu0  ;;  %v5292_v56 = vpop.f32.mrb[86].mxu1 }
 0x7d6   : > { %v5252_v52 = vpop.f32.mrb[55].mxu0  ;;  %v5293_v38 = vpop.f32.mrb[87].mxu1 }
 0x7f3   : > { %v5489_v8 = vpop.f32.mrb[56].mxu0  ;;  %v5530_v32 = vpop.f32.mrb[88].mxu1 }
 0x7f4   : > { %v5490_v10 = vadd.f32 %v5489_v8, %v5247_v15  ;;  %v5531_v33 = vadd.f32 %v5530_v32, %v5288_v16  ;;  %v5491_v3 = vpop.f32.mrb[57].mxu0  ;;  %v5532_v62 = vpop.f32.mrb[89].mxu1 }
 0x7f5   : > { %v5492_v36 = vadd.f32 %v5491_v3, %v5249_v54  ;;  %v5533_v53 = vadd.f32 %v5532_v62, %v5290_v61  ;;  %v5493_v1 = vpop.f32.mrb[58].mxu0  ;;  %v5534_v39 = vpop.f32.mrb[90].mxu1 }
 0x7f6   : > { %v5537_v41 = vadd.f32 %v5490_v10, %v11933_v20  ;;  %v5494_v44 = vpop.f32.mrb[59].mxu0  ;;  %v5535_v0 = vpop.f32.mrb[91].mxu1  ;;  %v5539_v15 = vadd.f32 %v5531_v33, %v11948_v45  ;;  %v13846_v1 = vld [vmem:[#allocation83_spill] sm:$0xff] }
 0x7f7   : > { %v5538_v55 = vadd.f32 %v5492_v36, %v11937_v24  ;;  %v5540_v12 = vadd.f32 %v5533_v53, %v11943_v40  ;;  %v13845_v53 = vld [vmem:[#allocation71_spill] sm:$0xff] }
 0x7f8   : > { %v9272_v7 = vmul.f32 -1.442695, %v5537_v41 }
 0x7f9   : > { %v9273_v4 = vmul.f32 -1.442695, %v5538_v55  ;;  %v9274_v13 = vmul.f32 -1.442695, %v5540_v12  ;;  %v13847_v55 = vld [vmem:[#allocation72_spill] sm:$0xff] }
 0x7fa   : > { %10580 = vpow2.f32 %v9272_v7 }
 0x7fb   : > { %10582 = vpow2.f32 %v9273_v4  ;;  %v13848_v4 = vld [vmem:[#allocation84_spill] sm:$0xff] }
 0x7fc   : > { %10584 = vpow2.f32 %v9274_v13 }
 0x7fd   : > { %10586 = vtanh.f32 %v5539_v15 }
 0x804   : > { %v10581_v16 = vpop.eup %10580 }
 0x805   : > { %v10583_v54 = vpop.eup %10582  ;;  %v5544_v61 = vadd.f32 1.0, %v10581_v16 }
 0x806   : > { %v5550_v50 = vadd.f32 1.0, %v10583_v54  ;;  %v10585_v56 = vpop.eup %10584 }
 0x807   : > { %10588 = vrcp.f32 %v5544_v61  ;;  %v10587_v52 = vpop.eup %10586  ;;  %v5557_v10 = vadd.f32 1.0, %v10585_v56 }
 0x808   : > { %10590 = vrcp.f32 %v5550_v50 }
 0x809   : > { %10592 = vrcp.f32 %v5557_v10 }
 0x811   : > { %v10589_v38 = vpop.eup %10588 }
 0x812   : > { %v10591_v8 = vpop.eup %10590  ;;  %v5561_v32 = vmul.f32 %v10589_v38, %v10587_v52 }
 0x813   : > { %v5560_v3 = vmul.f32 %v10591_v8, %v12613_v5  ;;  %v5800_v62 = vpop.f32.mrb[60].mxu0  ;;  %v5841_v36 = vpop.f32.mrb[92].mxu1 }
 0x814   : > { %v5848_v33 = vadd.f32 %v5800_v62, %v13845_v53  ;;  %v5850_v39 = vadd.f32 %v5841_v36, %v13846_v1  ;;  %v5802_v41 = vpop.f32.mrb[61].mxu0  ;;  %v5843_v44 = vpop.f32.mrb[93].mxu1  ;;  %v13850_v36 = vld [vmem:[#allocation79_spill] sm:$0xff] }
 0x815   : > { %v12827_v0 = vadd.f32 %v5561_v32, %v5560_v3  ;;  %v5849_v7 = vadd.f32 %v5802_v41, %v13847_v55  ;;  %v5851_v12 = vadd.f32 %v5843_v44, %v13848_v4  ;;  %v5804_v13 = vpop.f32.mrb[62].mxu0  ;;  %v5845_v15 = vpop.f32.mrb[94].mxu1  ;;  %v13854_v41 = vld [vmem:[#allocation54_spill] sm:$0xff]  ;;  %v13855_v44 = vld [vmem:[#allocation56_spill] sm:$0xff]  ;;  %v13856_v55 = vld [vmem:[#allocation57_spill] sm:$0xff] }
 0x816   : > { %v9307_v16 = vmul.f32 -1.442695, %v5848_v33  ;;  %v5805_v54 = vpop.f32.mrb[63].mxu0  ;;  %v5846_v5 = vpop.f32.mrb[95].mxu1  ;;  %v13862_v4 = vld [vmem:[#allocation63_spill] sm:$0xff] }
 0x817   : > { %v9308_v61 = vmul.f32 -1.442695, %v5849_v7  ;;  %10594 = vtanh.f32 %v12827_v0  ;;  %v9309_v50 = vmul.f32 -1.442695, %v5851_v12  ;;  %v10593_v56 = vpop.eup %10592  ;;  %v13860_v7 = vld [vmem:[#allocation61_spill] sm:$0xff]  ;;  %v13863_v12 = vld [vmem:[#allocation64_spill] sm:$0xff] }
 0x818   : > { %10596 = vpow2.f32 %v9307_v16  ;;  %v13864_v16 = vld [vmem:[#allocation89_spill] sm:$0xff]  ;;  %v12870_v5 = vld [vmem:[#allocation9 + $0xc] ss:$16 sps:$4 sm:$0xff]  }
 0x819   : > { %10598 = vpow2.f32 %v9308_v61 }
 0x81a   : > { %10600 = vpow2.f32 %v9309_v50  ;;  %v12874_v50 = vld [vmem:[#allocation9 + $0x8] ss:$16 sps:$4 sm:$0xff]  }
 0x81b   : > { %10602 = vtanh.f32 %v5850_v39 }
 0x821   : > { %v10595_v52 = vpop.eup %10594 }
 0x822   : > { %v10597_v38 = vpop.eup %10596  ;;  %v12832_v8 = vmul.f32 %v10595_v52, %v10593_v56  ;;  %v12958_v56 = vld [vmem:[#allocation13 + $0x28] ss:$16 sps:$4 sm:$0xff]   ;;  %v12964_v52 = vld [vmem:[#allocation13 + $0x44] ss:$16 sps:$4 sm:$0xff]  }
 0x823   : > { %v10599_v32 = vpop.eup %10598  ;;  %v5855_v3 = vadd.f32 1.0, %v10597_v38  ;;  %v12966_v38 = vld [vmem:[#allocation13 + $0x4c] ss:$16 sps:$4 sm:$0xff]  }
 0x824   : > { %13849 = vst [vmem:[#allocation65_spill] sm:$0xff] %v12832_v8  ;;  %v5861_v62 = vadd.f32 1.0, %v10599_v32  ;;  %v5909_v10 = vpack.c.bf16 %v12832_v8, %v12832_v8  ;;  %v10601_v53 = vpop.eup %10600  ;;  %v12968_v32 = vld [vmem:[#allocation13 + $0x40] ss:$16 sps:$4 sm:$0xff]  }
 0x825   : > { %10604 = vrcp.f32 %v5855_v3  ;;  %v5868_v39 = vadd.f32 1.0, %v10601_v53  ;;  %v12970_v3 = vld [vmem:[#allocation13 + $0x48] ss:$16 sps:$4 sm:$0xff]  }
 0x826   : > { %10606 = vrcp.f32 %v5861_v62  ;;  %6135 = vmatmul.mubr.bf16.vlgmr.msra.gmra.mrb[64].mxu0 %v5909_v10  ;;  %6176 = vmatmul.mubr.bf16.vlgmr.msra.gmra.mrb[96].mxu1 %v5909_v10  ;;  %v12976_v62 = vld [vmem:[#allocation13 + $0x64] ss:$16 sps:$4 sm:$0xff]   ;;  %v12978_v10 = vld [vmem:[#allocation13 + $0x6c] ss:$16 sps:$4 sm:$0xff]   ;;  %v12982_v53 = vld [vmem:[#allocation13 + $0x68] ss:$16 sps:$4 sm:$0xff]  }
 0x827   : > { %6345 = vmatpush1.bf16.msra.mxu0 %v12620_v57  ;;  %6386 = vmatpush1.bf16.msra.mxu1 %v12622_v34  ;;  %v10603_v57 = vpop.eup %10602  ;;  %v13851_v34 = vld [vmem:[#allocation68_spill] sm:$0xff]  ;;  %10608 = vrcp.f32 %v5868_v39  ;;  %v13004_v39 = vld [vmem:[#allocation13 + $0xa0] ss:$16 sps:$4 sm:$0xff]  }
 0x828   : > { %6346 = vmatprep.subr.bf16.mxu0 %v12626_v19  ;;  %6387 = vmatprep.subr.bf16.mxu1 %v12628_v26  ;;  %v13852_v19 = vld [vmem:[#allocation80_spill] sm:$0xff]  ;;  %13868 = vst [vmem:[#allocation81_spill] sm:$0xff] %v13004_v39 }
 0x829   : > { %6376 = vmatprep.mubr.bf16.mxu0 %v13690_v43  ;;  %6417 = vmatprep.mubr.bf16.mxu1 %v13690_v43 }
 0x82b   : > { %6347 = vmatpush1.bf16.msra.mxu0 %v12632_v21  ;;  %6388 = vmatpush1.bf16.msra.mxu1 %v12634_v9 }
 0x82c   : > { %6348 = vmatprep.subr.bf16.mxu0 %v12638_v49  ;;  %6389 = vmatprep.subr.bf16.mxu1 %v13850_v36  ;;  %v13853_v49 = vld [vmem:[#allocation52_spill] sm:$0xff]  ;;  %v12980_v36 = vld [vmem:[#allocation13 + $0x60] ss:$16 sps:$4 sm:$0xff]  }
 0x82f   : > { %v10605_v33 = vpop.eup %10604  ;;  %6349 = vmatpush1.bf16.msra.mxu0 %v13851_v34  ;;  %6390 = vmatpush1.bf16.msra.mxu1 %v13852_v19  ;;  %v12992_v34 = vld [vmem:[#allocation13 + $0x80] ss:$16 sps:$4 sm:$0xff]   ;;  %v12994_v19 = vld [vmem:[#allocation13 + $0x88] ss:$16 sps:$4 sm:$0xff]  }
 0x830   : > { %v10607_v26 = vpop.eup %10606  ;;  %v5872_v1 = vmul.f32 %v10605_v33, %v10603_v57  ;;  %6350 = vmatprep.subr.bf16.mxu0 %v12652_v51  ;;  %6391 = vmatprep.subr.bf16.mxu1 %v12654_v2  ;;  %v13857_v51 = vld [vmem:[#allocation58_spill] sm:$0xff]  ;;  %v13858_v2 = vld [vmem:[#allocation59_spill] sm:$0xff]  ;;  %13865 = vst [vmem:[#allocation77_spill] sm:$0xff] %v12994_v19 }
 0x831   : > { %v5871_v21 = vmul.f32 %v10607_v26, %v12669_v42  ;;  %v13859_v42 = vld [vmem:[#allocation60_spill] sm:$0xff]  ;;  %v10609_v13 = vpop.eup %10608  ;;  %v12990_v33 = vld [vmem:[#allocation13 + $0x8c] ss:$16 sps:$4 sm:$0xff]  }
 0x832   : > { %v12988_v57 = vld [vmem:[#allocation13 + $0x84] ss:$16 sps:$4 sm:$0xff]  }
 0x833   : > { %v12851_v9 = vadd.f32 %v5872_v1, %v5871_v21  ;;  %6351 = vmatpush1.bf16.msra.mxu0 %v12658_v6  ;;  %6392 = vmatpush1.bf16.msra.mxu1 %v13853_v49  ;;  %v13861_v6 = vld [vmem:[#allocation62_spill] sm:$0xff]  ;;  %v13002_v1 = vld [vmem:[#allocation13 + $0xac] ss:$16 sps:$4 sm:$0xff]  }
 0x834   : > { %6352 = vmatprep.subr.bf16.mxu0 %v13854_v41  ;;  %6393 = vmatprep.subr.bf16.mxu1 %v13855_v44  ;;  %v13000_v26 = vld [vmem:[#allocation13 + $0xa4] ss:$16 sps:$4 sm:$0xff]   ;;  %13867 = vst [vmem:[#allocation69_spill] sm:$0xff] %v13002_v1  ;;  %v13006_v21 = vld [vmem:[#allocation13 + $0xa8] ss:$16 sps:$4 sm:$0xff]  }
 0x835   : > { %10610 = vtanh.f32 %v12851_v9  ;;  %13866 = vst [vmem:[#allocation66_spill] sm:$0xff] %v13000_v26  ;;  %13869 = vst [vmem:[#allocation70_spill] sm:$0xff] %v13006_v21  ;;  %v13012_v49 = vld [vmem:[#allocation13 + $0xc4] ss:$16 sps:$4 sm:$0xff]   ;;  %v13014_v41 = vld [vmem:[#allocation13 + $0xcc] ss:$16 sps:$4 sm:$0xff]  }
 0x836   : > { %13870 = vst [vmem:[#allocation82_spill] sm:$0xff] %v13012_v49  ;;  %13871 = vst [vmem:[#allocation38_spill] sm:$0xff] %v13014_v41  ;;  %v13016_v44 = vld [vmem:[#allocation13 + $0xc0] ss:$16 sps:$4 sm:$0xff]  }
 0x837   : > { %6353 = vmatpush1.bf16.msra.mxu0 %v13856_v55  ;;  %6394 = vmatpush1.bf16.msra.mxu1 %v13857_v51  ;;  %13872 = vst [vmem:[#allocation39_spill] sm:$0xff] %v13016_v44  ;;  %v13018_v55 = vld [vmem:[#allocation13 + $0xc8] ss:$16 sps:$4 sm:$0xff]   ;;  %v13024_v51 = vld [vmem:[#allocation13 + $0xe4] ss:$16 sps:$4 sm:$0xff]  }
 0x838   : > { %6354 = vmatprep.subr.bf16.mxu0 %v13858_v2  ;;  %6395 = vmatprep.subr.bf16.mxu1 %v13859_v42  ;;  %13873 = vst [vmem:[#allocation40_spill] sm:$0xff] %v13018_v55  ;;  %13874 = vst [vmem:[#allocation41_spill] sm:$0xff] %v13024_v51  ;;  %v13026_v2 = vld [vmem:[#allocation13 + $0xec] ss:$16 sps:$4 sm:$0xff]   ;;  %v13028_v42 = vld [vmem:[#allocation13 + $0xe0] ss:$16 sps:$4 sm:$0xff]  }
 0x839   : > { %13875 = vst [vmem:[#allocation42_spill] sm:$0xff] %v13026_v2  ;;  %13876 = vst [vmem:[#allocation43_spill] sm:$0xff] %v13028_v42 }
 0x83b   : > { %6355 = vmatpush1.bf16.msra.mxu0 %v13860_v7  ;;  %6396 = vmatpush1.bf16.msra.mxu1 %v13861_v6  ;;  %v13030_v7 = vld [vmem:[#allocation13 + $0xe8] ss:$16 sps:$4 sm:$0xff]   ;;  %v13036_v6 = vld [vmem:[#allocation12 + $0x4] ss:$16 sps:$4 sm:$0xff]  }
 0x83c   : > { %6356 = vmatprep.subr.bf16.mxu0 %v13862_v4  ;;  %6397 = vmatprep.subr.bf16.mxu1 %v13863_v12  ;;  %13877 = vst [vmem:[#allocation44_spill] sm:$0xff] %v13030_v7  ;;  %13878 = vst [vmem:[#allocation45_spill] sm:$0xff] %v13036_v6  ;;  %v13038_v4 = vld [vmem:[#allocation12 + $0xc] ss:$16 sps:$4 sm:$0xff]  }
 0x83d   : > { %13879 = vst [vmem:[#allocation46_spill] sm:$0xff] %v13038_v4 }
 0x83f   : > { %v10611_v15 = vpop.eup %10610  ;;  %6357 = vmatpush1.bf16.msra.mxu0 %v12698_v63  ;;  %6398 = vmatpush1.bf16.msra.mxu1 %v13864_v16  ;;  %v12878_v63 = vld [vmem:[#allocation9 + $0x2c] ss:$16 sps:$4 sm:$0xff]  }
 0x840   : > { %6358 = vmatprep.subr.bf16.mxu0 %v12704_v60  ;;  %6399 = vmatprep.subr.bf16.mxu1 %v12706_v59  ;;  %v5875_v54 = vmul.f32 %v10611_v15, %v10609_v13  ;;  %v12882_v60 = vld [vmem:[#allocation9 + $0x28] ss:$16 sps:$4 sm:$0xff]   ;;  %v12886_v59 = vld [vmem:[#allocation9 + $0x4c] ss:$16 sps:$4 sm:$0xff]  }
 0x842   : > { %v5876_v61 = vpack.c.bf16 %v5875_v54, %v5875_v54 }
 0x843   : > { %6359 = vmatpush1.bf16.msra.mxu0 %v12710_v25  ;;  %6400 = vmatpush1.bf16.msra.mxu1 %v12712_v58  ;;  %v12892_v25 = vld [vmem:[#allocation9 + $0x48] ss:$16 sps:$4 sm:$0xff]   ;;  %v12904_v58 = vld [vmem:[#allocation9 + $0x8c] ss:$16 sps:$4 sm:$0xff]  }
 0x844   : > { %6655 = vmatprep.subr.bf16.mxu0 %v12716_v48  ;;  %6696 = vmatprep.subr.bf16.mxu1 %v12870_v5  ;;  %v12908_v48 = vld [vmem:[#allocation9 + $0x88] ss:$16 sps:$4 sm:$0xff]  }
 0x846   : > { %6377 = vmatmul.mubr.bf16.vlgmr.msra.gmra.mrb[68].mxu0 %v5876_v61  ;;  %6418 = vmatmul.mubr.bf16.vlgmr.msra.gmra.mrb[100].mxu1 %v5876_v61 }
 0x847   : > { %6656 = vmatpush1.bf16.msra.mxu0 %v12720_v28  ;;  %6697 = vmatpush1.bf16.msra.mxu1 %v12874_v50  ;;  %v12896_v28 = vld [vmem:[#allocation9 + $0x6c] ss:$16 sps:$4 sm:$0xff]  }
 0x848   : > { %6657 = vmatprep.subr.bf16.mxu0 %v12724_v29  ;;  %6698 = vmatprep.subr.bf16.mxu1 %v12878_v63  ;;  %v12900_v29 = vld [vmem:[#allocation9 + $0x68] ss:$16 sps:$4 sm:$0xff]  }
 0x849   : > { %6687 = vmatprep.mubr.bf16.mxu0 %v13690_v43  ;;  %6728 = vmatprep.mubr.bf16.mxu1 %v13690_v43 }
 0x84b   : > { %6658 = vmatpush1.bf16.msra.mxu0 %v12728_v46  ;;  %6699 = vmatpush1.bf16.msra.mxu1 %v12882_v60  ;;  %v12912_v46 = vld [vmem:[#allocation9 + $0xac] ss:$16 sps:$4 sm:$0xff]  }
 0x84c   : > { %6659 = vmatprep.subr.bf16.mxu0 %v12732_v30  ;;  %6700 = vmatprep.subr.bf16.mxu1 %v12886_v59  ;;  %v12916_v30 = vld [vmem:[#allocation9 + $0xa8] ss:$16 sps:$4 sm:$0xff]  }
 0x84f   : > { %6660 = vmatpush1.bf16.msra.mxu0 %v12738_v37  ;;  %6701 = vmatpush1.bf16.msra.mxu1 %v12892_v25  ;;  %v12920_v37 = vld [vmem:[#allocation9 + $0xcc] ss:$16 sps:$4 sm:$0xff]  }
 0x850   : > { %6661 = vmatprep.subr.bf16.mxu0 %v12742_v11  ;;  %6702 = vmatprep.subr.bf16.mxu1 %v12896_v28  ;;  %v12924_v11 = vld [vmem:[#allocation9 + $0xc8] ss:$16 sps:$4 sm:$0xff]  }
 0x853   : > { %6662 = vmatpush1.bf16.msra.mxu0 %v12746_v31  ;;  %6703 = vmatpush1.bf16.msra.mxu1 %v12900_v29  ;;  %v12928_v31 = vld [vmem:[#allocation9 + $0xec] ss:$16 sps:$4 sm:$0xff]  }
 0x854   : > { %6663 = vmatprep.subr.bf16.mxu0 %v12750_v47  ;;  %6704 = vmatprep.subr.bf16.mxu1 %v12904_v58  ;;  %v12932_v47 = vld [vmem:[#allocation9 + $0xe8] ss:$16 sps:$4 sm:$0xff]  }
 0x857   : > { %6664 = vmatpush1.bf16.msra.mxu0 %v12754_v27  ;;  %6705 = vmatpush1.bf16.msra.mxu1 %v12908_v48  ;;  %v12940_v27 = vld [vmem:[#allocation13 + $0x4] ss:$16 sps:$4 sm:$0xff]  }
 0x858   : > { %6665 = vmatprep.subr.bf16.mxu0 %v12758_v22  ;;  %6706 = vmatprep.subr.bf16.mxu1 %v12912_v46  ;;  %v12942_v22 = vld [vmem:[#allocation13 + $0xc] ss:$16 sps:$4 sm:$0xff]  }
 0x85b   : > { %6666 = vmatpush1.bf16.msra.mxu0 %v12762_v14  ;;  %6707 = vmatpush1.bf16.msra.mxu1 %v12916_v30  ;;  %v12944_v14 = vld [vmem:[#allocation13] ss:$16 sps:$4 sm:$0xff]  }
 0x85c   : > { %6667 = vmatprep.subr.bf16.mxu0 %v12766_v17  ;;  %6708 = vmatprep.subr.bf16.mxu1 %v12920_v37  ;;  %v12946_v17 = vld [vmem:[#allocation13 + $0x8] ss:$16 sps:$4 sm:$0xff]  }
 0x85f   : > { %6668 = vmatpush1.bf16.msra.mxu0 %v12770_v18  ;;  %6709 = vmatpush1.bf16.msra.mxu1 %v12924_v11  ;;  %v12952_v18 = vld [vmem:[#allocation13 + $0x24] ss:$16 sps:$4 sm:$0xff]  }
 0x860   : > { %6669 = vmatprep.subr.bf16.mxu0 %v12774_v23  ;;  %6710 = vmatprep.subr.bf16.mxu1 %v12928_v31  ;;  %v12954_v23 = vld [vmem:[#allocation13 + $0x2c] ss:$16 sps:$4 sm:$0xff]  }
 0x863   : > { %6670 = vmatpush1.bf16.msra.mxu0 %v12778_v35  ;;  %6711 = vmatpush1.bf16.msra.mxu1 %v12932_v47  ;;  %v12956_v35 = vld [vmem:[#allocation13 + $0x20] ss:$16 sps:$4 sm:$0xff]  }
 0x864   : > { %6991 = vmatprep.subr.bf16.mxu0 %v12940_v27  ;;  %7032 = vmatprep.subr.bf16.mxu1 %v12942_v22 }
 0x866   : > { %6688 = vmatmul.mubr.bf16.vlgmr.msra.gmra.mrb[72].mxu0 %v5876_v61  ;;  %6729 = vmatmul.mubr.bf16.vlgmr.msra.gmra.mrb[104].mxu1 %v5876_v61 }
 0x867   : > { %7023 = vmatprep.mubr.bf16.mxu0 %v13690_v43  ;;  %7064 = vmatprep.mubr.bf16.mxu1 %v13690_v43 }
 0x868   : > { %6992 = vmatpush1.bf16.msra.mxu0 %v12944_v14  ;;  %7033 = vmatpush1.bf16.msra.mxu1 %v12946_v17 }
 0x869   : > { %6993 = vmatprep.subr.bf16.mxu0 %v12952_v18  ;;  %7034 = vmatprep.subr.bf16.mxu1 %v12954_v23 }
 0x86c   : > { %6994 = vmatpush1.bf16.msra.mxu0 %v12956_v35  ;;  %7035 = vmatpush1.bf16.msra.mxu1 %v12958_v56 }
 0x86d   : > { %6995 = vmatprep.subr.bf16.mxu0 %v12964_v52  ;;  %7036 = vmatprep.subr.bf16.mxu1 %v12966_v38 }
 0x870   : > { %6996 = vmatpush1.bf16.msra.mxu0 %v12968_v32  ;;  %7037 = vmatpush1.bf16.msra.mxu1 %v12970_v3 }
 0x871   : > { %6997 = vmatprep.subr.bf16.mxu0 %v12976_v62  ;;  %7038 = vmatprep.subr.bf16.mxu1 %v12978_v10 }
 0x874   : > { %6998 = vmatpush1.bf16.msra.mxu0 %v12980_v36  ;;  %7039 = vmatpush1.bf16.msra.mxu1 %v12982_v53 }
 0x875   : > { %6999 = vmatprep.subr.bf16.mxu0 %v12988_v57  ;;  %7040 = vmatprep.subr.bf16.mxu1 %v12990_v33 }
 0x878   : > { %7000 = vmatpush1.bf16.msra.mxu0 %v12992_v34  ;;  %7041 = vmatpush1.bf16.msra.mxu1 %v12994_v19 }
 0x879   : > { %7001 = vmatprep.subr.bf16.mxu0 %v13000_v26  ;;  %7042 = vmatprep.subr.bf16.mxu1 %v13002_v1 }
 0x87c   : > { %7002 = vmatpush1.bf16.msra.mxu0 %v13004_v39  ;;  %7043 = vmatpush1.bf16.msra.mxu1 %v13006_v21 }
 0x87d   : > { %7003 = vmatprep.subr.bf16.mxu0 %v13012_v49  ;;  %7044 = vmatprep.subr.bf16.mxu1 %v13014_v41 }
 0x880   : > { %7004 = vmatpush1.bf16.msra.mxu0 %v13016_v44  ;;  %7045 = vmatpush1.bf16.msra.mxu1 %v13018_v55 }
 0x881   : > { %7005 = vmatprep.subr.bf16.mxu0 %v13024_v51  ;;  %7046 = vmatprep.subr.bf16.mxu1 %v13026_v2 }
 0x884   : > { %7006 = vmatpush1.bf16.msra.mxu0 %v13028_v42  ;;  %7047 = vmatpush1.bf16.msra.mxu1 %v13030_v7 }
 0x885   : > { %7233 = vmatprep.subr.bf16.mxu0 %v13036_v6  ;;  %7274 = vmatprep.subr.bf16.mxu1 %v13038_v4 }
 0x8f9   : > { %v6136_v12 = vpop.f32.mrb[64].mxu0  ;;  %v6177_v13 = vpop.f32.mrb[96].mxu1 }
 0x8fa   : > { %v6138_v15 = vpop.f32.mrb[65].mxu0  ;;  %v6179_v16 = vpop.f32.mrb[97].mxu1 }
 0x8fb   : > { %v6140_v54 = vpop.f32.mrb[66].mxu0  ;;  %v6181_v61 = vpop.f32.mrb[98].mxu1 }
 0x8fc   : > { %v6141_v8 = vpop.f32.mrb[67].mxu0  ;;  %v6182_v2 = vpop.f32.mrb[99].mxu1 }
 0x919   : > { %v6378_v51 = vpop.f32.mrb[68].mxu0  ;;  %v6419_v42 = vpop.f32.mrb[100].mxu1 }
 0x91a   : > { %v6379_v55 = vadd.f32 %v6378_v51, %v6136_v12  ;;  %v6420_v7 = vadd.f32 %v6419_v42, %v6177_v13  ;;  %v6380_v44 = vpop.f32.mrb[69].mxu0  ;;  %v6421_v41 = vpop.f32.mrb[101].mxu1  ;;  %v13880_v13 = vld [vmem:[#allocation73_spill] sm:$0xff] }
 0x91b   : > { %v6381_v49 = vadd.f32 %v6380_v44, %v6138_v15  ;;  %v6422_v21 = vadd.f32 %v6421_v41, %v6179_v16  ;;  %v6382_v39 = vpop.f32.mrb[70].mxu0  ;;  %v6423_v6 = vpop.f32.mrb[102].mxu1  ;;  %v13881_v15 = vld [vmem:[#allocation85_spill] sm:$0xff] }
 0x91c   : > { %v6426_v4 = vadd.f32 %v6379_v55, %v11933_v20  ;;  %v6383_v1 = vpop.f32.mrb[71].mxu0  ;;  %v6424_v26 = vpop.f32.mrb[103].mxu1  ;;  %v6428_v2 = vadd.f32 %v6420_v7, %v11948_v45 }
 0x91d   : > { %v6427_v19 = vadd.f32 %v6381_v49, %v11937_v24  ;;  %v6429_v8 = vadd.f32 %v6422_v21, %v11943_v40 }
 0x91e   : > { %v9374_v54 = vmul.f32 -1.442695, %v6426_v4 }
 0x91f   : > { %v9375_v61 = vmul.f32 -1.442695, %v6427_v19  ;;  %v9376_v51 = vmul.f32 -1.442695, %v6429_v8 }
 0x920   : > { %10612 = vpow2.f32 %v9374_v54 }
 0x921   : > { %10614 = vpow2.f32 %v9375_v61 }
 0x922   : > { %10616 = vpow2.f32 %v9376_v51  ;;  %v13882_v51 = vld [vmem:[#allocation74_spill] sm:$0xff] }
 0x923   : > { %10618 = vtanh.f32 %v6428_v2 }
 0x92a   : > { %v10613_v42 = vpop.eup %10612 }
 0x92b   : > { %v10615_v44 = vpop.eup %10614  ;;  %v6433_v41 = vadd.f32 1.0, %v10613_v42  ;;  %v13883_v42 = vld [vmem:[#allocation86_spill] sm:$0xff] }
 0x92c   : > { %v6439_v39 = vadd.f32 1.0, %v10615_v44  ;;  %v10617_v26 = vpop.eup %10616 }
 0x92d   : > { %10620 = vrcp.f32 %v6433_v41  ;;  %v10619_v1 = vpop.eup %10618  ;;  %v6446_v6 = vadd.f32 1.0, %v10617_v26 }
 0x92e   : > { %10622 = vrcp.f32 %v6439_v39 }
 0x92f   : > { %10624 = vrcp.f32 %v6446_v6  ;;  %v13058_v6 = vld [vmem:[#allocation12 + $0x8] ss:$16 sps:$4 sm:$0xff]  }
 0x937   : > { %v10621_v49 = vpop.eup %10620 }
 0x938   : > { %v10623_v55 = vpop.eup %10622  ;;  %v6450_v19 = vmul.f32 %v10621_v49, %v10619_v1 }
 0x939   : > { %v6449_v4 = vmul.f32 %v10623_v55, %v12827_v0  ;;  %v6689_v21 = vpop.f32.mrb[72].mxu0  ;;  %v6730_v12 = vpop.f32.mrb[104].mxu1 }
 0x93a   : > { %v6737_v7 = vadd.f32 %v6689_v21, %v13880_v13  ;;  %v6739_v16 = vadd.f32 %v6730_v12, %v13881_v15  ;;  %v6691_v54 = vpop.f32.mrb[73].mxu0  ;;  %v6732_v61 = vpop.f32.mrb[105].mxu1 }
 0x93b   : > { %v13049_v8 = vadd.f32 %v6450_v19, %v6449_v4  ;;  %v6738_v2 = vadd.f32 %v6691_v54, %v13882_v51  ;;  %v6740_v44 = vadd.f32 %v6732_v61, %v13883_v42  ;;  %v6693_v41 = vpop.f32.mrb[74].mxu0  ;;  %v6734_v39 = vpop.f32.mrb[106].mxu1  ;;  %v13056_v54 = vld [vmem:[#allocation12] ss:$16 sps:$4 sm:$0xff]   ;;  %v13062_v51 = vld [vmem:[#allocation12 + $0x24] ss:$16 sps:$4 sm:$0xff]  }
 0x93c   : > { %v9409_v26 = vmul.f32 -1.442695, %v6737_v7  ;;  %v6694_v1 = vpop.f32.mrb[75].mxu0  ;;  %v6735_v0 = vpop.f32.mrb[107].mxu1  ;;  %v13068_v42 = vld [vmem:[#allocation12 + $0x20] ss:$16 sps:$4 sm:$0xff]  }
 0x93d   : > { %v9410_v49 = vmul.f32 -1.442695, %v6738_v2  ;;  %10626 = vtanh.f32 %v13049_v8  ;;  %v9411_v55 = vmul.f32 -1.442695, %v6740_v44  ;;  %v10625_v21 = vpop.eup %10624  ;;  %v13064_v2 = vld [vmem:[#allocation12 + $0x2c] ss:$16 sps:$4 sm:$0xff]  }
 0x93e   : > { %10628 = vpow2.f32 %v9409_v26  ;;  %v13070_v44 = vld [vmem:[#allocation12 + $0x28] ss:$16 sps:$4 sm:$0xff]   ;;  %v13076_v41 = vld [vmem:[#allocation12 + $0x4c] ss:$16 sps:$4 sm:$0xff]   ;;  %v13082_v39 = vld [vmem:[#allocation12 + $0x40] ss:$16 sps:$4 sm:$0xff]  }
 0x93f   : > { %10630 = vpow2.f32 %v9410_v49  ;;  %13885 = vst [vmem:[#allocation48_spill] sm:$0xff] %v13076_v41  ;;  %13886 = vst [vmem:[#allocation49_spill] sm:$0xff] %v13082_v39  ;;  %v13084_v26 = vld [vmem:[#allocation12 + $0x48] ss:$16 sps:$4 sm:$0xff]   ;;  %v13088_v1 = vld [vmem:[#allocation12 + $0x64] ss:$16 sps:$4 sm:$0xff]  }
 0x940   : > { %10632 = vpow2.f32 %v9411_v55  ;;  %13887 = vst [vmem:[#allocation50_spill] sm:$0xff] %v13084_v26  ;;  %v13090_v0 = vld [vmem:[#allocation12 + $0x6c] ss:$16 sps:$4 sm:$0xff]  }
 0x941   : > { %10634 = vtanh.f32 %v6739_v16  ;;  %v13074_v16 = vld [vmem:[#allocation12 + $0x44] ss:$16 sps:$4 sm:$0xff]  }
 0x947   : > { %v10627_v12 = vpop.eup %10626 }
 0x948   : > { %v10629_v19 = vpop.eup %10628  ;;  %v13054_v4 = vmul.f32 %v10627_v12, %v10625_v21  ;;  %v13094_v12 = vld [vmem:[#allocation12 + $0x60] ss:$16 sps:$4 sm:$0xff]  }
 0x949   : > { %v10631_v13 = vpop.eup %10630  ;;  %v6744_v15 = vadd.f32 1.0, %v10629_v19  ;;  %v13096_v19 = vld [vmem:[#allocation12 + $0x68] ss:$16 sps:$4 sm:$0xff]  }
 0x94a   : > { %13884 = vst [vmem:[#allocation47_spill] sm:$0xff] %v13054_v4  ;;  %v6750_v7 = vadd.f32 1.0, %v10631_v13  ;;  %v6798_v61 = vpack.c.bf16 %v13054_v4, %v13054_v4  ;;  %v10633_v49 = vpop.eup %10632  ;;  %13888 = vst [vmem:[#allocation51_spill] sm:$0xff] %v13096_v19  ;;  %v13102_v4 = vld [vmem:[#allocation12 + $0x8c] ss:$16 sps:$4 sm:$0xff]  }
 0x94b   : > { %10636 = vrcp.f32 %v6744_v15  ;;  %v10635_v55 = vpop.eup %10634  ;;  %13890 = vst [vmem:[#allocation71_spill] sm:$0xff] %v13102_v4 }
 0x94c   : > { %10638 = vrcp.f32 %v6750_v7  ;;  %7024 = vmatmul.mubr.bf16.vlgmr.msra.gmra.mrb[76].mxu0 %v6798_v61  ;;  %7065 = vmatmul.mubr.bf16.vlgmr.msra.gmra.mrb[108].mxu1 %v6798_v61  ;;  %v6757_v7 = vadd.f32 1.0, %v10633_v49  ;;  %v13100_v61 = vld [vmem:[#allocation12 + $0x84] ss:$16 sps:$4 sm:$0xff]  }
 0x94d   : > { %7234 = vmatpush1.bf16.msra.mxu0 %v13056_v54  ;;  %7275 = vmatpush1.bf16.msra.mxu1 %v13058_v6  ;;  %13889 = vst [vmem:[#allocation53_spill] sm:$0xff] %v13100_v61  ;;  %v13115_v49 = vld [vmem:[#allocation12 + $0xa4] ss:$16 sps:$4 sm:$0xff]  }
 0x94e   : > { %7235 = vmatprep.subr.bf16.mxu0 %v13062_v51  ;;  %7276 = vmatprep.subr.bf16.mxu1 %v13064_v2  ;;  %10640 = vrcp.f32 %v6757_v7  ;;  %13893 = vst [vmem:[#allocation84_spill] sm:$0xff] %v13115_v49  ;;  %v13134_v7 = vld [vmem:[#allocation12 + $0xc0] ss:$16 sps:$4 sm:$0xff]  }
 0x94f   : > { %7265 = vmatprep.mubr.bf16.mxu0 %v13690_v43  ;;  %7306 = vmatprep.mubr.bf16.mxu1 %v13690_v43 }
 0x951   : > { %7236 = vmatpush1.bf16.msra.mxu0 %v13068_v42  ;;  %7277 = vmatpush1.bf16.msra.mxu1 %v13070_v44 }
 0x952   : > { %7237 = vmatprep.subr.bf16.mxu0 %v13074_v16  ;;  %7278 = vmatprep.subr.bf16.mxu1 %v13076_v41 }
 0x955   : > { %v10637_v21 = vpop.eup %10636  ;;  %7238 = vmatpush1.bf16.msra.mxu0 %v13082_v39  ;;  %7279 = vmatpush1.bf16.msra.mxu1 %v13084_v26  ;;  %v13109_v26 = vld [vmem:[#allocation12 + $0x80] ss:$16 sps:$4 sm:$0xff]  }
 0x956   : > { %v10639_v13 = vpop.eup %10638  ;;  %v6761_v15 = vmul.f32 %v10637_v21, %v10635_v55  ;;  %7239 = vmatprep.subr.bf16.mxu0 %v13088_v1  ;;  %7280 = vmatprep.subr.bf16.mxu1 %v13090_v0  ;;  %13891 = vst [vmem:[#allocation83_spill] sm:$0xff] %v13109_v26  ;;  %v13111_v55 = vld [vmem:[#allocation12 + $0x88] ss:$16 sps:$4 sm:$0xff]   ;;  %v13117_v21 = vld [vmem:[#allocation12 + $0xac] ss:$16 sps:$4 sm:$0xff]  }
 0x957   : > { %v6760_v41 = vmul.f32 %v10639_v13, %v12851_v9  ;;  %13892 = vst [vmem:[#allocation72_spill] sm:$0xff] %v13111_v55  ;;  %13894 = vst [vmem:[#allocation79_spill] sm:$0xff] %v13117_v21  ;;  %v13122_v9 = vld [vmem:[#allocation12 + $0xa0] ss:$16 sps:$4 sm:$0xff]   ;;  %v13128_v13 = vld [vmem:[#allocation12 + $0xc4] ss:$16 sps:$4 sm:$0xff]  }
 0x958   : > { %13895 = vst [vmem:[#allocation68_spill] sm:$0xff] %v13122_v9  ;;  %13897 = vst [vmem:[#allocation52_spill] sm:$0xff] %v13128_v13 }
 0x959   : > { %v13105_v39 = vadd.f32 %v6761_v15, %v6760_v41  ;;  %7240 = vmatpush1.bf16.msra.mxu0 %v13094_v12  ;;  %7281 = vmatpush1.bf16.msra.mxu1 %v13096_v19  ;;  %v13124_v41 = vld [vmem:[#allocation12 + $0xa8] ss:$16 sps:$4 sm:$0xff]   ;;  %v13130_v15 = vld [vmem:[#allocation12 + $0xcc] ss:$16 sps:$4 sm:$0xff]  }
 0x95a   : > { %7241 = vmatprep.subr.bf16.mxu0 %v13100_v61  ;;  %7282 = vmatprep.subr.bf16.mxu1 %v13102_v4  ;;  %13896 = vst [vmem:[#allocation80_spill] sm:$0xff] %v13124_v41  ;;  %13898 = vst [vmem:[#allocation54_spill] sm:$0xff] %v13130_v15  ;;  %v10404_v19 = vld [vmem:[#allocation9] ss:$16 sps:$4 sm:$0xff]  }
 0x95b   : > { %10642 = vtanh.f32 %v13105_v39 }
 0x95d   : > { %7242 = vmatpush1.bf16.msra.mxu0 %v13109_v26  ;;  %7283 = vmatpush1.bf16.msra.mxu1 %v13111_v55  ;;  %v13136_v26 = vld [vmem:[#allocation12 + $0xc8] ss:$16 sps:$4 sm:$0xff]   ;;  %v13140_v55 = vld [vmem:[#allocation12 + $0xe4] ss:$16 sps:$4 sm:$0xff]  }
 0x95e   : > { %7243 = vmatprep.subr.bf16.mxu0 %v13115_v49  ;;  %7284 = vmatprep.subr.bf16.mxu1 %v13117_v21  ;;  %13899 = vst [vmem:[#allocation56_spill] sm:$0xff] %v13136_v26  ;;  %13900 = vst [vmem:[#allocation57_spill] sm:$0xff] %v13140_v55  ;;  %v13142_v49 = vld [vmem:[#allocation12 + $0xec] ss:$16 sps:$4 sm:$0xff]   ;;  %v10641_v21 = vpop.eup %10640 }
 0x961   : > { %7244 = vmatpush1.bf16.msra.mxu0 %v13122_v9  ;;  %7285 = vmatpush1.bf16.msra.mxu1 %v13124_v41  ;;  %v13146_v9 = vld [vmem:[#allocation12 + $0xe0] ss:$16 sps:$4 sm:$0xff]   ;;  %v13148_v41 = vld [vmem:[#allocation12 + $0xe8] ss:$16 sps:$4 sm:$0xff]  }
 0x962   : > { %7245 = vmatprep.subr.bf16.mxu0 %v13128_v13  ;;  %7286 = vmatprep.subr.bf16.mxu1 %v13130_v15  ;;  %v10406_v15 = vld [vmem:[#allocation9 + $0x4] ss:$16 sps:$4 sm:$0xff]  }
 0x965   : > { %v10643_v4 = vpop.eup %10642  ;;  %7246 = vmatpush1.bf16.msra.mxu0 %v13134_v7  ;;  %7287 = vmatpush1.bf16.msra.mxu1 %v13136_v26  ;;  %v10409_v26 = vld [vmem:[#allocation9 + $0x24] ss:$16 sps:$4 sm:$0xff]  }
 0x966   : > { %7247 = vmatprep.subr.bf16.mxu0 %v13140_v55  ;;  %7288 = vmatprep.subr.bf16.mxu1 %v13142_v49  ;;  %v6764_v13 = vmul.f32 %v10643_v4, %v10641_v21  ;;  %v10407_v55 = vld [vmem:[#allocation9 + $0x20] ss:$16 sps:$4 sm:$0xff]   ;;  %v10412_v4 = vld [vmem:[#allocation9 + $0x44] ss:$16 sps:$4 sm:$0xff]  }
 0x967   : > { %v10410_v21 = vld [vmem:[#allocation9 + $0x40] ss:$16 sps:$4 sm:$0xff]  }
 0x968   : > { %v6765_v61 = vpack.c.bf16 %v6764_v13, %v6764_v13 }
 0x969   : > { %7248 = vmatpush1.bf16.msra.mxu0 %v13146_v9  ;;  %7289 = vmatpush1.bf16.msra.mxu1 %v13148_v41 }
 0x96a   : > { %7544 = vmatprep.subr.bf16.mxu0 %v10406_v15  ;;  %7585 = vmatprep.subr.bf16.mxu1 %v12870_v5  ;;  %v10415_v5 = vld [vmem:[#allocation9 + $0x64] ss:$16 sps:$4 sm:$0xff]  }
 0x96c   : > { %7266 = vmatmul.mubr.bf16.vlgmr.msra.gmra.mrb[80].mxu0 %v6765_v61  ;;  %7307 = vmatmul.mubr.bf16.vlgmr.msra.gmra.mrb[112].mxu1 %v6765_v61 }
 0x96d   : > { %7545 = vmatpush1.bf16.msra.mxu0 %v10404_v19  ;;  %7586 = vmatpush1.bf16.msra.mxu1 %v12874_v50  ;;  %v10413_v50 = vld [vmem:[#allocation9 + $0x60] ss:$16 sps:$4 sm:$0xff]  }
 0x96e   : > { %7546 = vmatprep.subr.bf16.mxu0 %v10409_v26  ;;  %7587 = vmatprep.subr.bf16.mxu1 %v12878_v63  ;;  %v10418_v63 = vld [vmem:[#allocation9 + $0x84] ss:$16 sps:$4 sm:$0xff]   ;;  %v10416_v26 = vld [vmem:[#allocation9 + $0x80] ss:$16 sps:$4 sm:$0xff]  }
 0x96f   : > { %7576 = vmatprep.mubr.bf16.mxu0 %v13690_v43  ;;  %7617 = vmatprep.mubr.bf16.mxu1 %v13690_v43 }
 0x971   : > { %7547 = vmatpush1.bf16.msra.mxu0 %v10407_v55  ;;  %7588 = vmatpush1.bf16.msra.mxu1 %v12882_v60  ;;  %v10421_v60 = vld [vmem:[#allocation9 + $0xa4] ss:$16 sps:$4 sm:$0xff]  }
 0x972   : > { %7548 = vmatprep.subr.bf16.mxu0 %v10412_v4  ;;  %7589 = vmatprep.subr.bf16.mxu1 %v12886_v59  ;;  %v10419_v59 = vld [vmem:[#allocation9 + $0xa0] ss:$16 sps:$4 sm:$0xff]  }
 0x975   : > { %7549 = vmatpush1.bf16.msra.mxu0 %v10410_v21  ;;  %7590 = vmatpush1.bf16.msra.mxu1 %v12892_v25  ;;  %v10424_v25 = vld [vmem:[#allocation9 + $0xc4] ss:$16 sps:$4 sm:$0xff]  }
 0x976   : > { %7550 = vmatprep.subr.bf16.mxu0 %v10415_v5  ;;  %7591 = vmatprep.subr.bf16.mxu1 %v12896_v28  ;;  %v10422_v28 = vld [vmem:[#allocation9 + $0xc0] ss:$16 sps:$4 sm:$0xff]  }
 0x979   : > { %7551 = vmatpush1.bf16.msra.mxu0 %v10413_v50  ;;  %7592 = vmatpush1.bf16.msra.mxu1 %v12900_v29  ;;  %v10427_v29 = vld [vmem:[#allocation9 + $0xe4] ss:$16 sps:$4 sm:$0xff]  }
 0x97a   : > { %7552 = vmatprep.subr.bf16.mxu0 %v10418_v63  ;;  %7593 = vmatprep.subr.bf16.mxu1 %v12904_v58  ;;  %v10425_v58 = vld [vmem:[#allocation9 + $0xe0] ss:$16 sps:$4 sm:$0xff]  }
 0x97d   : > { %7553 = vmatpush1.bf16.msra.mxu0 %v10416_v26  ;;  %7594 = vmatpush1.bf16.msra.mxu1 %v12908_v48  ;;  %v13901_v48 = vld [vmem:[#allocation77_spill] sm:$0xff] }
 0x97e   : > { %7554 = vmatprep.subr.bf16.mxu0 %v10421_v60  ;;  %7595 = vmatprep.subr.bf16.mxu1 %v12912_v46  ;;  %v13902_v46 = vld [vmem:[#allocation66_spill] sm:$0xff] }
 0x981   : > { %7555 = vmatpush1.bf16.msra.mxu0 %v10419_v59  ;;  %7596 = vmatpush1.bf16.msra.mxu1 %v12916_v30  ;;  %v13903_v30 = vld [vmem:[#allocation69_spill] sm:$0xff] }
 0x982   : > { %7556 = vmatprep.subr.bf16.mxu0 %v10424_v25  ;;  %7597 = vmatprep.subr.bf16.mxu1 %v12920_v37  ;;  %v13904_v37 = vld [vmem:[#allocation81_spill] sm:$0xff] }
 0x985   : > { %7557 = vmatpush1.bf16.msra.mxu0 %v10422_v28  ;;  %7598 = vmatpush1.bf16.msra.mxu1 %v12924_v11  ;;  %v13905_v11 = vld [vmem:[#allocation70_spill] sm:$0xff] }
 0x986   : > { %7558 = vmatprep.subr.bf16.mxu0 %v10427_v29  ;;  %7599 = vmatprep.subr.bf16.mxu1 %v12928_v31  ;;  %v13906_v31 = vld [vmem:[#allocation82_spill] sm:$0xff] }
 0x989   : > { %7559 = vmatpush1.bf16.msra.mxu0 %v10425_v58  ;;  %7600 = vmatpush1.bf16.msra.mxu1 %v12932_v47  ;;  %v13907_v47 = vld [vmem:[#allocation38_spill] sm:$0xff] }
 0x98a   : > { %7880 = vmatprep.subr.bf16.mxu0 %v12940_v27  ;;  %7921 = vmatprep.subr.bf16.mxu1 %v12942_v22  ;;  %v13908_v27 = vld [vmem:[#allocation39_spill] sm:$0xff]  ;;  %v13909_v22 = vld [vmem:[#allocation40_spill] sm:$0xff] }
 0x98c   : > { %7577 = vmatmul.mubr.bf16.vlgmr.msra.gmra.mrb[84].mxu0 %v6765_v61  ;;  %7618 = vmatmul.mubr.bf16.vlgmr.msra.gmra.mrb[116].mxu1 %v6765_v61 }
 0x98d   : > { %7881 = vmatpush1.bf16.msra.mxu0 %v12944_v14  ;;  %7922 = vmatpush1.bf16.msra.mxu1 %v12946_v17  ;;  %v13910_v14 = vld [vmem:[#allocation41_spill] sm:$0xff]  ;;  %v13911_v17 = vld [vmem:[#allocation42_spill] sm:$0xff] }
 0x98e   : > { %7882 = vmatprep.subr.bf16.mxu0 %v12952_v18  ;;  %7923 = vmatprep.subr.bf16.mxu1 %v12954_v23  ;;  %v13912_v18 = vld [vmem:[#allocation43_spill] sm:$0xff]  ;;  %v13913_v23 = vld [vmem:[#allocation44_spill] sm:$0xff] }
 0x98f   : > { %7912 = vmatprep.mubr.bf16.mxu0 %v13690_v43  ;;  %7953 = vmatprep.mubr.bf16.mxu1 %v13690_v43 }
 0x991   : > { %7883 = vmatpush1.bf16.msra.mxu0 %v12956_v35  ;;  %7924 = vmatpush1.bf16.msra.mxu1 %v12958_v56  ;;  %v13914_v35 = vld [vmem:[#allocation45_spill] sm:$0xff]  ;;  %v13915_v56 = vld [vmem:[#allocation46_spill] sm:$0xff] }
 0x992   : > { %7884 = vmatprep.subr.bf16.mxu0 %v12964_v52  ;;  %7925 = vmatprep.subr.bf16.mxu1 %v12966_v38 }
 0x995   : > { %7885 = vmatpush1.bf16.msra.mxu0 %v12968_v32  ;;  %7926 = vmatpush1.bf16.msra.mxu1 %v12970_v3 }
 0x996   : > { %7886 = vmatprep.subr.bf16.mxu0 %v12976_v62  ;;  %7927 = vmatprep.subr.bf16.mxu1 %v12978_v10 }
 0x999   : > { %7887 = vmatpush1.bf16.msra.mxu0 %v12980_v36  ;;  %7928 = vmatpush1.bf16.msra.mxu1 %v12982_v53 }
 0x99a   : > { %7888 = vmatprep.subr.bf16.mxu0 %v12988_v57  ;;  %7929 = vmatprep.subr.bf16.mxu1 %v12990_v33 }
 0x99d   : > { %7889 = vmatpush1.bf16.msra.mxu0 %v12992_v34  ;;  %7930 = vmatpush1.bf16.msra.mxu1 %v13901_v48 }
 0x99e   : > { %7890 = vmatprep.subr.bf16.mxu0 %v13902_v46  ;;  %7931 = vmatprep.subr.bf16.mxu1 %v13903_v30 }
 0x9a1   : > { %7891 = vmatpush1.bf16.msra.mxu0 %v13904_v37  ;;  %7932 = vmatpush1.bf16.msra.mxu1 %v13905_v11 }
 0x9a2   : > { %7892 = vmatprep.subr.bf16.mxu0 %v13906_v31  ;;  %7933 = vmatprep.subr.bf16.mxu1 %v13907_v47 }
 0x9a5   : > { %7893 = vmatpush1.bf16.msra.mxu0 %v13908_v27  ;;  %7934 = vmatpush1.bf16.msra.mxu1 %v13909_v22 }
 0x9a6   : > { %7894 = vmatprep.subr.bf16.mxu0 %v13910_v14  ;;  %7935 = vmatprep.subr.bf16.mxu1 %v13911_v17 }
 0x9a9   : > { %7895 = vmatpush1.bf16.msra.mxu0 %v13912_v18  ;;  %7936 = vmatpush1.bf16.msra.mxu1 %v13913_v23  ;;  %v13916_v23 = vld [vmem:[#allocation75_spill] sm:$0xff] }
 0x9aa   : > { %8122 = vmatprep.subr.bf16.mxu0 %v13914_v35  ;;  %8163 = vmatprep.subr.bf16.mxu1 %v13915_v56  ;;  %v13917_v56 = vld [vmem:[#allocation87_spill] sm:$0xff] }
 0xa1f   : > { %v7025_v52 = vpop.f32.mrb[76].mxu0  ;;  %v7066_v38 = vpop.f32.mrb[108].mxu1 }
 0xa20   : > { %v7027_v32 = vpop.f32.mrb[77].mxu0  ;;  %v7068_v3 = vpop.f32.mrb[109].mxu1 }
 0xa21   : > { %v7029_v62 = vpop.f32.mrb[78].mxu0  ;;  %v7070_v10 = vpop.f32.mrb[110].mxu1 }
 0xa22   : > { %v7030_v36 = vpop.f32.mrb[79].mxu0  ;;  %v7071_v53 = vpop.f32.mrb[111].mxu1  ;;  %v13918_v62 = vld [vmem:[#allocation76_spill] sm:$0xff] }
 0xa23   : > { %v13919_v36 = vld [vmem:[#allocation88_spill] sm:$0xff] }
 0xa3f   : > { %v7267_v57 = vpop.f32.mrb[80].mxu0  ;;  %v7308_v33 = vpop.f32.mrb[112].mxu1 }
 0xa40   : > { %v7268_v34 = vadd.f32 %v7267_v57, %v7025_v52  ;;  %v7309_v19 = vadd.f32 %v7308_v33, %v7066_v38  ;;  %v7269_v61 = vpop.f32.mrb[81].mxu0  ;;  %v7310_v55 = vpop.f32.mrb[113].mxu1 }
 0xa41   : > { %v7270_v13 = vadd.f32 %v7269_v61, %v7027_v32  ;;  %v7311_v15 = vadd.f32 %v7310_v55, %v7068_v3  ;;  %v7271_v4 = vpop.f32.mrb[82].mxu0  ;;  %v7312_v21 = vpop.f32.mrb[114].mxu1 }
 0xa42   : > { %v7315_v5 = vadd.f32 %v7268_v34, %v11933_v20  ;;  %v7272_v50 = vpop.f32.mrb[83].mxu0  ;;  %v7313_v63 = vpop.f32.mrb[115].mxu1  ;;  %v7317_v29 = vadd.f32 %v7309_v19, %v11948_v45 }
 0xa43   : > { %v7316_v26 = vadd.f32 %v7270_v13, %v11937_v24  ;;  %v7318_v25 = vadd.f32 %v7311_v15, %v11943_v40 }
 0xa44   : > { %v9476_v60 = vmul.f32 -1.442695, %v7315_v5 }
 0xa45   : > { %v9477_v59 = vmul.f32 -1.442695, %v7316_v26  ;;  %v9478_v28 = vmul.f32 -1.442695, %v7318_v25 }
 0xa46   : > { %10644 = vpow2.f32 %v9476_v60  ;;  %v13920_v60 = vld [vmem:[#allocation48_spill] sm:$0xff] }
 0xa47   : > { %10646 = vpow2.f32 %v9477_v59 }
 0xa48   : > { %10648 = vpow2.f32 %v9478_v28 }
 0xa49   : > { %10650 = vtanh.f32 %v7317_v29 }
 0xa50   : > { %v10645_v58 = vpop.eup %10644 }
 0xa51   : > { %v10647_v48 = vpop.eup %10646  ;;  %v7322_v46 = vadd.f32 1.0, %v10645_v58  ;;  %v13925_v58 = vld [vmem:[#allocation71_spill] sm:$0xff] }
 0xa52   : > { %v7328_v30 = vadd.f32 1.0, %v10647_v48  ;;  %v10649_v37 = vpop.eup %10648  ;;  %v13930_v48 = vld [vmem:[#allocation68_spill] sm:$0xff] }
 0xa53   : > { %10652 = vrcp.f32 %v7322_v46  ;;  %v10651_v11 = vpop.eup %10650  ;;  %v7335_v22 = vadd.f32 1.0, %v10649_v37  ;;  %v13931_v46 = vld [vmem:[#allocation80_spill] sm:$0xff]  ;;  %v13933_v37 = vld [vmem:[#allocation54_spill] sm:$0xff] }
 0xa54   : > { %10654 = vrcp.f32 %v7328_v30  ;;  %v13932_v30 = vld [vmem:[#allocation52_spill] sm:$0xff] }
 0xa55   : > { %10656 = vrcp.f32 %v7335_v22 }
 0xa5d   : > { %v10653_v31 = vpop.eup %10652 }
 0xa5e   : > { %v10655_v47 = vpop.eup %10654  ;;  %v7339_v27 = vmul.f32 %v10653_v31, %v10651_v11 }
 0xa5f   : > { %v7338_v14 = vmul.f32 %v10655_v47, %v13049_v8  ;;  %v7578_v17 = vpop.f32.mrb[84].mxu0  ;;  %v7619_v18 = vpop.f32.mrb[116].mxu1  ;;  %v13934_v47 = vld [vmem:[#allocation56_spill] sm:$0xff] }
 0xa60   : > { %v7626_v35 = vadd.f32 %v7578_v17, %v13916_v23  ;;  %v7628_v52 = vadd.f32 %v7619_v18, %v13917_v56  ;;  %v7580_v38 = vpop.f32.mrb[85].mxu0  ;;  %v7621_v32 = vpop.f32.mrb[117].mxu1  ;;  %v10429_v18 = vld [vmem:[#allocation16 + $0x8] sm:$0xff]   ;;  %v10431_v56 = vld [vmem:[#allocation16 + $0x18] sm:$0xff]  }
 0xa61   : > { %v13215_v3 = vadd.f32 %v7339_v27, %v7338_v14  ;;  %v7627_v10 = vadd.f32 %v7580_v38, %v13918_v62  ;;  %v7629_v53 = vadd.f32 %v7621_v32, %v13919_v36  ;;  %v7582_v57 = vpop.f32.mrb[86].mxu0  ;;  %v7623_v33 = vpop.f32.mrb[118].mxu1  ;;  %v13935_v27 = vld [vmem:[#allocation57_spill] sm:$0xff]  ;;  %v10428_v14 = vld [vmem:[#allocation16] sm:$0xff]   ;;  %v13937_v23 = vld [vmem:[#allocation55_spill] sm:$0xff] }
 0xa62   : > { %v9511_v34 = vmul.f32 -1.442695, %v7626_v35  ;;  %v7583_v19 = vpop.f32.mrb[87].mxu0  ;;  %v7624_v8 = vpop.f32.mrb[119].mxu1  ;;  %v10435_v38 = vld [vmem:[#allocation16 + $0x38] sm:$0xff]   ;;  %v13938_v32 = vld [vmem:[#allocation78_spill] sm:$0xff] }
 0xa63   : > { %v9512_v61 = vmul.f32 -1.442695, %v7627_v10  ;;  %10658 = vtanh.f32 %v13215_v3  ;;  %v9513_v55 = vmul.f32 -1.442695, %v7629_v53  ;;  %v10657_v13 = vpop.eup %10656  ;;  %v13939_v62 = vld [vmem:[#allocation67_spill] sm:$0xff]  ;;  %v13940_v36 = vld [vmem:[#allocation65_spill] sm:$0xff] }
 0xa64   : > { %10660 = vpow2.f32 %v9511_v34  ;;  %v8249_v10 = vpack.c.bf16 %v13939_v62, %v13938_v32  ;;  %v13941_v53 = vld [vmem:[#allocation47_spill] sm:$0xff] }
 0xa65   : > { %10662 = vpow2.f32 %v9512_v61  ;;  %v8250_v57 = vpack.c.bf16 %v13941_v53, %v13940_v36 }
 0xa66   : > { %10664 = vpow2.f32 %v9513_v55 }
 0xa67   : > { %10666 = vtanh.f32 %v7628_v52  ;;  %v10432_v52 = vld [vmem:[#allocation16 + $0x20] sm:$0xff]  }
 0xa6d   : > { %v10659_v15 = vpop.eup %10658 }
 0xa6e   : > { %v10661_v4 = vpop.eup %10660  ;;  %v13220_v21 = vmul.f32 %v10659_v15, %v10657_v13 }
 0xa6f   : > { %v10663_v5 = vpop.eup %10662  ;;  %v7633_v50 = vadd.f32 1.0, %v10661_v4 }
 0xa70   : > { %v7639_v63 = vadd.f32 1.0, %v10663_v5  ;;  %v7687_v26 = vpack.c.bf16 %v13220_v21, %v13220_v21  ;;  %v10665_v59 = vpop.eup %10664 }
 0xa71   : > { %10668 = vrcp.f32 %v7633_v50  ;;  %v7646_v29 = vadd.f32 1.0, %v10665_v59 }
 0xa72   : > { %10670 = vrcp.f32 %v7639_v63  ;;  %7913 = vmatmul.mubr.bf16.vlgmr.msra.gmra.mrb[88].mxu0 %v7687_v26  ;;  %7954 = vmatmul.mubr.bf16.vlgmr.msra.gmra.mrb[120].mxu1 %v7687_v26 }
 0xa73   : > { %8123 = vmatpush1.bf16.msra.mxu0 %v13056_v54  ;;  %8164 = vmatpush1.bf16.msra.mxu1 %v13058_v6  ;;  %v10667_v54 = vpop.eup %10666  ;;  %v13921_v6 = vld [vmem:[#allocation49_spill] sm:$0xff]  ;;  %10672 = vrcp.f32 %v7646_v29 }
 0xa74   : > { %8124 = vmatprep.subr.bf16.mxu0 %v13062_v51  ;;  %8165 = vmatprep.subr.bf16.mxu1 %v13064_v2  ;;  %v13922_v51 = vld [vmem:[#allocation50_spill] sm:$0xff] }
 0xa75   : > { %8154 = vmatprep.mubr.bf16.mxu0 %v13690_v43  ;;  %8195 = vmatprep.mubr.bf16.mxu1 %v13690_v43 }
 0xa77   : > { %8125 = vmatpush1.bf16.msra.mxu0 %v13068_v42  ;;  %8166 = vmatpush1.bf16.msra.mxu1 %v13070_v44  ;;  %v13923_v44 = vld [vmem:[#allocation51_spill] sm:$0xff] }
 0xa78   : > { %8126 = vmatprep.subr.bf16.mxu0 %v13074_v16  ;;  %8167 = vmatprep.subr.bf16.mxu1 %v13920_v60  ;;  %v13924_v16 = vld [vmem:[#allocation53_spill] sm:$0xff] }
 0xa7b   : > { %v10669_v25 = vpop.eup %10668  ;;  %8127 = vmatpush1.bf16.msra.mxu0 %v13921_v6  ;;  %8168 = vmatpush1.bf16.msra.mxu1 %v13922_v51 }
 0xa7c   : > { %v10671_v2 = vpop.eup %10670  ;;  %v7650_v28 = vmul.f32 %v10669_v25, %v10667_v54  ;;  %8128 = vmatprep.subr.bf16.mxu0 %v13088_v1  ;;  %8169 = vmatprep.subr.bf16.mxu1 %v13090_v0  ;;  %v13926_v1 = vld [vmem:[#allocation83_spill] sm:$0xff]  ;;  %v13927_v0 = vld [vmem:[#allocation72_spill] sm:$0xff] }
 0xa7d   : > { %v7649_v43 = vmul.f32 %v10671_v2, %v13105_v39  ;;  %v13928_v39 = vld [vmem:[#allocation84_spill] sm:$0xff]  ;;  %v10673_v11 = vpop.eup %10672 }
 0xa7f   : > { %v7651_v42 = vadd.f32 %v7650_v28, %v7649_v43  ;;  %8129 = vmatpush1.bf16.msra.mxu0 %v13094_v12  ;;  %8170 = vmatpush1.bf16.msra.mxu1 %v13923_v44  ;;  %v13929_v12 = vld [vmem:[#allocation79_spill] sm:$0xff] }
 0xa80   : > { %8130 = vmatprep.subr.bf16.mxu0 %v13924_v16  ;;  %8171 = vmatprep.subr.bf16.mxu1 %v13925_v58 }
 0xa81   : > { %10674 = vtanh.f32 %v7651_v42  ;;  %8235 = vst [vmem:[%s13244_s23] sm:$0xff] %v7651_v42 }
 0xa83   : > { %8131 = vmatpush1.bf16.msra.mxu0 %v13926_v1  ;;  %8172 = vmatpush1.bf16.msra.mxu1 %v13927_v0 }
 0xa84   : > { %8132 = vmatprep.subr.bf16.mxu0 %v13928_v39  ;;  %8173 = vmatprep.subr.bf16.mxu1 %v13929_v12 }
 0xa87   : > { %8133 = vmatpush1.bf16.msra.mxu0 %v13930_v48  ;;  %8174 = vmatpush1.bf16.msra.mxu1 %v13931_v46  ;;  %v13279_v46 = vld [vmem:[%s13942_s25] ss:$0 sm:$0xff] }
 0xa88   : > { %8134 = vmatprep.subr.bf16.mxu0 %v13932_v30  ;;  %8175 = vmatprep.subr.bf16.mxu1 %v13933_v37 }
 0xa8b   : > { %v10675_v31 = vpop.eup %10674  ;;  %8135 = vmatpush1.bf16.msra.mxu0 %v13134_v7  ;;  %8176 = vmatpush1.bf16.msra.mxu1 %v13934_v47  ;;  %v13936_v7 = vld [vmem:[#allocation90_spill] sm:$0xff] }
 0xa8c   : > { %8136 = vmatprep.subr.bf16.mxu0 %v13935_v27  ;;  %8177 = vmatprep.subr.bf16.mxu1 %v13142_v49  ;;  %v7653_v22 = vmul.f32 %v10675_v31, %v10673_v11  ;;  %v8248_v35 = vpack.c.bf16 %v13937_v23, %v13936_v7  ;;  %v10430_v49 = vld [vmem:[#allocation16 + $0x10] sm:$0xff]  }
 0xa8e   : > { %v7654_v17 = vpack.c.bf16 %v7653_v22, %v7653_v22  ;;  %8234 = vst [vmem:[%s13260_s1] sm:$0xff] %v7653_v22 }
 0xa8f   : > { %8137 = vmatpush1.bf16.msra.mxu0 %v13146_v9  ;;  %8178 = vmatpush1.bf16.msra.mxu1 %v13148_v41  ;;  %v10433_v9 = vld [vmem:[#allocation16 + $0x28] sm:$0xff]   ;;  %v10434_v41 = vld [vmem:[#allocation16 + $0x30] sm:$0xff]  }
 0xa90   : > { %9615 = vmatprep.subr.bf16.mxu0 %v10428_v14 }
 0xa92   : > { %8155 = vmatmul.mubr.bf16.vlgmr.msra.gmra.mrb[92].mxu0 %v7654_v17  ;;  %8196 = vmatmul.mubr.bf16.vlgmr.msra.gmra.mrb[124].mxu1 %v7654_v17 }
 0xa93   : > { %9616 = vmatpush3.bf16.msra.mxu0 %v10428_v14  ;;  %9631 = vmatprep.mubr.bf16.mxu0 %v8248_v35 }
 0xa94   : > { %9617 = vmatprep.subr.bf16.mxu0 %v10429_v18 }
 0xa97   : > { %9618 = vmatpush3.bf16.msra.mxu0 %v10429_v18 }
 0xa98   : > { %9619 = vmatprep.subr.bf16.mxu0 %v10430_v49 }
 0xa9b   : > { %9620 = vmatpush3.bf16.msra.mxu0 %v10430_v49 }
 0xa9c   : > { %9621 = vmatprep.subr.bf16.mxu0 %v10431_v56 }
 0xa9f   : > { %9622 = vmatpush3.bf16.msra.mxu0 %v10431_v56 }
 0xaa0   : > { %9623 = vmatprep.subr.bf16.mxu0 %v10432_v52 }
 0xaa3   : > { %9624 = vmatpush3.bf16.msra.mxu0 %v10432_v52 }
 0xaa4   : > { %9625 = vmatprep.subr.bf16.mxu0 %v10433_v9 }
 0xaa7   : > { %9626 = vmatpush3.bf16.msra.mxu0 %v10433_v9 }
 0xaa8   : > { %9627 = vmatprep.subr.bf16.mxu0 %v10434_v41 }
 0xaab   : > { %9628 = vmatpush3.bf16.msra.mxu0 %v10434_v41 }
 0xaac   : > { %9629 = vmatprep.subr.bf16.mxu0 %v10435_v38 }
 0xaaf   : > { %9630 = vmatpush3.bf16.msra.mxu0 %v10435_v38 }
 0xab2   : > { %9632 = vmatmul.mubr.bf16.vlgmr.msra.gmra.mrb[96].mxu0 %v8249_v10 }
 0xab3   : > { %9635 = vmatprep.mubr.bf16.mxu0 %v8250_v57 }
 0xb45   : > { %v7914_v33 = vpop.f32.mrb[88].mxu0  ;;  %v7955_v34 = vpop.f32.mrb[120].mxu1 }
 0xb46   : > { %v7916_v19 = vpop.f32.mrb[89].mxu0  ;;  %v7957_v8 = vpop.f32.mrb[121].mxu1 }
 0xb47   : > { %v7918_v61 = vpop.f32.mrb[90].mxu0  ;;  %v7959_v55 = vpop.f32.mrb[122].mxu1 }
 0xb48   : > { %v7919_v13 = vpop.f32.mrb[91].mxu0  ;;  %v7960_v15 = vpop.f32.mrb[123].mxu1 }
 0xb65   : > { %v8156_v4 = vpop.f32.mrb[92].mxu0  ;;  %v8197_v5 = vpop.f32.mrb[124].mxu1 }
 0xb66   : > { %v8157_v50 = vadd.f32 %v8156_v4, %v7914_v33  ;;  %v8198_v63 = vadd.f32 %v8197_v5, %v7955_v34  ;;  %v8158_v26 = vpop.f32.mrb[93].mxu0  ;;  %v8199_v60 = vpop.f32.mrb[125].mxu1 }
 0xb67   : > { %v8159_v59 = vadd.f32 %v8158_v26, %v7916_v19  ;;  %v8200_v54 = vadd.f32 %v8199_v60, %v7957_v8  ;;  %v8160_v25 = vpop.f32.mrb[94].mxu0  ;;  %v8201_v6 = vpop.f32.mrb[126].mxu1 }
 0xb68   : > { %v8204_v51 = vadd.f32 %v8157_v50, %v11933_v20  ;;  %v8161_v2 = vpop.f32.mrb[95].mxu0  ;;  %v8202_v28 = vpop.f32.mrb[127].mxu1  ;;  %v8206_v58 = vadd.f32 %v8198_v63, %v11948_v45 }
 0xb69   : > { %v8205_v29 = vadd.f32 %v8159_v59, %v11937_v24  ;;  %v8207_v44 = vadd.f32 %v8200_v54, %v11943_v40 }
 0xb6a   : > { %v9578_v43 = vmul.f32 -1.442695, %v8204_v51 }
 0xb6b   : > { %v9579_v42 = vmul.f32 -1.442695, %v8205_v29  ;;  %v9580_v16 = vmul.f32 -1.442695, %v8207_v44 }
 0xb6c   : > { %10676 = vpow2.f32 %v9578_v43 }
 0xb6d   : > { %10678 = vpow2.f32 %v9579_v42 }
 0xb6e   : > { %10680 = vpow2.f32 %v9580_v16 }
 0xb6f   : > { %10682 = vtanh.f32 %v8206_v58 }
 0xb76   : > { %v10677_v1 = vpop.eup %10676 }
 0xb77   : > { %v10679_v0 = vpop.eup %10678  ;;  %v8211_v39 = vadd.f32 1.0, %v10677_v1 }
 0xb78   : > { %v8217_v20 = vadd.f32 1.0, %v10679_v0  ;;  %v10681_v12 = vpop.eup %10680 }
 0xb79   : > { %10684 = vrcp.f32 %v8211_v39  ;;  %v10683_v24 = vpop.eup %10682  ;;  %v8224_v45 = vadd.f32 1.0, %v10681_v12 }
 0xb7a   : > { %10686 = vrcp.f32 %v8217_v20 }
 0xb7b   : > { %10688 = vrcp.f32 %v8224_v45 }
 0xb83   : > { %v10685_v48 = vpop.eup %10684 }
 0xb84   : > { %v10687_v40 = vpop.eup %10686  ;;  %v8228_v30 = vmul.f32 %v10685_v48, %v10683_v24 }
 0xb85   : > { %v8227_v37 = vmul.f32 %v10687_v40, %v13215_v3  ;;  %v9633_v11 = vpop.f32.mrb[96].mxu0  ;;  %v10689_v7 = vpop.eup %10688 }
 0xb86   : > { %v8366_v31 = vadd.f32 %v9633_v11, %v13279_v46  ;;  %v8357_v47 = vpop.f32.mrb[97].mxu0 }
 0xb87   : > { %v8358_v27 = vadd.f32 %v13279_v46, %v8357_v47  ;;  %v9634_v22 = vpop.f32.mrb[98].mxu0  ;;  %v8229_v14 = vadd.f32 %v8228_v30, %v8227_v37 }
 0xb88   : > { %8390 = vst [vmem:[%s13284_s19 + $0x10] sm:$0xff] %v8366_v31  ;;  %v8369_v3 = vadd.f32 %v9634_v22, %v13279_v46  ;;  %v8360_v17 = vpop.f32.mrb[99].mxu0 }
 0xb89   : > { %8388 = vst [vmem:[%s13284_s19] sm:$0xff] %v8358_v27  ;;  %v8361_v18 = vadd.f32 %v13279_v46, %v8360_v17  ;;  %10690 = vtanh.f32 %v8229_v14  ;;  %9582 = vst [vmem:[%s13244_s23 + $0x8] sm:$0xff] %v8229_v14 }
 0xb8a   : > { %8391 = vst [vmem:[%s13284_s19 + $0x18] sm:$0xff] %v8369_v3 }
 0xb8b   : > { %8389 = vst [vmem:[%s13284_s19 + $0x8] sm:$0xff] %v8361_v18 }
 0xb93   : > { %v10691_v23 = vpop.eup %10690 }
 0xb94   : > { %v8231_v35 = vmul.f32 %v10691_v23, %v10689_v7 }
 0xb96   : > { %9581 = vst [vmem:[%s13260_s1 + $0x8] sm:$0xff] %v8231_v35  ;;  %v8251_v49 = vpack.c.bf16 %v8231_v35, %v13220_v21  ;;  %s10964_s1 = sshll.u32 %s11127_s16, 4  ;;  %s10965_s1 = int_to_ptr.vmem [resolvable:$false] %s10964_s1 }
 0xb97   : > { %s10966_s8 = scalar_lea.vmem %s10965_s1, 512  ;;  %p10967_p9 = scmp.lt.s32.totalorder %s13296_s20, %s10965_s1 }
 0xb98   : > { %9636 = vmatmul.mubr.bf16.gmra.mrb[100].mxu0 %v8251_v49  ;;  %p10968_p6 = scmp.lt.s32.totalorder %s10966_s8, %s10960_s22 }
 0xb9a   : > { %p10969_p10 = por %p10968_p6, %p10967_p9 }
 0xb9c   : > { %p10970_p1 = pnand %p10969_p10, %p10963_p0 }
 0xb9e   : > { %10973 = shalt.err (!%p10970_p1)
}
 0xb9f   : > { %s10974_s15 = scalar_lea.hbm %s13304_s24, 256  ;;  %s10978_s25 = scalar_lea.hbm %s13944_s17, 512 }
 0xba0   : > { %p10975_p2 = scmp.ne.s32.totalorder %s13304_s24, %s10974_s15  ;;  %p10979_p12 = scmp.lt.u32.totalorder %s13304_s24, %s13944_s17 }
 0xba1   : > { %p10980_p3 = scmp.lt.u32.totalorder %s10978_s25, %s10974_s15  ;;  %p10982_p8 = scmp.lt.u32.totalorder %s10974_s15, %s13304_s24 }
 0xba2   : > { %p10976_p5 = pnand %p10975_p2, %p13945_p7 }
 0xba3   : > { %p10981_p13 = por %p10980_p3, %p10979_p12 }
 0xba4   : > { %p10977_p11 = pneg %p10976_p5 }
 0xba5   : > { %p10983_p0 = por %p10982_p8, %p10981_p13 }
 0xba7   : > { %p10984_p9 = pnand %p10983_p0, %p10977_p11 }
 0xba9   : > { %10987 = shalt.err (!%p10984_p9)
}
 0xbaa   : > { %s11128_s22 = smov 128   ;;  %s11129_s16 = smov 256  }
 0xbab   : > { %s11130_s1 = smov 8   ;;  %s13946_s14 = sld [smem:[#allocation97_spill]] }
 0xbac   : > { %9672 = dma.vmem_to_hbm [thread:$0]  (%p13945_p7), %s13296_s20, 256, %s13304_s24, %s13308_s18, %s11128_s22, %s11129_s16, %s11130_s1  }
 0xbad   : > { %s8450_s25 = sshll.u32 %s13244_s23, 4  ;;  %s11131_s3 = smov [#allocation23]   ;;  %s13343_s25 = int_to_ptr.vmem [resolvable:$true] %s8450_s25 }
 0xbae   : > { %s10988_s21 = scalar_lea.vmem %s13343_s25, 256  ;;  %s10992_s0 = sshll.u32 %s11131_s3, 4  ;;  %s10993_s0 = int_to_ptr.vmem [resolvable:$false] %s10992_s0 }
 0xbaf   : > { %p10989_p6 = scmp.ne.s32.totalorder %s13343_s25, %s10988_s21  ;;  %s10994_s20 = scalar_lea.vmem %s10993_s0, 512 }
 0xbb0   : > { %p10995_p2 = scmp.lt.s32.totalorder %s13343_s25, %s10993_s0  ;;  %p10996_p5 = scmp.lt.s32.totalorder %s10994_s20, %s10988_s21 }
 0xbb1   : > { %s13340_s30 = scalar_lea.hbm %s13946_s14, %s9597_s11  ;;  %p10990_p10 = pnand %p10989_p6, %p13945_p7 }
 0xbb2   : > { %p10997_p11 = por %p10996_p5, %p10995_p2 }
 0xbb3   : > { %p10991_p1 = pneg %p10990_p10 }
 0xbb5   : > { %p10998_p12 = pnand %p10997_p11, %p10991_p1 }
 0xbb7   : > { %11001 = shalt.err (!%p10998_p12)
}
 0xbb8   : > { %s11002_s23 = scalar_lea.hbm %s13340_s30, 256  ;;  %s11006_s8 = scalar_lea.hbm %s13946_s14, 512 }
 0xbb9   : > { %p11003_p3 = scmp.ne.s32.totalorder %s13340_s30, %s11002_s23  ;;  %p11007_p0 = scmp.lt.u32.totalorder %s13340_s30, %s13946_s14 }
 0xbba   : > { %p11008_p9 = scmp.lt.u32.totalorder %s11006_s8, %s11002_s23  ;;  %p11010_p10 = scmp.lt.u32.totalorder %s11002_s23, %s13340_s30 }
 0xbbb   : > { %p11004_p13 = pnand %p11003_p3, %p13945_p7 }
 0xbbc   : > { %p11009_p6 = por %p11008_p9, %p11007_p0 }
 0xbbd   : > { %p11005_p8 = pneg %p11004_p13 }
 0xbbe   : > { %p11011_p1 = por %p11010_p10, %p11009_p6 }
 0xbc0   : > { %p11012_p2 = pnand %p11011_p1, %p11005_p8 }
 0xbc2   : > { %11015 = shalt.err (!%p11012_p2)
}
 0xbc3   : > { %9673 = dma.vmem_to_hbm [thread:$0]  (%p13945_p7), %s13343_s25, 256, %s13340_s30, %s13308_s18, %s11128_s22, %s11129_s16, %s11130_s1  }
 0xbc4   : > { %s8420_s21 = sshll.u32 %s13284_s19, 4  ;;  %s9602_s3 = sshll.u32 %s11224_s29, 10  ;;  %s13374_s21 = int_to_ptr.vmem [resolvable:$true] %s8420_s21 }
 0xbc5   : > { %s13947_s30 = sld [smem:[#allocation95_spill]]  ;;  %s8397_s29 = scalar_lea.sflag [#allocation6], %s11510_s12 }
 0xbc6   : > { %s11016_s20 = scalar_lea.vmem %s13374_s21, 1024  ;;  %s11132_s23 = smov [#allocation20]  }
 0xbc7   : > { %p11017_p5 = scmp.ne.s32.totalorder %s13374_s21, %s11016_s20  ;;  %s11020_s11 = sshll.u32 %s11132_s23, 4  ;;  %s11021_s11 = int_to_ptr.vmem [resolvable:$false] %s11020_s11 }
 0xbc8   : > { %s11022_s24 = scalar_lea.vmem %s11021_s11, 2048  ;;  %p11023_p3 = scmp.lt.s32.totalorder %s13374_s21, %s11021_s11 }
 0xbc9   : > { %p11018_p11 = pnand %p11017_p5, %p13945_p7  ;;  %p11024_p13 = scmp.lt.s32.totalorder %s11022_s24, %s11016_s20 }
 0xbcb   : > { %s13383_s25 = scalar_lea.hbm %s13947_s30, %s9602_s3  ;;  %p11019_p12 = pneg %p11018_p11 }
 0xbcc   : > { %p11025_p8 = por %p11024_p13, %p11023_p3 }
 0xbce   : > { %p11026_p0 = pnand %p11025_p8, %p11019_p12 }
 0xc6b   : > { %v9637_v21 = vpop.f32.mrb[100].mxu0 }
 0xc6c   : > { %v8382_v56 = vadd.f32 %v9637_v21, %v13279_v46  ;;  %v8373_v52 = vpop.f32.mrb[101].mxu0 }
 0xc6d   : > { %v8374_v9 = vadd.f32 %v13279_v46, %v8373_v52  ;;  %v9638_v41 = vpop.f32.mrb[102].mxu0 }
 0xc6e   : > { %8394 = vst [vmem:[%s13284_s19 + $0x30] sm:$0xff] %v8382_v56  ;;  %v8385_v38 = vadd.f32 %v9638_v41, %v13279_v46  ;;  %v8376_v32 = vpop.f32.mrb[103].mxu0 }
 0xc6f   : > { %8392 = vst [vmem:[%s13284_s19 + $0x20] sm:$0xff] %v8374_v9  ;;  %v8377_v62 = vadd.f32 %v13279_v46, %v8376_v32 }
 0xc70   : > { %8395 = vst [vmem:[%s13284_s19 + $0x38] sm:$0xff] %v8385_v38 }
 0xc71   : > { %8393 = vst [vmem:[%s13284_s19 + $0x28] sm:$0xff] %v8377_v62 }
 0xc72   : > { %11029 = shalt.err (!%p11026_p0)
}
 0xc73   : > { %s11030_s19 = scalar_lea.hbm %s13383_s25, 1024  ;;  %s11034_s0 = scalar_lea.hbm %s13947_s30, 2048 }
 0xc74   : > { %p11031_p9 = scmp.ne.s32.totalorder %s13383_s25, %s11030_s19  ;;  %p11035_p1 = scmp.lt.u32.totalorder %s13383_s25, %s13947_s30 }
 0xc75   : > { %p11036_p2 = scmp.lt.u32.totalorder %s11034_s0, %s11030_s19  ;;  %p11038_p11 = scmp.lt.u32.totalorder %s11030_s19, %s13383_s25 }
 0xc76   : > { %p11032_p6 = pnand %p11031_p9, %p13945_p7 }
 0xc77   : > { %p11037_p5 = por %p11036_p2, %p11035_p1 }
 0xc78   : > { %p11033_p10 = pneg %p11032_p6 }
 0xc79   : > { %p11039_p12 = por %p11038_p11, %p11037_p5 }
 0xc7b   : > { %p11040_p3 = pnand %p11039_p12, %p11033_p10 }
 0xc7d   : > { %11043 = shalt.err (!%p11040_p3)
}
 0xc7e   : > { %9671 = dma.vmem_to_hbm [thread:$0]  (%p13945_p7), %s13374_s21, 1024, %s13383_s25, %s8397_s29, %s11128_s22, %s11128_s22, %s11130_s1  }
 0xc7f PF: > { %s13948_s16 = sld [smem:[#allocation32_spill]]  ;;  %s13949_s20 = sld [smem:[#allocation37_spill]] }
 0xc85   : > { %s8465_s23 = sand.u32 1, %s13948_s16   ;;  %p13950_p13 = scmp.ne.s32.totalorder %s13949_s20, 0 }
 0xc86   : > { %s8466_s11 = scalar_lea.sflag [#allocation6], %s8465_s23 }
 0xc87   : > { %p9700_p8 = pnand %p8705_p4, %p13950_p13 }
 0xc89   : > { %11085 = dma.done.wait (!%p9700_p8), %s8466_s11, 1024  }
 0xc8a   : > { %11087 = vsyncadd (!%p9700_p8), %s8466_s11, 4294966272  ;;  %s13951_s13 = sadd.s32 4294967294, %s11106_s28  }
 0xc8b   : > { %s8474_s24 = sand.u32 1, %s13951_s13  }
 0xc8c   : > { %s8475_s19 = scalar_lea.sflag [#allocation22], %s8474_s24 }
 0xc8d   : > { %11089 = dma.done.wait (!%p9700_p8), %s8475_s19, 512  }
 0xc8e   : > { %11091 = vsyncadd (!%p9700_p8), %s8475_s19, 4294966784  ;;  %s13952_s28 = sld [smem:[#allocation33_spill]]  ;;  %s13953_s12 = sld [smem:[#allocation34_spill]] }
 0xc8f   : > { %s13954_s25 = smov %s11098_s26  ;;  %s13955_s26 = smov %s11102_s27 }
 0xc94   : > { %p34_p7 = scmp.ge.s32.totalorder %s13952_s28, 4   ;;  %s13956_s27 = smov %s13953_s12 }
 0xc96   :  { %36 = sbr.rel (!%p34_p7) target bundleno = 19 (0x13), region = 245 }
 0xc9d   :  { %8489 = vsyncpa [#allocation5], 1 }
 0xc9e   :  { %8491 = vsyncpa [#allocation5 + $0x1], 1 }
 0xc9f   :  { %8492 = vsyncpa [#allocation8], 1 }
 0xca0   :  { %8493 = vsyncpa [#allocation11], 1 }
 0xca1   :  { %8494 = vsyncpa [#allocation14], 1 }
 0xca2   :  { %8495 = vsyncpa [#allocation17], 1 }
 0xca3   :  { %8496 = vsyncpa [#allocation6], 1 }
 0xca4   :  { %8498 = vsyncpa [#allocation6 + $0x1], 1 }
 0xca5   :  { %8499 = vsyncpa [#allocation22], 1 }
 0xca6   :  { %8501 = vsyncpa [#allocation22 + $0x1], 1 }

</bundles_post_ra>
